<compile_context>
chip_gen: v6e
topology: v6e:2x2x1
jax: 0.10.0
libtpu: 0.0.40
codegen_flags: <defaults>
</compile_context>

<pallas_src>
import jax
import jax.numpy as jnp
from jax import lax
from jax.experimental import pallas as pl
from jax.experimental.pallas import tpu as pltpu

# Module hyper-parameters (fixed by WNSpecEncoder.__init__)
NUM_BLOCKS = 2
NUM_LAYERS = 4
DILATION_RATE = 3
KERNEL_SIZE = 3

MAX_DIL = DILATION_RATE ** (NUM_LAYERS - 1)          # 27
PAD = ((MAX_DIL + 7) // 8) * 8                       # 32: halo size, sublane-aligned


# --------------------------------------------------------------------------------------
# Pallas kernel: whole forward pass for one batch element (grid over batch).
# --------------------------------------------------------------------------------------
def wn_spec_encoder_kernel(
    x_ref,        # (1, T, Cin)
    w_in_ref,     # (Cin, H)                 1x1 in_layer weight (transposed)
    b_in_ref,     # (1, H)
    w_gate_ref,   # (NB*NL*3, H, 2H)         per (layer, tap) fused [tanh | sigmoid] weights
    b_gate_ref,   # (NB*NL, 1, 2H)
    w_rs_ref,     # (NB*(NL-1), H, 2H)       fused [residual | skip] 1x1 weights
    b_rs_ref,     # (NB*(NL-1), 1, 2H)
    w_skl_ref,    # (NB, H, H)               last-layer skip-only 1x1 weights
    b_skl_ref,    # (NB, 1, H)
    w_out_ref,    # (H, H)                   1x1 out_layer weight (transposed)
    b_out_ref,    # (1, H)
    o_ref,        # (1, T, H)
    pad_ref,      # scratch (T + 2*PAD, H)   zero-padded halo buffer for dilated taps
):
    f32 = jnp.float32
    x = x_ref[0]                      # (T, Cin)
    T = x.shape[0]
    H = w_in_ref.shape[1]

    # in_layer (1x1 conv) + ReLU
    h = jnp.dot(x, w_in_ref[...], preferred_element_type=f32) + b_in_ref[...]
    h = jnp.maximum(h, 0.0)           # (T, H)

    # Zero the halo scratch once; only the [PAD:PAD+T] center is rewritten per layer, so
    # the halos stay zero and provide exact conv zero-padding at the sequence boundaries.
    pad_ref[...] = jnp.zeros_like(pad_ref)

    for nb in range(NUM_BLOCKS):
        cur = h
        out = jnp.zeros_like(h)
        for nl in range(NUM_LAYERS):
            idx = nb * NUM_LAYERS + nl
            dil = DILATION_RATE ** nl            # 1, 3, 9, 27  (all <= PAD)

            # Dilated taps via the halo scratch: cheap static-slice loads, no MXU work.
            pad_ref[PAD:PAD + T, :] = cur
            x_prev = pad_ref[PAD - dil:PAD - dil + T, :]   # cur[t - dil], 0 when OOB
            x_next = pad_ref[PAD + dil:PAD + dil + T, :]   # cur[t + dil], 0 when OOB

            # Dilated conv taps (-dil, 0, +dil) with fused [tanh | sigmoid] gate weights:
            # one (T,H)x(H,2H) matmul per tap.
            b3 = 3 * idx
            pre = (b_gate_ref[idx]
                   + jnp.dot(x_prev, w_gate_ref[b3 + 0], preferred_element_type=f32)
                   + jnp.dot(cur,    w_gate_ref[b3 + 1], preferred_element_type=f32)
                   + jnp.dot(x_next, w_gate_ref[b3 + 2], preferred_element_type=f32))

            # fused_add_tanh_sigmoid_multiply (g = 0)
            acts = jnp.tanh(pre[:, :H]) * jax.nn.sigmoid(pre[:, H:])   # (T, H)

            if nl < NUM_LAYERS - 1:
                # fused [residual | skip] 1x1 conv
                ridx = nb * (NUM_LAYERS - 1) + nl
                rs = jnp.dot(acts, w_rs_ref[ridx], preferred_element_type=f32) + b_rs_ref[ridx]
                cur = cur + rs[:, :H]
                out = out + rs[:, H:]
            else:
                # last layer of the block: residual path statically absent, skip-only conv
                out = out + (jnp.dot(acts, w_skl_ref[nb], preferred_element_type=f32)
                             + b_skl_ref[nb])
        h = out

    # out_layer (1x1 conv)
    o_ref[0] = jnp.dot(h, w_out_ref[...], preferred_element_type=f32) + b_out_ref[...]


# --------------------------------------------------------------------------------------
# Wrapper
# --------------------------------------------------------------------------------------
_PARAM_ORDER = ["w_in", "b_in", "w_gate", "b_gate", "w_rs", "b_rs",
                "w_skip_last", "b_skip_last", "w_out", "b_out"]


def _full_spec(w):
    nd = w.ndim
    return pl.BlockSpec(w.shape, lambda b, _nd=nd: (0,) * _nd)


def wn_spec_encoder(x_btc, params):
    """x_btc: (B, T, Cin) channels-last. Returns (B, T, H)."""
    B, T, Cin = x_btc.shape
    H = params["w_in"].shape[1]
    weights = [params[k] for k in _PARAM_ORDER]
    return pl.pallas_call(
        wn_spec_encoder_kernel,
        out_shape=jax.ShapeDtypeStruct((B, T, H), jnp.float32),
        grid=(B,),
        in_specs=[pl.BlockSpec((1, T, Cin), lambda b: (b, 0, 0))]
                 + [_full_spec(w) for w in weights],
        out_specs=pl.BlockSpec((1, T, H), lambda b: (b, 0, 0)),
        scratch_shapes=[pltpu.VMEM((T + 2 * PAD, H), jnp.float32)],
        compiler_params=pltpu.CompilerParams(
            dimension_semantics=("parallel",),
            vmem_limit_bytes=48 * 1024 * 1024),
    )(x_btc, *weights)


# --------------------------------------------------------------------------------------
# Deterministic synthetic parameters (PyTorch Conv1d shapes), converted to kernel layout.
# --------------------------------------------------------------------------------------
def build_torch_params(key, in_channels, out_channels):
    H = out_channels
    keys = iter(jax.random.split(key, 64))

    def nrm(shape, scale):
        return (scale * jax.random.normal(next(keys), shape)).astype(jnp.float32)

    tp = {
        "in_w": nrm((H, in_channels, 1), 1.0 / (in_channels ** 0.5)),
        "in_b": nrm((H,), 0.1),
        "wn_in_w": [], "wn_in_b": [], "wn_rs_w": [], "wn_rs_b": [],
        "out_w": None, "out_b": None,
    }
    for _nb in range(NUM_BLOCKS):
        iw, ib, rw, rb = [], [], [], []
        for nl in range(NUM_LAYERS):
            iw.append(nrm((2 * H, H, KERNEL_SIZE), 1.0 / ((H * KERNEL_SIZE) ** 0.5)))
            ib.append(nrm((2 * H,), 0.1))
            R = 2 * H if nl < NUM_LAYERS - 1 else H
            rw.append(nrm((R, H, 1), 1.0 / (H ** 0.5)))
            rb.append(nrm((R,), 0.1))
        tp["wn_in_w"].append(iw); tp["wn_in_b"].append(ib)
        tp["wn_rs_w"].append(rw); tp["wn_rs_b"].append(rb)
    tp["out_w"] = nrm((H, H, 1), 1.0 / (H ** 0.5))
    tp["out_b"] = nrm((H,), 0.1)
    return tp


def to_pallas_params(tp):
    """Pack torch-layout weights into fused, stacked kernel-layout weights."""
    H = tp["in_w"].shape[0]
    p = {
        "w_in": tp["in_w"][:, :, 0].T,          # (Cin, H)
        "b_in": tp["in_b"][None, :],            # (1, H)
        "w_out": tp["out_w"][:, :, 0].T,        # (H, H)
        "b_out": tp["out_b"][None, :],          # (1, H)
    }
    w_gate, b_gate = [], []
    w_rs, b_rs = [], []
    w_skl, b_skl = [], []
    for nb in range(NUM_BLOCKS):
        for nl in range(NUM_LAYERS):
            w = tp["wn_in_w"][nb][nl]           # (2H, H, 3): rows [:H] tanh, [H:] sigmoid
            b = tp["wn_in_b"][nb][nl]           # (2H,)
            for k in range(KERNEL_SIZE):
                # fuse tanh/sigmoid halves into one (H, 2H) matrix per tap
                w_gate.append(jnp.concatenate([w[:H, :, k].T, w[H:, :, k].T], axis=1))
            b_gate.append(b[None, :])           # already ordered [tanh | sigmoid]
            rw = tp["wn_rs_w"][nb][nl][:, :, 0]
            rb = tp["wn_rs_b"][nb][nl]
            if nl < NUM_LAYERS - 1:
                # fuse residual/skip halves into one (H, 2H) matrix
                w_rs.append(jnp.concatenate([rw[:H].T, rw[H:].T], axis=1))
                b_rs.append(rb[None, :])
            else:                               # last layer: skip-only, residual removed
                w_skl.append(rw.T)              # (H, H)
                b_skl.append(rb[None, :])       # (1, H)
    p["w_gate"] = jnp.stack(w_gate)             # (NB*NL*3, H, 2H)
    p["b_gate"] = jnp.stack(b_gate)             # (NB*NL, 1, 2H)
    p["w_rs"] = jnp.stack(w_rs)                 # (NB*(NL-1), H, 2H)
    p["b_rs"] = jnp.stack(b_rs)                 # (NB*(NL-1), 1, 2H)
    p["w_skip_last"] = jnp.stack(w_skl)         # (NB, H, H)
    p["b_skip_last"] = jnp.stack(b_skl)         # (NB, 1, H)
    return p


# --------------------------------------------------------------------------------------
# Pure-JAX reference (NCT layout, lax.conv_general_dilated) — mirrors the PyTorch module.
# --------------------------------------------------------------------------------------
def torch_ref(x_nct, tp):
    def conv1d(x, w, b, dilation=1, padding=0):
        y = lax.conv_general_dilated(
            x, w, window_strides=(1,), padding=[(padding, padding)],
            rhs_dilation=(dilation,), dimension_numbers=("NCH", "OIH", "NCH"))
        return y + b[None, :, None]

    o = jax.nn.relu(conv1d(x_nct, tp["in_w"], tp["in_b"]))
    H = o.shape[1]
    for nb in range(NUM_BLOCKS):
        xb = o
        output = jnp.zeros_like(xb)
        for nl in range(NUM_LAYERS):
            dil = DILATION_RATE ** nl
            pad = (KERNEL_SIZE * dil - dil) // 2
            x_in = conv1d(xb, tp["wn_in_w"][nb][nl], tp["wn_in_b"][nb][nl], dil, pad)
            acts = jnp.tanh(x_in[:, :H]) * jax.nn.sigmoid(x_in[:, H:])
            rs = conv1d(acts, tp["wn_rs_w"][nb][nl], tp["wn_rs_b"][nb][nl])
            if nl < NUM_LAYERS - 1:
                xb = xb + rs[:, :H]
                output = output + rs[:, H:]
            else:
                output = output + rs
        o = output
    return conv1d(o, tp["out_w"], tp["out_b"])


# --------------------------------------------------------------------------------------
if __name__ == "__main__":
    B, Cin, H, T = 2, 8, 32, 64   # (batch, in_channels, out_channels, time)

    key = jax.random.PRNGKey(0)
    kx, kp = jax.random.split(key)
    x_nct = jax.random.normal(kx, (B, Cin, T), jnp.float32)   # PyTorch NCT input layout

    tp = build_torch_params(kp, Cin, H)
    p = to_pallas_params(tp)

    # layout: kernel works on (B, T, C); transpose at the boundary.
    x_btc = jnp.transpose(x_nct, (0, 2, 1))
    out_btc = jax.block_until_ready(wn_spec_encoder(x_btc, p))

    ref_btc = jnp.transpose(torch_ref(x_nct, tp), (0, 2, 1))
    err = float(jnp.max(jnp.abs(out_btc - ref_btc)))
    assert out_btc.shape == (B, T, H)
    assert jnp.allclose(out_btc, ref_btc, rtol=1e-3, atol=1e-3), f"max abs err {err}"
    print("KERNEL_OK")
</pallas_src>

<mosaic_0001>
module attributes {stable_mosaic.version = 11 : i64} {
  func.func @wn_spec_encoder_kernel(%arg0: i32, %arg1: memref<1x64x8xf32, #tpu.memory_space<vmem>>, %arg2: memref<8x32xf32, #tpu.memory_space<vmem>>, %arg3: memref<1x32xf32, #tpu.memory_space<vmem>>, %arg4: memref<24x32x64xf32, #tpu.memory_space<vmem>>, %arg5: memref<8x1x64xf32, #tpu.memory_space<vmem>>, %arg6: memref<6x32x64xf32, #tpu.memory_space<vmem>>, %arg7: memref<6x1x64xf32, #tpu.memory_space<vmem>>, %arg8: memref<2x32x32xf32, #tpu.memory_space<vmem>>, %arg9: memref<2x1x32xf32, #tpu.memory_space<vmem>>, %arg10: memref<32x32xf32, #tpu.memory_space<vmem>>, %arg11: memref<1x32xf32, #tpu.memory_space<vmem>>, %arg12: memref<1x64x32xf32, #tpu.memory_space<vmem>>, %arg13: memref<128x32xf32, #tpu.memory_space<vmem>>) attributes {dimension_semantics = [#tpu.dimension_semantics<parallel>], iteration_bounds = array<i64: 2>, scalar_prefetch = 0 : i64, scratch_operands = 1 : i64, tpu.core_type = #tpu.core_type<tc>, window_params = [{transform_indices = @transform_0, window_bounds = array<i64: 1, 64, 8>}, {pipeline_mode = #tpu.pipeline_mode<synchronous>, transform_indices = @transform_1, window_bounds = array<i64: 8, 32>}, {pipeline_mode = #tpu.pipeline_mode<synchronous>, transform_indices = @transform_2, window_bounds = array<i64: 1, 32>}, {pipeline_mode = #tpu.pipeline_mode<synchronous>, transform_indices = @transform_3, window_bounds = array<i64: 24, 32, 64>}, {pipeline_mode = #tpu.pipeline_mode<synchronous>, transform_indices = @transform_4, window_bounds = array<i64: 8, 1, 64>}, {pipeline_mode = #tpu.pipeline_mode<synchronous>, transform_indices = @transform_5, window_bounds = array<i64: 6, 32, 64>}, {pipeline_mode = #tpu.pipeline_mode<synchronous>, transform_indices = @transform_6, window_bounds = array<i64: 6, 1, 64>}, {pipeline_mode = #tpu.pipeline_mode<synchronous>, transform_indices = @transform_7, window_bounds = array<i64: 2, 32, 32>}, {pipeline_mode = #tpu.pipeline_mode<synchronous>, transform_indices = @transform_8, window_bounds = array<i64: 2, 1, 32>}, {pipeline_mode = #tpu.pipeline_mode<synchronous>, transform_indices = @transform_9, window_bounds = array<i64: 32, 32>}, {pipeline_mode = #tpu.pipeline_mode<synchronous>, transform_indices = @transform_10, window_bounds = array<i64: 1, 32>}, {transform_indices = @transform_11, window_bounds = array<i64: 1, 64, 32>}]} {
    %c0 = arith.constant 0 : index
    %c0_0 = arith.constant 0 : index
    %c0_1 = arith.constant 0 : index
    %0 = vector.load %arg1[%c0, %c0_0, %c0_1] : memref<1x64x8xf32, #tpu.memory_space<vmem>>, vector<1x64x8xf32>
    %1 = vector.shape_cast %0 : vector<1x64x8xf32> to vector<64x8xf32>
    %c0_2 = arith.constant 0 : index
    %c0_3 = arith.constant 0 : index
    %2 = vector.load %arg2[%c0_2, %c0_3] : memref<8x32xf32, #tpu.memory_space<vmem>>, vector<8x32xf32>
    %cst = arith.constant dense<0.000000e+00> : vector<64x32xf32>
    %3 = tpu.matmul %1, %2, %cst {dimension_numbers = #tpu.dot_dimension_numbers<[1], [0], [0], [1], [0, 0, 1, 1], [], []>} : vector<64x8xf32>, vector<8x32xf32>, vector<64x32xf32> -> vector<64x32xf32>
    %c0_4 = arith.constant 0 : index
    %c0_5 = arith.constant 0 : index
    %4 = vector.load %arg3[%c0_4, %c0_5] : memref<1x32xf32, #tpu.memory_space<vmem>>, vector<1x32xf32>
    %5 = vector.broadcast %4 : vector<1x32xf32> to vector<64x32xf32>
    %6 = arith.addf %3, %5 : vector<64x32xf32>
    %cst_6 = arith.constant 0.000000e+00 : f32
    %7 = vector.broadcast %cst_6 : f32 to vector<64x32xf32>
    %8 = arith.maximumf %6, %7 : vector<64x32xf32>
    %cst_7 = arith.constant 0.000000e+00 : f32
    %9 = vector.broadcast %cst_7 : f32 to vector<128x32xf32>
    %c0_8 = arith.constant 0 : index
    %c0_9 = arith.constant 0 : index
    %10 = vector.load %arg13[%c0_8, %c0_9] : memref<128x32xf32, #tpu.memory_space<vmem>>, vector<128x32xf32>
    tpu.vector_store %arg13[%c0_8, %c0_9], %9 {strides = array<i32>} : memref<128x32xf32, #tpu.memory_space<vmem>>, vector<128x32xf32>,
    %cst_10 = arith.constant 0.000000e+00 : f32
    %11 = vector.broadcast %cst_10 : f32 to vector<64x32xf32>
    %c32 = arith.constant 32 : index
    %c0_11 = arith.constant 0 : index
    %12 = vector.load %arg13[%c32, %c0_11] : memref<128x32xf32, #tpu.memory_space<vmem>>, vector<64x32xf32>
    tpu.vector_store %arg13[%c32, %c0_11], %8 {strides = array<i32>} : memref<128x32xf32, #tpu.memory_space<vmem>>, vector<64x32xf32>,
    %c31 = arith.constant 31 : index
    %c0_12 = arith.constant 0 : index
    %13 = vector.load %arg13[%c31, %c0_12] : memref<128x32xf32, #tpu.memory_space<vmem>>, vector<64x32xf32>
    %c33 = arith.constant 33 : index
    %c0_13 = arith.constant 0 : index
    %14 = vector.load %arg13[%c33, %c0_13] : memref<128x32xf32, #tpu.memory_space<vmem>>, vector<64x32xf32>
    %c0_14 = arith.constant 0 : index
    %c0_15 = arith.constant 0 : index
    %c0_16 = arith.constant 0 : index
    %15 = vector.load %arg5[%c0_14, %c0_15, %c0_16] : memref<8x1x64xf32, #tpu.memory_space<vmem>>, vector<1x1x64xf32>
    %16 = vector.shape_cast %15 : vector<1x1x64xf32> to vector<1x64xf32>
    %c0_17 = arith.constant 0 : index
    %c0_18 = arith.constant 0 : index
    %c0_19 = arith.constant 0 : index
    %17 = vector.load %arg4[%c0_17, %c0_18, %c0_19] : memref<24x32x64xf32, #tpu.memory_space<vmem>>, vector<1x32x64xf32>
    %18 = vector.shape_cast %17 : vector<1x32x64xf32> to vector<32x64xf32>
    %cst_20 = arith.constant dense<0.000000e+00> : vector<64x64xf32>
    %19 = tpu.matmul %13, %18, %cst_20 {dimension_numbers = #tpu.dot_dimension_numbers<[1], [0], [0], [1], [0, 0, 1, 1], [], []>} : vector<64x32xf32>, vector<32x64xf32>, vector<64x64xf32> -> vector<64x64xf32>
    %20 = vector.broadcast %16 : vector<1x64xf32> to vector<64x64xf32>
    %21 = arith.addf %20, %19 : vector<64x64xf32>
    %c1 = arith.constant 1 : index
    %c0_21 = arith.constant 0 : index
    %c0_22 = arith.constant 0 : index
    %22 = vector.load %arg4[%c1, %c0_21, %c0_22] : memref<24x32x64xf32, #tpu.memory_space<vmem>>, vector<1x32x64xf32>
    %23 = vector.shape_cast %22 : vector<1x32x64xf32> to vector<32x64xf32>
    %cst_23 = arith.constant dense<0.000000e+00> : vector<64x64xf32>
    %24 = tpu.matmul %8, %23, %cst_23 {dimension_numbers = #tpu.dot_dimension_numbers<[1], [0], [0], [1], [0, 0, 1, 1], [], []>} : vector<64x32xf32>, vector<32x64xf32>, vector<64x64xf32> -> vector<64x64xf32>
    %25 = arith.addf %21, %24 : vector<64x64xf32>
    %c2 = arith.constant 2 : index
    %c0_24 = arith.constant 0 : index
    %c0_25 = arith.constant 0 : index
    %26 = vector.load %arg4[%c2, %c0_24, %c0_25] : memref<24x32x64xf32, #tpu.memory_space<vmem>>, vector<1x32x64xf32>
    %27 = vector.shape_cast %26 : vector<1x32x64xf32> to vector<32x64xf32>
    %cst_26 = arith.constant dense<0.000000e+00> : vector<64x64xf32>
    %28 = tpu.matmul %14, %27, %cst_26 {dimension_numbers = #tpu.dot_dimension_numbers<[1], [0], [0], [1], [0, 0, 1, 1], [], []>} : vector<64x32xf32>, vector<32x64xf32>, vector<64x64xf32> -> vector<64x64xf32>
    %29 = arith.addf %25, %28 : vector<64x64xf32>
    %30 = vector.extract_strided_slice %29 {offsets = [0, 0], sizes = [64, 32], strides = [1, 1]} : vector<64x64xf32> to vector<64x32xf32>
    %31 = math.tanh %30 : vector<64x32xf32>
    %32 = vector.extract_strided_slice %29 {offsets = [0, 32], sizes = [64, 32], strides = [1, 1]} : vector<64x64xf32> to vector<64x32xf32>
    %33 = arith.negf %32 : vector<64x32xf32>
    %34 = math.exp %33 : vector<64x32xf32>
    %cst_27 = arith.constant 1.000000e+00 : f32
    %35 = vector.broadcast %cst_27 : f32 to vector<64x32xf32>
    %36 = arith.addf %35, %34 : vector<64x32xf32>
    %37 = arith.divf %35, %36 : vector<64x32xf32>
    %38 = arith.mulf %31, %37 : vector<64x32xf32>
    %c0_28 = arith.constant 0 : index
    %c0_29 = arith.constant 0 : index
    %c0_30 = arith.constant 0 : index
    %39 = vector.load %arg6[%c0_28, %c0_29, %c0_30] : memref<6x32x64xf32, #tpu.memory_space<vmem>>, vector<1x32x64xf32>
    %40 = vector.shape_cast %39 : vector<1x32x64xf32> to vector<32x64xf32>
    %cst_31 = arith.constant dense<0.000000e+00> : vector<64x64xf32>
    %41 = tpu.matmul %38, %40, %cst_31 {dimension_numbers = #tpu.dot_dimension_numbers<[1], [0], [0], [1], [0, 0, 1, 1], [], []>} : vector<64x32xf32>, vector<32x64xf32>, vector<64x64xf32> -> vector<64x64xf32>
    %c0_32 = arith.constant 0 : index
    %c0_33 = arith.constant 0 : index
    %c0_34 = arith.constant 0 : index
    %42 = vector.load %arg7[%c0_32, %c0_33, %c0_34] : memref<6x1x64xf32, #tpu.memory_space<vmem>>, vector<1x1x64xf32>
    %43 = vector.shape_cast %42 : vector<1x1x64xf32> to vector<1x64xf32>
    %44 = vector.broadcast %43 : vector<1x64xf32> to vector<64x64xf32>
    %45 = arith.addf %41, %44 : vector<64x64xf32>
    %46 = vector.extract_strided_slice %45 {offsets = [0, 0], sizes = [64, 32], strides = [1, 1]} : vector<64x64xf32> to vector<64x32xf32>
    %47 = arith.addf %8, %46 : vector<64x32xf32>
    %48 = vector.extract_strided_slice %45 {offsets = [0, 32], sizes = [64, 32], strides = [1, 1]} : vector<64x64xf32> to vector<64x32xf32>
    %49 = arith.addf %11, %48 : vector<64x32xf32>
    %c32_35 = arith.constant 32 : index
    %c0_36 = arith.constant 0 : index
    %50 = vector.load %arg13[%c32_35, %c0_36] : memref<128x32xf32, #tpu.memory_space<vmem>>, vector<64x32xf32>
    tpu.vector_store %arg13[%c32_35, %c0_36], %47 {strides = array<i32>} : memref<128x32xf32, #tpu.memory_space<vmem>>, vector<64x32xf32>,
    %c29 = arith.constant 29 : index
    %c0_37 = arith.constant 0 : index
    %51 = vector.load %arg13[%c29, %c0_37] : memref<128x32xf32, #tpu.memory_space<vmem>>, vector<64x32xf32>
    %c35 = arith.constant 35 : index
    %c0_38 = arith.constant 0 : index
    %52 = vector.load %arg13[%c35, %c0_38] : memref<128x32xf32, #tpu.memory_space<vmem>>, vector<64x32xf32>
    %c1_39 = arith.constant 1 : index
    %c0_40 = arith.constant 0 : index
    %c0_41 = arith.constant 0 : index
    %53 = vector.load %arg5[%c1_39, %c0_40, %c0_41] : memref<8x1x64xf32, #tpu.memory_space<vmem>>, vector<1x1x64xf32>
    %54 = vector.shape_cast %53 : vector<1x1x64xf32> to vector<1x64xf32>
    %c3 = arith.constant 3 : index
    %c0_42 = arith.constant 0 : index
    %c0_43 = arith.constant 0 : index
    %55 = vector.load %arg4[%c3, %c0_42, %c0_43] : memref<24x32x64xf32, #tpu.memory_space<vmem>>, vector<1x32x64xf32>
    %56 = vector.shape_cast %55 : vector<1x32x64xf32> to vector<32x64xf32>
    %cst_44 = arith.constant dense<0.000000e+00> : vector<64x64xf32>
    %57 = tpu.matmul %51, %56, %cst_44 {dimension_numbers = #tpu.dot_dimension_numbers<[1], [0], [0], [1], [0, 0, 1, 1], [], []>} : vector<64x32xf32>, vector<32x64xf32>, vector<64x64xf32> -> vector<64x64xf32>
    %58 = vector.broadcast %54 : vector<1x64xf32> to vector<64x64xf32>
    %59 = arith.addf %58, %57 : vector<64x64xf32>
    %c4 = arith.constant 4 : index
    %c0_45 = arith.constant 0 : index
    %c0_46 = arith.constant 0 : index
    %60 = vector.load %arg4[%c4, %c0_45, %c0_46] : memref<24x32x64xf32, #tpu.memory_space<vmem>>, vector<1x32x64xf32>
    %61 = vector.shape_cast %60 : vector<1x32x64xf32> to vector<32x64xf32>
    %cst_47 = arith.constant dense<0.000000e+00> : vector<64x64xf32>
    %62 = tpu.matmul %47, %61, %cst_47 {dimension_numbers = #tpu.dot_dimension_numbers<[1], [0], [0], [1], [0, 0, 1, 1], [], []>} : vector<64x32xf32>, vector<32x64xf32>, vector<64x64xf32> -> vector<64x64xf32>
    %63 = arith.addf %59, %62 : vector<64x64xf32>
    %c5 = arith.constant 5 : index
    %c0_48 = arith.constant 0 : index
    %c0_49 = arith.constant 0 : index
    %64 = vector.load %arg4[%c5, %c0_48, %c0_49] : memref<24x32x64xf32, #tpu.memory_space<vmem>>, vector<1x32x64xf32>
    %65 = vector.shape_cast %64 : vector<1x32x64xf32> to vector<32x64xf32>
    %cst_50 = arith.constant dense<0.000000e+00> : vector<64x64xf32>
    %66 = tpu.matmul %52, %65, %cst_50 {dimension_numbers = #tpu.dot_dimension_numbers<[1], [0], [0], [1], [0, 0, 1, 1], [], []>} : vector<64x32xf32>, vector<32x64xf32>, vector<64x64xf32> -> vector<64x64xf32>
    %67 = arith.addf %63, %66 : vector<64x64xf32>
    %68 = vector.extract_strided_slice %67 {offsets = [0, 0], sizes = [64, 32], strides = [1, 1]} : vector<64x64xf32> to vector<64x32xf32>
    %69 = math.tanh %68 : vector<64x32xf32>
    %70 = vector.extract_strided_slice %67 {offsets = [0, 32], sizes = [64, 32], strides = [1, 1]} : vector<64x64xf32> to vector<64x32xf32>
    %71 = arith.negf %70 : vector<64x32xf32>
    %72 = math.exp %71 : vector<64x32xf32>
    %cst_51 = arith.constant 1.000000e+00 : f32
    %73 = vector.broadcast %cst_51 : f32 to vector<64x32xf32>
    %74 = arith.addf %73, %72 : vector<64x32xf32>
    %75 = arith.divf %73, %74 : vector<64x32xf32>
    %76 = arith.mulf %69, %75 : vector<64x32xf32>
    %c1_52 = arith.constant 1 : index
    %c0_53 = arith.constant 0 : index
    %c0_54 = arith.constant 0 : index
    %77 = vector.load %arg6[%c1_52, %c0_53, %c0_54] : memref<6x32x64xf32, #tpu.memory_space<vmem>>, vector<1x32x64xf32>
    %78 = vector.shape_cast %77 : vector<1x32x64xf32> to vector<32x64xf32>
    %cst_55 = arith.constant dense<0.000000e+00> : vector<64x64xf32>
    %79 = tpu.matmul %76, %78, %cst_55 {dimension_numbers = #tpu.dot_dimension_numbers<[1], [0], [0], [1], [0, 0, 1, 1], [], []>} : vector<64x32xf32>, vector<32x64xf32>, vector<64x64xf32> -> vector<64x64xf32>
    %c1_56 = arith.constant 1 : index
    %c0_57 = arith.constant 0 : index
    %c0_58 = arith.constant 0 : index
    %80 = vector.load %arg7[%c1_56, %c0_57, %c0_58] : memref<6x1x64xf32, #tpu.memory_space<vmem>>, vector<1x1x64xf32>
    %81 = vector.shape_cast %80 : vector<1x1x64xf32> to vector<1x64xf32>
    %82 = vector.broadcast %81 : vector<1x64xf32> to vector<64x64xf32>
    %83 = arith.addf %79, %82 : vector<64x64xf32>
    %84 = vector.extract_strided_slice %83 {offsets = [0, 0], sizes = [64, 32], strides = [1, 1]} : vector<64x64xf32> to vector<64x32xf32>
    %85 = arith.addf %47, %84 : vector<64x32xf32>
    %86 = vector.extract_strided_slice %83 {offsets = [0, 32], sizes = [64, 32], strides = [1, 1]} : vector<64x64xf32> to vector<64x32xf32>
    %87 = arith.addf %49, %86 : vector<64x32xf32>
    %c32_59 = arith.constant 32 : index
    %c0_60 = arith.constant 0 : index
    %88 = vector.load %arg13[%c32_59, %c0_60] : memref<128x32xf32, #tpu.memory_space<vmem>>, vector<64x32xf32>
    tpu.vector_store %arg13[%c32_59, %c0_60], %85 {strides = array<i32>} : memref<128x32xf32, #tpu.memory_space<vmem>>, vector<64x32xf32>,
    %c23 = arith.constant 23 : index
    %c0_61 = arith.constant 0 : index
    %89 = vector.load %arg13[%c23, %c0_61] : memref<128x32xf32, #tpu.memory_space<vmem>>, vector<64x32xf32>
    %c41 = arith.constant 41 : index
    %c0_62 = arith.constant 0 : index
    %90 = vector.load %arg13[%c41, %c0_62] : memref<128x32xf32, #tpu.memory_space<vmem>>, vector<64x32xf32>
    %c2_63 = arith.constant 2 : index
    %c0_64 = arith.constant 0 : index
    %c0_65 = arith.constant 0 : index
    %91 = vector.load %arg5[%c2_63, %c0_64, %c0_65] : memref<8x1x64xf32, #tpu.memory_space<vmem>>, vector<1x1x64xf32>
    %92 = vector.shape_cast %91 : vector<1x1x64xf32> to vector<1x64xf32>
    %c6 = arith.constant 6 : index
    %c0_66 = arith.constant 0 : index
    %c0_67 = arith.constant 0 : index
    %93 = vector.load %arg4[%c6, %c0_66, %c0_67] : memref<24x32x64xf32, #tpu.memory_space<vmem>>, vector<1x32x64xf32>
    %94 = vector.shape_cast %93 : vector<1x32x64xf32> to vector<32x64xf32>
    %cst_68 = arith.constant dense<0.000000e+00> : vector<64x64xf32>
    %95 = tpu.matmul %89, %94, %cst_68 {dimension_numbers = #tpu.dot_dimension_numbers<[1], [0], [0], [1], [0, 0, 1, 1], [], []>} : vector<64x32xf32>, vector<32x64xf32>, vector<64x64xf32> -> vector<64x64xf32>
    %96 = vector.broadcast %92 : vector<1x64xf32> to vector<64x64xf32>
    %97 = arith.addf %96, %95 : vector<64x64xf32>
    %c7 = arith.constant 7 : index
    %c0_69 = arith.constant 0 : index
    %c0_70 = arith.constant 0 : index
    %98 = vector.load %arg4[%c7, %c0_69, %c0_70] : memref<24x32x64xf32, #tpu.memory_space<vmem>>, vector<1x32x64xf32>
    %99 = vector.shape_cast %98 : vector<1x32x64xf32> to vector<32x64xf32>
    %cst_71 = arith.constant dense<0.000000e+00> : vector<64x64xf32>
    %100 = tpu.matmul %85, %99, %cst_71 {dimension_numbers = #tpu.dot_dimension_numbers<[1], [0], [0], [1], [0, 0, 1, 1], [], []>} : vector<64x32xf32>, vector<32x64xf32>, vector<64x64xf32> -> vector<64x64xf32>
    %101 = arith.addf %97, %100 : vector<64x64xf32>
    %c8 = arith.constant 8 : index
    %c0_72 = arith.constant 0 : index
    %c0_73 = arith.constant 0 : index
    %102 = vector.load %arg4[%c8, %c0_72, %c0_73] : memref<24x32x64xf32, #tpu.memory_space<vmem>>, vector<1x32x64xf32>
    %103 = vector.shape_cast %102 : vector<1x32x64xf32> to vector<32x64xf32>
    %cst_74 = arith.constant dense<0.000000e+00> : vector<64x64xf32>
    %104 = tpu.matmul %90, %103, %cst_74 {dimension_numbers = #tpu.dot_dimension_numbers<[1], [0], [0], [1], [0, 0, 1, 1], [], []>} : vector<64x32xf32>, vector<32x64xf32>, vector<64x64xf32> -> vector<64x64xf32>
    %105 = arith.addf %101, %104 : vector<64x64xf32>
    %106 = vector.extract_strided_slice %105 {offsets = [0, 0], sizes = [64, 32], strides = [1, 1]} : vector<64x64xf32> to vector<64x32xf32>
    %107 = math.tanh %106 : vector<64x32xf32>
    %108 = vector.extract_strided_slice %105 {offsets = [0, 32], sizes = [64, 32], strides = [1, 1]} : vector<64x64xf32> to vector<64x32xf32>
    %109 = arith.negf %108 : vector<64x32xf32>
    %110 = math.exp %109 : vector<64x32xf32>
    %cst_75 = arith.constant 1.000000e+00 : f32
    %111 = vector.broadcast %cst_75 : f32 to vector<64x32xf32>
    %112 = arith.addf %111, %110 : vector<64x32xf32>
    %113 = arith.divf %111, %112 : vector<64x32xf32>
    %114 = arith.mulf %107, %113 : vector<64x32xf32>
    %c2_76 = arith.constant 2 : index
    %c0_77 = arith.constant 0 : index
    %c0_78 = arith.constant 0 : index
    %115 = vector.load %arg6[%c2_76, %c0_77, %c0_78] : memref<6x32x64xf32, #tpu.memory_space<vmem>>, vector<1x32x64xf32>
    %116 = vector.shape_cast %115 : vector<1x32x64xf32> to vector<32x64xf32>
    %cst_79 = arith.constant dense<0.000000e+00> : vector<64x64xf32>
    %117 = tpu.matmul %114, %116, %cst_79 {dimension_numbers = #tpu.dot_dimension_numbers<[1], [0], [0], [1], [0, 0, 1, 1], [], []>} : vector<64x32xf32>, vector<32x64xf32>, vector<64x64xf32> -> vector<64x64xf32>
    %c2_80 = arith.constant 2 : index
    %c0_81 = arith.constant 0 : index
    %c0_82 = arith.constant 0 : index
    %118 = vector.load %arg7[%c2_80, %c0_81, %c0_82] : memref<6x1x64xf32, #tpu.memory_space<vmem>>, vector<1x1x64xf32>
    %119 = vector.shape_cast %118 : vector<1x1x64xf32> to vector<1x64xf32>
    %120 = vector.broadcast %119 : vector<1x64xf32> to vector<64x64xf32>
    %121 = arith.addf %117, %120 : vector<64x64xf32>
    %122 = vector.extract_strided_slice %121 {offsets = [0, 0], sizes = [64, 32], strides = [1, 1]} : vector<64x64xf32> to vector<64x32xf32>
    %123 = arith.addf %85, %122 : vector<64x32xf32>
    %124 = vector.extract_strided_slice %121 {offsets = [0, 32], sizes = [64, 32], strides = [1, 1]} : vector<64x64xf32> to vector<64x32xf32>
    %125 = arith.addf %87, %124 : vector<64x32xf32>
    %c32_83 = arith.constant 32 : index
    %c0_84 = arith.constant 0 : index
    %126 = vector.load %arg13[%c32_83, %c0_84] : memref<128x32xf32, #tpu.memory_space<vmem>>, vector<64x32xf32>
    tpu.vector_store %arg13[%c32_83, %c0_84], %123 {strides = array<i32>} : memref<128x32xf32, #tpu.memory_space<vmem>>, vector<64x32xf32>,
    %c5_85 = arith.constant 5 : index
    %c0_86 = arith.constant 0 : index
    %127 = vector.load %arg13[%c5_85, %c0_86] : memref<128x32xf32, #tpu.memory_space<vmem>>, vector<64x32xf32>
    %c59 = arith.constant 59 : index
    %c0_87 = arith.constant 0 : index
    %128 = vector.load %arg13[%c59, %c0_87] : memref<128x32xf32, #tpu.memory_space<vmem>>, vector<64x32xf32>
    %c3_88 = arith.constant 3 : index
    %c0_89 = arith.constant 0 : index
    %c0_90 = arith.constant 0 : index
    %129 = vector.load %arg5[%c3_88, %c0_89, %c0_90] : memref<8x1x64xf32, #tpu.memory_space<vmem>>, vector<1x1x64xf32>
    %130 = vector.shape_cast %129 : vector<1x1x64xf32> to vector<1x64xf32>
    %c9 = arith.constant 9 : index
    %c0_91 = arith.constant 0 : index
    %c0_92 = arith.constant 0 : index
    %131 = vector.load %arg4[%c9, %c0_91, %c0_92] : memref<24x32x64xf32, #tpu.memory_space<vmem>>, vector<1x32x64xf32>
    %132 = vector.shape_cast %131 : vector<1x32x64xf32> to vector<32x64xf32>
    %cst_93 = arith.constant dense<0.000000e+00> : vector<64x64xf32>
    %133 = tpu.matmul %127, %132, %cst_93 {dimension_numbers = #tpu.dot_dimension_numbers<[1], [0], [0], [1], [0, 0, 1, 1], [], []>} : vector<64x32xf32>, vector<32x64xf32>, vector<64x64xf32> -> vector<64x64xf32>
    %134 = vector.broadcast %130 : vector<1x64xf32> to vector<64x64xf32>
    %135 = arith.addf %134, %133 : vector<64x64xf32>
    %c10 = arith.constant 10 : index
    %c0_94 = arith.constant 0 : index
    %c0_95 = arith.constant 0 : index
    %136 = vector.load %arg4[%c10, %c0_94, %c0_95] : memref<24x32x64xf32, #tpu.memory_space<vmem>>, vector<1x32x64xf32>
    %137 = vector.shape_cast %136 : vector<1x32x64xf32> to vector<32x64xf32>
    %cst_96 = arith.constant dense<0.000000e+00> : vector<64x64xf32>
    %138 = tpu.matmul %123, %137, %cst_96 {dimension_numbers = #tpu.dot_dimension_numbers<[1], [0], [0], [1], [0, 0, 1, 1], [], []>} : vector<64x32xf32>, vector<32x64xf32>, vector<64x64xf32> -> vector<64x64xf32>
    %139 = arith.addf %135, %138 : vector<64x64xf32>
    %c11 = arith.constant 11 : index
    %c0_97 = arith.constant 0 : index
    %c0_98 = arith.constant 0 : index
    %140 = vector.load %arg4[%c11, %c0_97, %c0_98] : memref<24x32x64xf32, #tpu.memory_space<vmem>>, vector<1x32x64xf32>
    %141 = vector.shape_cast %140 : vector<1x32x64xf32> to vector<32x64xf32>
    %cst_99 = arith.constant dense<0.000000e+00> : vector<64x64xf32>
    %142 = tpu.matmul %128, %141, %cst_99 {dimension_numbers = #tpu.dot_dimension_numbers<[1], [0], [0], [1], [0, 0, 1, 1], [], []>} : vector<64x32xf32>, vector<32x64xf32>, vector<64x64xf32> -> vector<64x64xf32>
    %143 = arith.addf %139, %142 : vector<64x64xf32>
    %144 = vector.extract_strided_slice %143 {offsets = [0, 0], sizes = [64, 32], strides = [1, 1]} : vector<64x64xf32> to vector<64x32xf32>
    %145 = math.tanh %144 : vector<64x32xf32>
    %146 = vector.extract_strided_slice %143 {offsets = [0, 32], sizes = [64, 32], strides = [1, 1]} : vector<64x64xf32> to vector<64x32xf32>
    %147 = arith.negf %146 : vector<64x32xf32>
    %148 = math.exp %147 : vector<64x32xf32>
    %cst_100 = arith.constant 1.000000e+00 : f32
    %149 = vector.broadcast %cst_100 : f32 to vector<64x32xf32>
    %150 = arith.addf %149, %148 : vector<64x32xf32>
    %151 = arith.divf %149, %150 : vector<64x32xf32>
    %152 = arith.mulf %145, %151 : vector<64x32xf32>
    %c0_101 = arith.constant 0 : index
    %c0_102 = arith.constant 0 : index
    %c0_103 = arith.constant 0 : index
    %153 = vector.load %arg8[%c0_101, %c0_102, %c0_103] : memref<2x32x32xf32, #tpu.memory_space<vmem>>, vector<1x32x32xf32>
    %154 = vector.shape_cast %153 : vector<1x32x32xf32> to vector<32x32xf32>
    %cst_104 = arith.constant dense<0.000000e+00> : vector<64x32xf32>
    %155 = tpu.matmul %152, %154, %cst_104 {dimension_numbers = #tpu.dot_dimension_numbers<[1], [0], [0], [1], [0, 0, 1, 1], [], []>} : vector<64x32xf32>, vector<32x32xf32>, vector<64x32xf32> -> vector<64x32xf32>
    %c0_105 = arith.constant 0 : index
    %c0_106 = arith.constant 0 : index
    %c0_107 = arith.constant 0 : index
    %156 = vector.load %arg9[%c0_105, %c0_106, %c0_107] : memref<2x1x32xf32, #tpu.memory_space<vmem>>, vector<1x1x32xf32>
    %157 = vector.shape_cast %156 : vector<1x1x32xf32> to vector<1x32xf32>
    %158 = vector.broadcast %157 : vector<1x32xf32> to vector<64x32xf32>
    %159 = arith.addf %155, %158 : vector<64x32xf32>
    %160 = arith.addf %125, %159 : vector<64x32xf32>
    %cst_108 = arith.constant 0.000000e+00 : f32
    %161 = vector.broadcast %cst_108 : f32 to vector<64x32xf32>
    %c32_109 = arith.constant 32 : index
    %c0_110 = arith.constant 0 : index
    %162 = vector.load %arg13[%c32_109, %c0_110] : memref<128x32xf32, #tpu.memory_space<vmem>>, vector<64x32xf32>
    tpu.vector_store %arg13[%c32_109, %c0_110], %160 {strides = array<i32>} : memref<128x32xf32, #tpu.memory_space<vmem>>, vector<64x32xf32>,
    %c31_111 = arith.constant 31 : index
    %c0_112 = arith.constant 0 : index
    %163 = vector.load %arg13[%c31_111, %c0_112] : memref<128x32xf32, #tpu.memory_space<vmem>>, vector<64x32xf32>
    %c33_113 = arith.constant 33 : index
    %c0_114 = arith.constant 0 : index
    %164 = vector.load %arg13[%c33_113, %c0_114] : memref<128x32xf32, #tpu.memory_space<vmem>>, vector<64x32xf32>
    %c4_115 = arith.constant 4 : index
    %c0_116 = arith.constant 0 : index
    %c0_117 = arith.constant 0 : index
    %165 = vector.load %arg5[%c4_115, %c0_116, %c0_117] : memref<8x1x64xf32, #tpu.memory_space<vmem>>, vector<1x1x64xf32>
    %166 = vector.shape_cast %165 : vector<1x1x64xf32> to vector<1x64xf32>
    %c12 = arith.constant 12 : index
    %c0_118 = arith.constant 0 : index
    %c0_119 = arith.constant 0 : index
    %167 = vector.load %arg4[%c12, %c0_118, %c0_119] : memref<24x32x64xf32, #tpu.memory_space<vmem>>, vector<1x32x64xf32>
    %168 = vector.shape_cast %167 : vector<1x32x64xf32> to vector<32x64xf32>
    %cst_120 = arith.constant dense<0.000000e+00> : vector<64x64xf32>
    %169 = tpu.matmul %163, %168, %cst_120 {dimension_numbers = #tpu.dot_dimension_numbers<[1], [0], [0], [1], [0, 0, 1, 1], [], []>} : vector<64x32xf32>, vector<32x64xf32>, vector<64x64xf32> -> vector<64x64xf32>
    %170 = vector.broadcast %166 : vector<1x64xf32> to vector<64x64xf32>
    %171 = arith.addf %170, %169 : vector<64x64xf32>
    %c13 = arith.constant 13 : index
    %c0_121 = arith.constant 0 : index
    %c0_122 = arith.constant 0 : index
    %172 = vector.load %arg4[%c13, %c0_121, %c0_122] : memref<24x32x64xf32, #tpu.memory_space<vmem>>, vector<1x32x64xf32>
    %173 = vector.shape_cast %172 : vector<1x32x64xf32> to vector<32x64xf32>
    %cst_123 = arith.constant dense<0.000000e+00> : vector<64x64xf32>
    %174 = tpu.matmul %160, %173, %cst_123 {dimension_numbers = #tpu.dot_dimension_numbers<[1], [0], [0], [1], [0, 0, 1, 1], [], []>} : vector<64x32xf32>, vector<32x64xf32>, vector<64x64xf32> -> vector<64x64xf32>
    %175 = arith.addf %171, %174 : vector<64x64xf32>
    %c14 = arith.constant 14 : index
    %c0_124 = arith.constant 0 : index
    %c0_125 = arith.constant 0 : index
    %176 = vector.load %arg4[%c14, %c0_124, %c0_125] : memref<24x32x64xf32, #tpu.memory_space<vmem>>, vector<1x32x64xf32>
    %177 = vector.shape_cast %176 : vector<1x32x64xf32> to vector<32x64xf32>
    %cst_126 = arith.constant dense<0.000000e+00> : vector<64x64xf32>
    %178 = tpu.matmul %164, %177, %cst_126 {dimension_numbers = #tpu.dot_dimension_numbers<[1], [0], [0], [1], [0, 0, 1, 1], [], []>} : vector<64x32xf32>, vector<32x64xf32>, vector<64x64xf32> -> vector<64x64xf32>
    %179 = arith.addf %175, %178 : vector<64x64xf32>
    %180 = vector.extract_strided_slice %179 {offsets = [0, 0], sizes = [64, 32], strides = [1, 1]} : vector<64x64xf32> to vector<64x32xf32>
    %181 = math.tanh %180 : vector<64x32xf32>
    %182 = vector.extract_strided_slice %179 {offsets = [0, 32], sizes = [64, 32], strides = [1, 1]} : vector<64x64xf32> to vector<64x32xf32>
    %183 = arith.negf %182 : vector<64x32xf32>
    %184 = math.exp %183 : vector<64x32xf32>
    %cst_127 = arith.constant 1.000000e+00 : f32
    %185 = vector.broadcast %cst_127 : f32 to vector<64x32xf32>
    %186 = arith.addf %185, %184 : vector<64x32xf32>
    %187 = arith.divf %185, %186 : vector<64x32xf32>
    %188 = arith.mulf %181, %187 : vector<64x32xf32>
    %c3_128 = arith.constant 3 : index
    %c0_129 = arith.constant 0 : index
    %c0_130 = arith.constant 0 : index
    %189 = vector.load %arg6[%c3_128, %c0_129, %c0_130] : memref<6x32x64xf32, #tpu.memory_space<vmem>>, vector<1x32x64xf32>
    %190 = vector.shape_cast %189 : vector<1x32x64xf32> to vector<32x64xf32>
    %cst_131 = arith.constant dense<0.000000e+00> : vector<64x64xf32>
    %191 = tpu.matmul %188, %190, %cst_131 {dimension_numbers = #tpu.dot_dimension_numbers<[1], [0], [0], [1], [0, 0, 1, 1], [], []>} : vector<64x32xf32>, vector<32x64xf32>, vector<64x64xf32> -> vector<64x64xf32>
    %c3_132 = arith.constant 3 : index
    %c0_133 = arith.constant 0 : index
    %c0_134 = arith.constant 0 : index
    %192 = vector.load %arg7[%c3_132, %c0_133, %c0_134] : memref<6x1x64xf32, #tpu.memory_space<vmem>>, vector<1x1x64xf32>
    %193 = vector.shape_cast %192 : vector<1x1x64xf32> to vector<1x64xf32>
    %194 = vector.broadcast %193 : vector<1x64xf32> to vector<64x64xf32>
    %195 = arith.addf %191, %194 : vector<64x64xf32>
    %196 = vector.extract_strided_slice %195 {offsets = [0, 0], sizes = [64, 32], strides = [1, 1]} : vector<64x64xf32> to vector<64x32xf32>
    %197 = arith.addf %160, %196 : vector<64x32xf32>
    %198 = vector.extract_strided_slice %195 {offsets = [0, 32], sizes = [64, 32], strides = [1, 1]} : vector<64x64xf32> to vector<64x32xf32>
    %199 = arith.addf %161, %198 : vector<64x32xf32>
    %c32_135 = arith.constant 32 : index
    %c0_136 = arith.constant 0 : index
    %200 = vector.load %arg13[%c32_135, %c0_136] : memref<128x32xf32, #tpu.memory_space<vmem>>, vector<64x32xf32>
    tpu.vector_store %arg13[%c32_135, %c0_136], %197 {strides = array<i32>} : memref<128x32xf32, #tpu.memory_space<vmem>>, vector<64x32xf32>,
    %c29_137 = arith.constant 29 : index
    %c0_138 = arith.constant 0 : index
    %201 = vector.load %arg13[%c29_137, %c0_138] : memref<128x32xf32, #tpu.memory_space<vmem>>, vector<64x32xf32>
    %c35_139 = arith.constant 35 : index
    %c0_140 = arith.constant 0 : index
    %202 = vector.load %arg13[%c35_139, %c0_140] : memref<128x32xf32, #tpu.memory_space<vmem>>, vector<64x32xf32>
    %c5_141 = arith.constant 5 : index
    %c0_142 = arith.constant 0 : index
    %c0_143 = arith.constant 0 : index
    %203 = vector.load %arg5[%c5_141, %c0_142, %c0_143] : memref<8x1x64xf32, #tpu.memory_space<vmem>>, vector<1x1x64xf32>
    %204 = vector.shape_cast %203 : vector<1x1x64xf32> to vector<1x64xf32>
    %c15 = arith.constant 15 : index
    %c0_144 = arith.constant 0 : index
    %c0_145 = arith.constant 0 : index
    %205 = vector.load %arg4[%c15, %c0_144, %c0_145] : memref<24x32x64xf32, #tpu.memory_space<vmem>>, vector<1x32x64xf32>
    %206 = vector.shape_cast %205 : vector<1x32x64xf32> to vector<32x64xf32>
    %cst_146 = arith.constant dense<0.000000e+00> : vector<64x64xf32>
    %207 = tpu.matmul %201, %206, %cst_146 {dimension_numbers = #tpu.dot_dimension_numbers<[1], [0], [0], [1], [0, 0, 1, 1], [], []>} : vector<64x32xf32>, vector<32x64xf32>, vector<64x64xf32> -> vector<64x64xf32>
    %208 = vector.broadcast %204 : vector<1x64xf32> to vector<64x64xf32>
    %209 = arith.addf %208, %207 : vector<64x64xf32>
    %c16 = arith.constant 16 : index
    %c0_147 = arith.constant 0 : index
    %c0_148 = arith.constant 0 : index
    %210 = vector.load %arg4[%c16, %c0_147, %c0_148] : memref<24x32x64xf32, #tpu.memory_space<vmem>>, vector<1x32x64xf32>
    %211 = vector.shape_cast %210 : vector<1x32x64xf32> to vector<32x64xf32>
    %cst_149 = arith.constant dense<0.000000e+00> : vector<64x64xf32>
    %212 = tpu.matmul %197, %211, %cst_149 {dimension_numbers = #tpu.dot_dimension_numbers<[1], [0], [0], [1], [0, 0, 1, 1], [], []>} : vector<64x32xf32>, vector<32x64xf32>, vector<64x64xf32> -> vector<64x64xf32>
    %213 = arith.addf %209, %212 : vector<64x64xf32>
    %c17 = arith.constant 17 : index
    %c0_150 = arith.constant 0 : index
    %c0_151 = arith.constant 0 : index
    %214 = vector.load %arg4[%c17, %c0_150, %c0_151] : memref<24x32x64xf32, #tpu.memory_space<vmem>>, vector<1x32x64xf32>
    %215 = vector.shape_cast %214 : vector<1x32x64xf32> to vector<32x64xf32>
    %cst_152 = arith.constant dense<0.000000e+00> : vector<64x64xf32>
    %216 = tpu.matmul %202, %215, %cst_152 {dimension_numbers = #tpu.dot_dimension_numbers<[1], [0], [0], [1], [0, 0, 1, 1], [], []>} : vector<64x32xf32>, vector<32x64xf32>, vector<64x64xf32> -> vector<64x64xf32>
    %217 = arith.addf %213, %216 : vector<64x64xf32>
    %218 = vector.extract_strided_slice %217 {offsets = [0, 0], sizes = [64, 32], strides = [1, 1]} : vector<64x64xf32> to vector<64x32xf32>
    %219 = math.tanh %218 : vector<64x32xf32>
    %220 = vector.extract_strided_slice %217 {offsets = [0, 32], sizes = [64, 32], strides = [1, 1]} : vector<64x64xf32> to vector<64x32xf32>
    %221 = arith.negf %220 : vector<64x32xf32>
    %222 = math.exp %221 : vector<64x32xf32>
    %cst_153 = arith.constant 1.000000e+00 : f32
    %223 = vector.broadcast %cst_153 : f32 to vector<64x32xf32>
    %224 = arith.addf %223, %222 : vector<64x32xf32>
    %225 = arith.divf %223, %224 : vector<64x32xf32>
    %226 = arith.mulf %219, %225 : vector<64x32xf32>
    %c4_154 = arith.constant 4 : index
    %c0_155 = arith.constant 0 : index
    %c0_156 = arith.constant 0 : index
    %227 = vector.load %arg6[%c4_154, %c0_155, %c0_156] : memref<6x32x64xf32, #tpu.memory_space<vmem>>, vector<1x32x64xf32>
    %228 = vector.shape_cast %227 : vector<1x32x64xf32> to vector<32x64xf32>
    %cst_157 = arith.constant dense<0.000000e+00> : vector<64x64xf32>
    %229 = tpu.matmul %226, %228, %cst_157 {dimension_numbers = #tpu.dot_dimension_numbers<[1], [0], [0], [1], [0, 0, 1, 1], [], []>} : vector<64x32xf32>, vector<32x64xf32>, vector<64x64xf32> -> vector<64x64xf32>
    %c4_158 = arith.constant 4 : index
    %c0_159 = arith.constant 0 : index
    %c0_160 = arith.constant 0 : index
    %230 = vector.load %arg7[%c4_158, %c0_159, %c0_160] : memref<6x1x64xf32, #tpu.memory_space<vmem>>, vector<1x1x64xf32>
    %231 = vector.shape_cast %230 : vector<1x1x64xf32> to vector<1x64xf32>
    %232 = vector.broadcast %231 : vector<1x64xf32> to vector<64x64xf32>
    %233 = arith.addf %229, %232 : vector<64x64xf32>
    %234 = vector.extract_strided_slice %233 {offsets = [0, 0], sizes = [64, 32], strides = [1, 1]} : vector<64x64xf32> to vector<64x32xf32>
    %235 = arith.addf %197, %234 : vector<64x32xf32>
    %236 = vector.extract_strided_slice %233 {offsets = [0, 32], sizes = [64, 32], strides = [1, 1]} : vector<64x64xf32> to vector<64x32xf32>
    %237 = arith.addf %199, %236 : vector<64x32xf32>
    %c32_161 = arith.constant 32 : index
    %c0_162 = arith.constant 0 : index
    %238 = vector.load %arg13[%c32_161, %c0_162] : memref<128x32xf32, #tpu.memory_space<vmem>>, vector<64x32xf32>
    tpu.vector_store %arg13[%c32_161, %c0_162], %235 {strides = array<i32>} : memref<128x32xf32, #tpu.memory_space<vmem>>, vector<64x32xf32>,
    %c23_163 = arith.constant 23 : index
    %c0_164 = arith.constant 0 : index
    %239 = vector.load %arg13[%c23_163, %c0_164] : memref<128x32xf32, #tpu.memory_space<vmem>>, vector<64x32xf32>
    %c41_165 = arith.constant 41 : index
    %c0_166 = arith.constant 0 : index
    %240 = vector.load %arg13[%c41_165, %c0_166] : memref<128x32xf32, #tpu.memory_space<vmem>>, vector<64x32xf32>
    %c6_167 = arith.constant 6 : index
    %c0_168 = arith.constant 0 : index
    %c0_169 = arith.constant 0 : index
    %241 = vector.load %arg5[%c6_167, %c0_168, %c0_169] : memref<8x1x64xf32, #tpu.memory_space<vmem>>, vector<1x1x64xf32>
    %242 = vector.shape_cast %241 : vector<1x1x64xf32> to vector<1x64xf32>
    %c18 = arith.constant 18 : index
    %c0_170 = arith.constant 0 : index
    %c0_171 = arith.constant 0 : index
    %243 = vector.load %arg4[%c18, %c0_170, %c0_171] : memref<24x32x64xf32, #tpu.memory_space<vmem>>, vector<1x32x64xf32>
    %244 = vector.shape_cast %243 : vector<1x32x64xf32> to vector<32x64xf32>
    %cst_172 = arith.constant dense<0.000000e+00> : vector<64x64xf32>
    %245 = tpu.matmul %239, %244, %cst_172 {dimension_numbers = #tpu.dot_dimension_numbers<[1], [0], [0], [1], [0, 0, 1, 1], [], []>} : vector<64x32xf32>, vector<32x64xf32>, vector<64x64xf32> -> vector<64x64xf32>
    %246 = vector.broadcast %242 : vector<1x64xf32> to vector<64x64xf32>
    %247 = arith.addf %246, %245 : vector<64x64xf32>
    %c19 = arith.constant 19 : index
    %c0_173 = arith.constant 0 : index
    %c0_174 = arith.constant 0 : index
    %248 = vector.load %arg4[%c19, %c0_173, %c0_174] : memref<24x32x64xf32, #tpu.memory_space<vmem>>, vector<1x32x64xf32>
    %249 = vector.shape_cast %248 : vector<1x32x64xf32> to vector<32x64xf32>
    %cst_175 = arith.constant dense<0.000000e+00> : vector<64x64xf32>
    %250 = tpu.matmul %235, %249, %cst_175 {dimension_numbers = #tpu.dot_dimension_numbers<[1], [0], [0], [1], [0, 0, 1, 1], [], []>} : vector<64x32xf32>, vector<32x64xf32>, vector<64x64xf32> -> vector<64x64xf32>
    %251 = arith.addf %247, %250 : vector<64x64xf32>
    %c20 = arith.constant 20 : index
    %c0_176 = arith.constant 0 : index
    %c0_177 = arith.constant 0 : index
    %252 = vector.load %arg4[%c20, %c0_176, %c0_177] : memref<24x32x64xf32, #tpu.memory_space<vmem>>, vector<1x32x64xf32>
    %253 = vector.shape_cast %252 : vector<1x32x64xf32> to vector<32x64xf32>
    %cst_178 = arith.constant dense<0.000000e+00> : vector<64x64xf32>
    %254 = tpu.matmul %240, %253, %cst_178 {dimension_numbers = #tpu.dot_dimension_numbers<[1], [0], [0], [1], [0, 0, 1, 1], [], []>} : vector<64x32xf32>, vector<32x64xf32>, vector<64x64xf32> -> vector<64x64xf32>
    %255 = arith.addf %251, %254 : vector<64x64xf32>
    %256 = vector.extract_strided_slice %255 {offsets = [0, 0], sizes = [64, 32], strides = [1, 1]} : vector<64x64xf32> to vector<64x32xf32>
    %257 = math.tanh %256 : vector<64x32xf32>
    %258 = vector.extract_strided_slice %255 {offsets = [0, 32], sizes = [64, 32], strides = [1, 1]} : vector<64x64xf32> to vector<64x32xf32>
    %259 = arith.negf %258 : vector<64x32xf32>
    %260 = math.exp %259 : vector<64x32xf32>
    %cst_179 = arith.constant 1.000000e+00 : f32
    %261 = vector.broadcast %cst_179 : f32 to vector<64x32xf32>
    %262 = arith.addf %261, %260 : vector<64x32xf32>
    %263 = arith.divf %261, %262 : vector<64x32xf32>
    %264 = arith.mulf %257, %263 : vector<64x32xf32>
    %c5_180 = arith.constant 5 : index
    %c0_181 = arith.constant 0 : index
    %c0_182 = arith.constant 0 : index
    %265 = vector.load %arg6[%c5_180, %c0_181, %c0_182] : memref<6x32x64xf32, #tpu.memory_space<vmem>>, vector<1x32x64xf32>
    %266 = vector.shape_cast %265 : vector<1x32x64xf32> to vector<32x64xf32>
    %cst_183 = arith.constant dense<0.000000e+00> : vector<64x64xf32>
    %267 = tpu.matmul %264, %266, %cst_183 {dimension_numbers = #tpu.dot_dimension_numbers<[1], [0], [0], [1], [0, 0, 1, 1], [], []>} : vector<64x32xf32>, vector<32x64xf32>, vector<64x64xf32> -> vector<64x64xf32>
    %c5_184 = arith.constant 5 : index
    %c0_185 = arith.constant 0 : index
    %c0_186 = arith.constant 0 : index
    %268 = vector.load %arg7[%c5_184, %c0_185, %c0_186] : memref<6x1x64xf32, #tpu.memory_space<vmem>>, vector<1x1x64xf32>
    %269 = vector.shape_cast %268 : vector<1x1x64xf32> to vector<1x64xf32>
    %270 = vector.broadcast %269 : vector<1x64xf32> to vector<64x64xf32>
    %271 = arith.addf %267, %270 : vector<64x64xf32>
    %272 = vector.extract_strided_slice %271 {offsets = [0, 0], sizes = [64, 32], strides = [1, 1]} : vector<64x64xf32> to vector<64x32xf32>
    %273 = arith.addf %235, %272 : vector<64x32xf32>
    %274 = vector.extract_strided_slice %271 {offsets = [0, 32], sizes = [64, 32], strides = [1, 1]} : vector<64x64xf32> to vector<64x32xf32>
    %275 = arith.addf %237, %274 : vector<64x32xf32>
    %c32_187 = arith.constant 32 : index
    %c0_188 = arith.constant 0 : index
    %276 = vector.load %arg13[%c32_187, %c0_188] : memref<128x32xf32, #tpu.memory_space<vmem>>, vector<64x32xf32>
    tpu.vector_store %arg13[%c32_187, %c0_188], %273 {strides = array<i32>} : memref<128x32xf32, #tpu.memory_space<vmem>>, vector<64x32xf32>,
    %c5_189 = arith.constant 5 : index
    %c0_190 = arith.constant 0 : index
    %277 = vector.load %arg13[%c5_189, %c0_190] : memref<128x32xf32, #tpu.memory_space<vmem>>, vector<64x32xf32>
    %c59_191 = arith.constant 59 : index
    %c0_192 = arith.constant 0 : index
    %278 = vector.load %arg13[%c59_191, %c0_192] : memref<128x32xf32, #tpu.memory_space<vmem>>, vector<64x32xf32>
    %c7_193 = arith.constant 7 : index
    %c0_194 = arith.constant 0 : index
    %c0_195 = arith.constant 0 : index
    %279 = vector.load %arg5[%c7_193, %c0_194, %c0_195] : memref<8x1x64xf32, #tpu.memory_space<vmem>>, vector<1x1x64xf32>
    %280 = vector.shape_cast %279 : vector<1x1x64xf32> to vector<1x64xf32>
    %c21 = arith.constant 21 : index
    %c0_196 = arith.constant 0 : index
    %c0_197 = arith.constant 0 : index
    %281 = vector.load %arg4[%c21, %c0_196, %c0_197] : memref<24x32x64xf32, #tpu.memory_space<vmem>>, vector<1x32x64xf32>
    %282 = vector.shape_cast %281 : vector<1x32x64xf32> to vector<32x64xf32>
    %cst_198 = arith.constant dense<0.000000e+00> : vector<64x64xf32>
    %283 = tpu.matmul %277, %282, %cst_198 {dimension_numbers = #tpu.dot_dimension_numbers<[1], [0], [0], [1], [0, 0, 1, 1], [], []>} : vector<64x32xf32>, vector<32x64xf32>, vector<64x64xf32> -> vector<64x64xf32>
    %284 = vector.broadcast %280 : vector<1x64xf32> to vector<64x64xf32>
    %285 = arith.addf %284, %283 : vector<64x64xf32>
    %c22 = arith.constant 22 : index
    %c0_199 = arith.constant 0 : index
    %c0_200 = arith.constant 0 : index
    %286 = vector.load %arg4[%c22, %c0_199, %c0_200] : memref<24x32x64xf32, #tpu.memory_space<vmem>>, vector<1x32x64xf32>
    %287 = vector.shape_cast %286 : vector<1x32x64xf32> to vector<32x64xf32>
    %cst_201 = arith.constant dense<0.000000e+00> : vector<64x64xf32>
    %288 = tpu.matmul %273, %287, %cst_201 {dimension_numbers = #tpu.dot_dimension_numbers<[1], [0], [0], [1], [0, 0, 1, 1], [], []>} : vector<64x32xf32>, vector<32x64xf32>, vector<64x64xf32> -> vector<64x64xf32>
    %289 = arith.addf %285, %288 : vector<64x64xf32>
    %c23_202 = arith.constant 23 : index
    %c0_203 = arith.constant 0 : index
    %c0_204 = arith.constant 0 : index
    %290 = vector.load %arg4[%c23_202, %c0_203, %c0_204] : memref<24x32x64xf32, #tpu.memory_space<vmem>>, vector<1x32x64xf32>
    %291 = vector.shape_cast %290 : vector<1x32x64xf32> to vector<32x64xf32>
    %cst_205 = arith.constant dense<0.000000e+00> : vector<64x64xf32>
    %292 = tpu.matmul %278, %291, %cst_205 {dimension_numbers = #tpu.dot_dimension_numbers<[1], [0], [0], [1], [0, 0, 1, 1], [], []>} : vector<64x32xf32>, vector<32x64xf32>, vector<64x64xf32> -> vector<64x64xf32>
    %293 = arith.addf %289, %292 : vector<64x64xf32>
    %294 = vector.extract_strided_slice %293 {offsets = [0, 0], sizes = [64, 32], strides = [1, 1]} : vector<64x64xf32> to vector<64x32xf32>
    %295 = math.tanh %294 : vector<64x32xf32>
    %296 = vector.extract_strided_slice %293 {offsets = [0, 32], sizes = [64, 32], strides = [1, 1]} : vector<64x64xf32> to vector<64x32xf32>
    %297 = arith.negf %296 : vector<64x32xf32>
    %298 = math.exp %297 : vector<64x32xf32>
    %cst_206 = arith.constant 1.000000e+00 : f32
    %299 = vector.broadcast %cst_206 : f32 to vector<64x32xf32>
    %300 = arith.addf %299, %298 : vector<64x32xf32>
    %301 = arith.divf %299, %300 : vector<64x32xf32>
    %302 = arith.mulf %295, %301 : vector<64x32xf32>
    %c1_207 = arith.constant 1 : index
    %c0_208 = arith.constant 0 : index
    %c0_209 = arith.constant 0 : index
    %303 = vector.load %arg8[%c1_207, %c0_208, %c0_209] : memref<2x32x32xf32, #tpu.memory_space<vmem>>, vector<1x32x32xf32>
    %304 = vector.shape_cast %303 : vector<1x32x32xf32> to vector<32x32xf32>
    %cst_210 = arith.constant dense<0.000000e+00> : vector<64x32xf32>
    %305 = tpu.matmul %302, %304, %cst_210 {dimension_numbers = #tpu.dot_dimension_numbers<[1], [0], [0], [1], [0, 0, 1, 1], [], []>} : vector<64x32xf32>, vector<32x32xf32>, vector<64x32xf32> -> vector<64x32xf32>
    %c1_211 = arith.constant 1 : index
    %c0_212 = arith.constant 0 : index
    %c0_213 = arith.constant 0 : index
    %306 = vector.load %arg9[%c1_211, %c0_212, %c0_213] : memref<2x1x32xf32, #tpu.memory_space<vmem>>, vector<1x1x32xf32>
    %307 = vector.shape_cast %306 : vector<1x1x32xf32> to vector<1x32xf32>
    %308 = vector.broadcast %307 : vector<1x32xf32> to vector<64x32xf32>
    %309 = arith.addf %305, %308 : vector<64x32xf32>
    %310 = arith.addf %275, %309 : vector<64x32xf32>
    %c0_214 = arith.constant 0 : index
    %c0_215 = arith.constant 0 : index
    %311 = vector.load %arg10[%c0_214, %c0_215] : memref<32x32xf32, #tpu.memory_space<vmem>>, vector<32x32xf32>
    %cst_216 = arith.constant dense<0.000000e+00> : vector<64x32xf32>
    %312 = tpu.matmul %310, %311, %cst_216 {dimension_numbers = #tpu.dot_dimension_numbers<[1], [0], [0], [1], [0, 0, 1, 1], [], []>} : vector<64x32xf32>, vector<32x32xf32>, vector<64x32xf32> -> vector<64x32xf32>
    %c0_217 = arith.constant 0 : index
    %c0_218 = arith.constant 0 : index
    %313 = vector.load %arg11[%c0_217, %c0_218] : memref<1x32xf32, #tpu.memory_space<vmem>>, vector<1x32xf32>
    %314 = vector.broadcast %313 : vector<1x32xf32> to vector<64x32xf32>
    %315 = arith.addf %312, %314 : vector<64x32xf32>
    %c0_219 = arith.constant 0 : index
    %c0_220 = arith.constant 0 : index
    %c0_221 = arith.constant 0 : index
    %316 = vector.load %arg12[%c0_219, %c0_220, %c0_221] : memref<1x64x32xf32, #tpu.memory_space<vmem>>, vector<1x64x32xf32>
    %317 = vector.shape_cast %316 : vector<1x64x32xf32> to vector<64x32xf32>
    %318 = vector.shape_cast %315 : vector<64x32xf32> to vector<1x64x32xf32>
    tpu.vector_store %arg12[%c0_219, %c0_220, %c0_221], %318 {strides = array<i32>} : memref<1x64x32xf32, #tpu.memory_space<vmem>>, vector<1x64x32xf32>,
    return
  }
  func.func @transform_0(%arg0: i32) -> (i32, i32, i32) {
    %c0_i32 = arith.constant 0 : i32
    %c0_i32_0 = arith.constant 0 : i32
    %c0_i32_1 = arith.constant 0 : i32
    return %arg0, %c0_i32, %c0_i32_0 : i32, i32, i32
  }
  func.func @transform_1(%arg0: i32) -> (i32, i32) {
    %c0_i32 = arith.constant 0 : i32
    %c0_i32_0 = arith.constant 0 : i32
    %c0_i32_1 = arith.constant 0 : i32
    return %c0_i32, %c0_i32_0 : i32, i32
  }
  func.func @transform_2(%arg0: i32) -> (i32, i32) {
    %c0_i32 = arith.constant 0 : i32
    %c0_i32_0 = arith.constant 0 : i32
    %c0_i32_1 = arith.constant 0 : i32
    return %c0_i32, %c0_i32_0 : i32, i32
  }
  func.func @transform_3(%arg0: i32) -> (i32, i32, i32) {
    %c0_i32 = arith.constant 0 : i32
    %c0_i32_0 = arith.constant 0 : i32
    %c0_i32_1 = arith.constant 0 : i32
    %c0_i32_2 = arith.constant 0 : i32
    return %c0_i32, %c0_i32_0, %c0_i32_1 : i32, i32, i32
  }
  func.func @transform_4(%arg0: i32) -> (i32, i32, i32) {
    %c0_i32 = arith.constant 0 : i32
    %c0_i32_0 = arith.constant 0 : i32
    %c0_i32_1 = arith.constant 0 : i32
    %c0_i32_2 = arith.constant 0 : i32
    return %c0_i32, %c0_i32_0, %c0_i32_1 : i32, i32, i32
  }
  func.func @transform_5(%arg0: i32) -> (i32, i32, i32) {
    %c0_i32 = arith.constant 0 : i32
    %c0_i32_0 = arith.constant 0 : i32
    %c0_i32_1 = arith.constant 0 : i32
    %c0_i32_2 = arith.constant 0 : i32
    return %c0_i32, %c0_i32_0, %c0_i32_1 : i32, i32, i32
  }
  func.func @transform_6(%arg0: i32) -> (i32, i32, i32) {
    %c0_i32 = arith.constant 0 : i32
    %c0_i32_0 = arith.constant 0 : i32
    %c0_i32_1 = arith.constant 0 : i32
    %c0_i32_2 = arith.constant 0 : i32
    return %c0_i32, %c0_i32_0, %c0_i32_1 : i32, i32, i32
  }
  func.func @transform_7(%arg0: i32) -> (i32, i32, i32) {
    %c0_i32 = arith.constant 0 : i32
    %c0_i32_0 = arith.constant 0 : i32
    %c0_i32_1 = arith.constant 0 : i32
    %c0_i32_2 = arith.constant 0 : i32
    return %c0_i32, %c0_i32_0, %c0_i32_1 : i32, i32, i32
  }
  func.func @transform_8(%arg0: i32) -> (i32, i32, i32) {
    %c0_i32 = arith.constant 0 : i32
    %c0_i32_0 = arith.constant 0 : i32
    %c0_i32_1 = arith.constant 0 : i32
    %c0_i32_2 = arith.constant 0 : i32
    return %c0_i32, %c0_i32_0, %c0_i32_1 : i32, i32, i32
  }
  func.func @transform_9(%arg0: i32) -> (i32, i32) {
    %c0_i32 = arith.constant 0 : i32
    %c0_i32_0 = arith.constant 0 : i32
    %c0_i32_1 = arith.constant 0 : i32
    return %c0_i32, %c0_i32_0 : i32, i32
  }
  func.func @transform_10(%arg0: i32) -> (i32, i32) {
    %c0_i32 = arith.constant 0 : i32
    %c0_i32_0 = arith.constant 0 : i32
    %c0_i32_1 = arith.constant 0 : i32
    return %c0_i32, %c0_i32_0 : i32, i32
  }
  func.func @transform_11(%arg0: i32) -> (i32, i32, i32) {
    %c0_i32 = arith.constant 0 : i32
    %c0_i32_0 = arith.constant 0 : i32
    %c0_i32_1 = arith.constant 0 : i32
    return %arg0, %c0_i32, %c0_i32_0 : i32, i32, i32
  }
}

</mosaic_0001>

<bundles_post_ra>
// kernel: tpu_custom_call.1
= control target key start
LH: loop header
LB: loop body
LE: loop exit
PB: predicated region body
PF: predicated region fallthrough
CT: control target
= control target key end

     0   :  { %16 = vsyncpa [#allocation4], 0  ;;  %s10021_s0 = inlined_call_operand.vmem [shape: f32[2,64,8], index: 0, kind: input, shape index: {}]   ;;  %s10022_s1 = inlined_call_operand.vmem [shape: f32[8,32], index: 1, kind: input, shape index: {}]   ;;  %s10023_s2 = inlined_call_operand.vmem [shape: f32[1,32], index: 2, kind: input, shape index: {}]   ;;  %s10024_s3 = inlined_call_operand.hbm [shape: f32[24,32,64], index: 3, kind: input, shape index: {}]   ;;  %s10025_s4 = inlined_call_operand.vmem [shape: f32[8,1,64], index: 4, kind: input, shape index: {}]   ;;  %s10026_s5 = inlined_call_operand.hbm [shape: f32[6,32,64], index: 5, kind: input, shape index: {}]   ;;  %s10027_s6 = inlined_call_operand.vmem [shape: f32[6,1,64], index: 6, kind: input, shape index: {}]   ;;  %s10028_s7 = inlined_call_operand.vmem [shape: f32[2,32,32], index: 7, kind: input, shape index: {}]   ;;  %s10029_s8 = inlined_call_operand.vmem [shape: f32[2,1,32], index: 8, kind: input, shape index: {}]   ;;  %s10030_s9 = inlined_call_operand.vmem [shape: f32[32,32], index: 9, kind: input, shape index: {}]   ;;  %s10031_s10 = inlined_call_operand.vmem [shape: f32[1,32], index: 10, kind: input, shape index: {}]   ;;  %s10032_s11 = inlined_call_operand.vmem [shape: f32[2,64,32], index: 11, kind: output, shape index: {}]  }
   0x1   :  { %17 = vsyncpa [#allocation6], 0  ;;  %s8779_s17 = smov 0  }
   0x2 LB: > { %s8785_s18 = sadd.s32 4294967295, %s8710_s17   ;;  %p6761_p0 = scmp.ge.s32.totalorder %s8710_s17, 1  ;;  %s8710_s17 = sphi %s8779_s17, %s23_s17  }
   0x3   : > { %p290_p1 = scmp.lt.s32.totalorder %s8710_s17, 3  ;;  %s8712_s19 = smov [#allocation3]  }
   0x4   : > { %s308_s20 = sshll.u32 %s8712_s19, 4  ;;  %p8241_p3 = scmp.eq.s32.totalorder %s8785_s18, 0  ;;  %s309_s20 = int_to_ptr.vmem [resolvable:$true] %s308_s20 }
   0x5   : > { %p8789_p2 = pnand %p6761_p0, %p290_p1  ;;  %s8713_s22 = smov [#allocation5]  }
   0x6   : > { %s324_s23 = sshll.u32 %s8713_s22, 4  ;;  %s8655_s25 = scalar_lea.vmem %s309_s20, 12288  ;;  %s325_s23 = int_to_ptr.vmem [resolvable:$true] %s324_s23 }
   0x7   : > { %p8234_p4 = pneg %p8789_p2  ;;  %p8656_p7 = scmp.ne.s32.totalorder %s309_s20, %s8655_s25 }
   0x8   : > { %p8663_p10 = scmp.lt.s32.totalorder %s309_s20, %s309_s20  ;;  %p8664_p11 = scmp.lt.s32.totalorder %s8655_s25, %s8655_s25 }
   0x9   : > { %p8798_p5 = pnand %p8241_p3, %p8234_p4 }
   0xa   : > { %p8665_p12 = por %p8664_p11, %p8663_p10 }
   0xb   : > { %p8646_p6 = pneg %p8798_p5 }
   0xd   : > { %p8658_p8 = pnand %p8656_p7, %p8646_p6 }
   0xf   : > { %p8659_p9 = pneg %p8658_p8 }
  0x11   : > { %p8666_p13 = pnand %p8665_p12, %p8659_p9 }
  0x13   : > { %8669 = shalt.err (!%p8666_p13)
}
  0x14   : > { %s8714_s26 = smov 128   ;;  %s8715_s27 = smov 8  }
  0x15   : > { %8237 = dma.hbm_to_vmem [thread:$0]  (!%p8798_p5), %s10024_s3, 12288, %s309_s20, [#allocation4], %s8714_s26, %s8714_s26, %s8715_s27  }
  0x16   : > { %s8681_s30 = scalar_lea.vmem %s325_s23, 3072  ;;  %p8689_p7 = scmp.lt.s32.totalorder %s325_s23, %s325_s23 }
  0x17   : > { %p8682_p0 = scmp.ne.s32.totalorder %s325_s23, %s8681_s30  ;;  %p8690_p8 = scmp.lt.s32.totalorder %s8681_s30, %s8681_s30 }
  0x19   : > { %p8684_p1 = pnand %p8682_p0, %p8646_p6  ;;  %p8691_p10 = por %p8690_p8, %p8689_p7 }
  0x1b   : > { %p8685_p4 = pneg %p8684_p1 }
  0x1d   : > { %p8692_p9 = pnand %p8691_p10, %p8685_p4 }
  0x1f   : > { %8695 = shalt.err (!%p8692_p9)
}
  0x20   : > { %8240 = dma.hbm_to_vmem [thread:$0]  (!%p8798_p5), %s10026_s5, 3072, %s325_s23, [#allocation6], %s8714_s26, %s8714_s26, %s8715_s27  }
  0x21   : > { %363 = sbr.rel (%p8789_p2) target bundleno = 6167 (0x1817), region = 64 }
  0x26   : > { %8701 = dma.done.wait (%p8241_p3), [#allocation4], 12288  }
  0x27   : > { %8703 = vsyncadd (%p8241_p3), [#allocation4], 4294955008 }
  0x28   : > { %8705 = dma.done.wait (%p8241_p3), [#allocation6], 3072  }
  0x29   : > { %8707 = vsyncadd (%p8241_p3), [#allocation6], 4294964224  ;;  %p407_p6 = scmp.lt.s32.totalorder %s8785_s18, 1  ;;  %vm433_vm0 = vcmask 64512   ;;  %v425_v0 = vld [vmem:[%s10022_s1] sm:$0xff]  ;;  %v764_v9 = vld [vmem:[#allocation3 + $0x38] sm:$0xff] }
  0x2a   : > { %7552 = vmatprep.subr.mxu0 %v425_v0  ;;  %v763_v10 = vld [vmem:[#allocation3 + $0x30] sm:$0xff]  ;;  %vm571_vm1 = vcmask 261120   ;;  %v762_v11 = vld [vmem:[#allocation3 + $0x28] sm:$0xff]  ;;  %v8716_v12 = vmov 0.0   ;;  %v761_v13 = vld [vmem:[#allocation3 + $0x20] sm:$0xff]  ;;  %s8717_s26 = smov 96  }
  0x2b   : > { %s10036_s18 = smov (!%p407_p6, %s8785_s18), 1  ;;  %7553 = vmatpush3.msra.mxu0 %v425_v0  ;;  %577 = vst.msk [vmem:[#allocation2 + $0x28] sm:$0xff] %vm571_vm1, %v8716_v12  ;;  %572 = vst.msk [vmem:[#allocation2] sm:$0xff] %vm571_vm1, %v8716_v12  ;;  %v616_v14 = vld [vmem:[#allocation3 + $0x18] sm:$0xff]  ;;  %v615_v15 = vld [vmem:[#allocation3 + $0x10] sm:$0xff]  ;;  %s8718_s16 = smov 32  }
  0x2c   : > { %s7145_s14 = sshll.u32 %s10036_s18, 6  ;;  %7586 = vmatprep.subr.mxu0 %v764_v9  ;;  %573 = vst.msk [vmem:[#allocation2 + $0x8] sm:$0xff] %vm571_vm1, %v8716_v12  ;;  %574 = vst.msk [vmem:[#allocation2 + $0x10] sm:$0xff] %vm571_vm1, %v8716_v12  ;;  %7566 = vmatprep.subr.mxu1 %v616_v14  ;;  %v614_v16 = vld [vmem:[#allocation3 + $0x8] sm:$0xff]  ;;  %v613_v17 = vld [vmem:[#allocation3] sm:$0xff] }
  0x2d   : > { %s411_s19 = scalar_lea.vmem %s10021_s0, %s7145_s14  ;;  %575 = vst.msk [vmem:[#allocation2 + $0x18] sm:$0xff] %vm571_vm1, %v8716_v12  ;;  %576 = vst.msk [vmem:[#allocation2 + $0x20] sm:$0xff] %vm571_vm1, %v8716_v12  ;;  %7567 = vmatpush3.msra.mxu1 %v616_v14  ;;  %v906_v18 = vld [vmem:[#allocation3 + $0x58] sm:$0xff]  ;;  %v6772_v19 = vld [vmem:[%s10023_s2] ss:$0 sm:$0xff]  ;;  %s416_s25 = scalar_lea.vmem %s10032_s11, %s7145_s14 }
  0x2e   : > { %v417_v1 = vld [vmem:[%s411_s19] sm:$0xff]  ;;  %v418_v2 = vld [vmem:[%s411_s19 + $0x8] sm:$0xff]  ;;  %v419_v3 = vld [vmem:[%s411_s19 + $0x10] sm:$0xff]  ;;  %578 = vst.msk [vmem:[#allocation2 + $0x30] sm:$0xff] %vm571_vm1, %v8716_v12  ;;  %7568 = vmatprep.subr.mxu1 %v615_v15 }
  0x2f   : > { %7554 = vmatprep.mubr.msk.f32.mxu0 %vm433_vm0, %v417_v1  ;;  %v420_v4 = vld [vmem:[%s411_s19 + $0x18] sm:$0xff]  ;;  %v421_v5 = vld [vmem:[%s411_s19 + $0x20] sm:$0xff]  ;;  %v422_v6 = vld [vmem:[%s411_s19 + $0x28] sm:$0xff]  ;;  %579 = vst.msk [vmem:[#allocation2 + $0x38] sm:$0xff] %vm571_vm1, %v8716_v12  ;;  %7569 = vmatpush3.msra.mxu1 %v615_v15 }
  0x30   : > { %7555 = vmatmul.mubr.msk.f32.vlgmr.msra.gmra.mxu0 %vm433_vm0, %v418_v2  ;;  %v423_v7 = vld [vmem:[%s411_s19 + $0x30] sm:$0xff]  ;;  %v424_v8 = vld [vmem:[%s411_s19 + $0x38] sm:$0xff]  ;;  %580 = vst.msk [vmem:[#allocation2 + $0x40] sm:$0xff] %vm571_vm1, %v8716_v12  ;;  %581 = vst.msk [vmem:[#allocation2 + $0x48] sm:$0xff] %vm571_vm1, %v8716_v12  ;;  %7570 = vmatprep.subr.mxu1 %v614_v16 }
  0x31   : > { %7557 = vmatprep.mubr.msk.f32.mxu0 %vm433_vm0, %v419_v3  ;;  %7587 = vmatpush3.msra.mxu0 %v764_v9  ;;  %582 = vst.msk [vmem:[#allocation2 + $0x50] sm:$0xff] %vm571_vm1, %v8716_v12  ;;  %583 = vst.msk [vmem:[#allocation2 + $0x58] sm:$0xff] %vm571_vm1, %v8716_v12  ;;  %v905_v45 = vld [vmem:[#allocation3 + $0x50] sm:$0xff]  ;;  %v904_v49 = vld [vmem:[#allocation3 + $0x48] sm:$0xff] }
  0x32   : > { %7588 = vmatprep.subr.mxu0 %v763_v10  ;;  %584 = vst.msk [vmem:[#allocation2 + $0x60] sm:$0xff] %vm571_vm1, %v8716_v12  ;;  %585 = vst.msk [vmem:[#allocation2 + $0x68] sm:$0xff] %vm571_vm1, %v8716_v12  ;;  %7571 = vmatpush3.msra.mxu1 %v614_v16  ;;  %v903_v50 = vld [vmem:[#allocation3 + $0x40] sm:$0xff]  ;;  %v1143_v63 = vld [vmem:[#allocation5 + $0x18] sm:$0xff] }
  0x33   : > { %7589 = vmatpush3.msra.mxu0 %v763_v10  ;;  %586 = vst.msk [vmem:[#allocation2 + $0x70] sm:$0xff] %vm571_vm1, %v8716_v12  ;;  %587 = vst.msk [vmem:[#allocation2 + $0x78] sm:$0xff] %vm571_vm1, %v8716_v12  ;;  %7572 = vmatprep.subr.mxu1 %v613_v17  ;;  %v1142_v0 = vld [vmem:[#allocation5 + $0x10] sm:$0xff]  ;;  %v1141_v1 = vld [vmem:[#allocation5 + $0x8] sm:$0xff] }
  0x34   : > { %7558 = vmatmul.mubr.msk.f32.gmra.mxu0 %vm433_vm0, %v420_v4  ;;  %7590 = vmatprep.subr.mxu0 %v762_v11  ;;  %v6789_v9 = vld [vmem:[%s10025_s4] ss:$0 sm:$0xff] }
  0x35   : > { %7560 = vmatprep.mubr.msk.f32.mxu0 %vm433_vm0, %v421_v5  ;;  %7591 = vmatpush3.msra.mxu0 %v762_v11 }
  0x36   : > { %7592 = vmatprep.subr.mxu0 %v761_v13  ;;  %7573 = vmatpush3.msra.mxu1 %v613_v17 }
  0x37   : > { %7593 = vmatpush3.msra.mxu0 %v761_v13  ;;  %7606 = vmatprep.subr.mxu1 %v906_v18 }
  0x38   : > { %7561 = vmatmul.mubr.msk.f32.gmra.mxu0 %vm433_vm0, %v422_v6  ;;  %7626 = vmatprep.subr.mxu0 %v1143_v63 }
  0x39   : > { %7563 = vmatprep.mubr.msk.f32.mxu0 %vm433_vm0, %v423_v7 }
  0x3c   : > { %7564 = vmatmul.mubr.msk.f32.gmra.mxu0 %vm433_vm0, %v424_v8 }
  0xf0   : > { %v7556_v20 = vpop.f32.mrf.mxu0 }
  0xf1   : > { %v530_v21 = vadd.f32 %v7556_v20, %v6772_v19 }
  0xf2   : > { %v524_v22 = vpop.f32.mrf.mxu0 }
  0xf3   : > { %v8870_v23 = vmax.f32 %v530_v21, 0.0  ;;  %v525_v24 = vadd.f32 %v6772_v19, %v524_v22 }
  0xf4   : > { %v7559_v25 = vpop.f32.mrf.mxu0 }
  0xf5   : > { %589 = vst.msk [vmem:[#allocation2 + $0x28] sm:$0xff] %vm571_vm1, %v8870_v23  ;;  %v8874_v26 = vmax.f32 %v525_v24, 0.0  ;;  %v540_v27 = vadd.f32 %v7559_v25, %v6772_v19 }
  0xf6   : > { %v534_v28 = vpop.f32.mrf.mxu0 }
  0xf7   : > { %588 = vst.msk [vmem:[#allocation2 + $0x20] sm:$0xff] %vm571_vm1, %v8874_v26  ;;  %v8878_v29 = vmax.f32 %v540_v27, 0.0  ;;  %v535_v30 = vadd.f32 %v6772_v19, %v534_v28  ;;  %7594 = vmatprep.mubr.msk.f32.mxu0 %vm571_vm1, %v8874_v26 }
  0xf8   : > { %v7562_v31 = vpop.f32.mrf.mxu0  ;;  %7595 = vmatmul.mubr.msk.f32.vlgmr.msra.gmra.mxu0 %vm571_vm1, %v8870_v23 }
  0xf9   : > { %591 = vst.msk [vmem:[#allocation2 + $0x38] sm:$0xff] %vm571_vm1, %v8878_v29  ;;  %v8886_v32 = vmax.f32 %v535_v30, 0.0  ;;  %v550_v33 = vadd.f32 %v7562_v31, %v6772_v19  ;;  %7627 = vmatpush3.msra.mxu0 %v1143_v63 }
  0xfa   : > { %v544_v34 = vpop.f32.mrf.mxu0  ;;  %7628 = vmatprep.subr.mxu0 %v1142_v0 }
  0xfb   : > { %590 = vst.msk [vmem:[#allocation2 + $0x30] sm:$0xff] %vm571_vm1, %v8886_v32  ;;  %v8890_v35 = vmax.f32 %v550_v33, 0.0  ;;  %v545_v36 = vadd.f32 %v6772_v19, %v544_v34  ;;  %7597 = vmatprep.mubr.msk.f32.mxu0 %vm571_vm1, %v8886_v32  ;;  %7629 = vmatpush3.msra.mxu0 %v1142_v0 }
  0xfc   : > { %v7565_v37 = vpop.f32.mrf.mxu0  ;;  %7598 = vmatmul.mubr.msk.f32.gmra.mxu0 %vm571_vm1, %v8878_v29  ;;  %7630 = vmatprep.subr.mxu0 %v1141_v1 }
  0xfd   : > { %593 = vst.msk [vmem:[#allocation2 + $0x48] sm:$0xff] %vm571_vm1, %v8890_v35  ;;  %v8898_v38 = vmax.f32 %v545_v36, 0.0  ;;  %v560_v39 = vadd.f32 %v7565_v37, %v6772_v19  ;;  %7631 = vmatpush3.msra.mxu0 %v1141_v1 }
  0xfe   : > { %v597_v40 = vld [vmem:[#allocation2 + $0x27] sm:$0xff]  ;;  %v554_v41 = vpop.f32.mrf.mxu0  ;;  %v596_v42 = vld [vmem:[#allocation2 + $0x1f] sm:$0xff] }
  0xff   : > { %592 = vst.msk [vmem:[#allocation2 + $0x40] sm:$0xff] %vm571_vm1, %v8898_v38  ;;  %v8902_v43 = vmax.f32 %v560_v39, 0.0  ;;  %v555_v44 = vadd.f32 %v6772_v19, %v554_v41  ;;  %7574 = vmatprep.mubr.msk.f32.mxu1 %vm571_vm1, %v596_v42  ;;  %7600 = vmatprep.mubr.msk.f32.mxu0 %vm571_vm1, %v8898_v38  ;;  %v604_v55 = vld [vmem:[#allocation2 + $0x21] sm:$0xff] }
 0x100   : > { %7575 = vmatmul.mubr.msk.f32.vlgmr.msra.gmra.mxu1 %vm571_vm1, %v597_v40  ;;  %7601 = vmatmul.mubr.msk.f32.gmra.mxu0 %vm571_vm1, %v8890_v35 }
 0x101   : > { %595 = vst.msk [vmem:[#allocation2 + $0x58] sm:$0xff] %vm571_vm1, %v8902_v43  ;;  %v8912_v46 = vmax.f32 %v555_v44, 0.0  ;;  %7607 = vmatpush3.msra.mxu1 %v906_v18 }
 0x102   : > { %v598_v47 = vld [vmem:[#allocation2 + $0x2f] sm:$0xff]  ;;  %v599_v48 = vld [vmem:[#allocation2 + $0x37] sm:$0xff]  ;;  %7608 = vmatprep.subr.mxu1 %v905_v45 }
 0x103   : > { %594 = vst.msk [vmem:[#allocation2 + $0x50] sm:$0xff] %vm571_vm1, %v8912_v46  ;;  %7577 = vmatprep.mubr.msk.f32.mxu1 %vm571_vm1, %v598_v47  ;;  %7603 = vmatprep.mubr.msk.f32.mxu0 %vm571_vm1, %v8912_v46  ;;  %v605_v56 = vld [vmem:[#allocation2 + $0x29] sm:$0xff]  ;;  %v606_v57 = vld [vmem:[#allocation2 + $0x31] sm:$0xff] }
 0x104   : > { %7578 = vmatmul.mubr.msk.f32.gmra.mxu1 %vm571_vm1, %v599_v48  ;;  %7604 = vmatmul.mubr.msk.f32.gmra.mxu0 %vm571_vm1, %v8902_v43 }
 0x105   : > { %7609 = vmatpush3.msra.mxu1 %v905_v45 }
 0x106   : > { %v600_v51 = vld [vmem:[#allocation2 + $0x3f] sm:$0xff]  ;;  %v601_v52 = vld [vmem:[#allocation2 + $0x47] sm:$0xff]  ;;  %7610 = vmatprep.subr.mxu1 %v904_v49 }
 0x107   : > { %7580 = vmatprep.mubr.msk.f32.mxu1 %vm571_vm1, %v600_v51  ;;  %7611 = vmatpush3.msra.mxu1 %v904_v49  ;;  %v607_v58 = vld [vmem:[#allocation2 + $0x39] sm:$0xff]  ;;  %v608_v59 = vld [vmem:[#allocation2 + $0x41] sm:$0xff] }
 0x108   : > { %7581 = vmatmul.mubr.msk.f32.gmra.mxu1 %vm571_vm1, %v601_v52  ;;  %7612 = vmatprep.subr.mxu1 %v903_v50  ;;  %v611_v62 = vld [vmem:[#allocation2 + $0x59] sm:$0xff] }
 0x109   : > { %7613 = vmatpush3.msra.mxu1 %v903_v50 }
 0x10a   : > { %v602_v53 = vld [vmem:[#allocation2 + $0x4f] sm:$0xff]  ;;  %v603_v54 = vld [vmem:[#allocation2 + $0x57] sm:$0xff] }
 0x10b   : > { %7583 = vmatprep.mubr.msk.f32.mxu1 %vm571_vm1, %v602_v53  ;;  %v609_v60 = vld [vmem:[#allocation2 + $0x49] sm:$0xff]  ;;  %v610_v61 = vld [vmem:[#allocation2 + $0x51] sm:$0xff] }
 0x10c   : > { %7584 = vmatmul.mubr.msk.f32.gmra.mxu1 %vm571_vm1, %v603_v54 }
 0x10d   : > { %7614 = vmatprep.mubr.msk.f32.mxu1 %vm571_vm1, %v604_v55 }
 0x110   : > { %7615 = vmatmul.mubr.msk.f32.vlgmr.msra.gmra.mxu1 %vm571_vm1, %v605_v56 }
 0x111   : > { %7617 = vmatprep.mubr.msk.f32.mxu1 %vm571_vm1, %v606_v57 }
 0x114   : > { %7618 = vmatmul.mubr.msk.f32.gmra.mxu1 %vm571_vm1, %v607_v58 }
 0x115   : > { %7620 = vmatprep.mubr.msk.f32.mxu1 %vm571_vm1, %v608_v59 }
 0x118   : > { %7621 = vmatmul.mubr.msk.f32.gmra.mxu1 %vm571_vm1, %v609_v60 }
 0x119   : > { %7623 = vmatprep.mubr.msk.f32.mxu1 %vm571_vm1, %v610_v61 }
 0x11c   : > { %7624 = vmatmul.mubr.msk.f32.gmra.mxu1 %vm571_vm1, %v611_v62 }
 0x1b8   : > { %v7596_v2 = vpop.f32.mrf.mxu0 }
 0x1ba   : > { %v855_v5 = vpop.f32.mrf.mxu0 }
 0x1bc   : > { %v7599_v8 = vpop.f32.mrf.mxu0 }
 0x1be   : > { %v865_v13 = vpop.f32.mrf.mxu0 }
 0x1c0   : > { %v7576_v3 = vpop.f32.mrf.mxu1  ;;  %v7602_v19 = vpop.f32.mrf.mxu0 }
 0x1c1   : > { %v753_v12 = vadd.f32 %v7576_v3, %v6789_v9 }
 0x1c2   : > { %v707_v4 = vpop.f32.mrf.mxu1  ;;  %v875_v33 = vpop.f32.mrf.mxu0 }
 0x1c3   : > { %v752_v15 = vadd.f32 %v6789_v9, %v707_v4  ;;  %v895_v18 = vadd.f32 %v7596_v2, %v753_v12 }
 0x1c4   : > { %v7579_v6 = vpop.f32.mrf.mxu1  ;;  %v7605_v48 = vpop.f32.mrf.mxu0 }
 0x1c5   : > { %v755_v17 = vadd.f32 %v7579_v6, %v6789_v9  ;;  %v894_v24 = vadd.f32 %v855_v5, %v752_v15 }
 0x1c6   : > { %v717_v7 = vpop.f32.mrf.mxu1  ;;  %v885_v58 = vpop.f32.mrf.mxu0 }
 0x1c7   : > { %v754_v21 = vadd.f32 %v6789_v9, %v717_v7  ;;  %v897_v31 = vadd.f32 %v7599_v8, %v755_v17 }
 0x1c8   : > { %v7582_v10 = vpop.f32.mrf.mxu1 }
 0x1c9   : > { %v757_v25 = vadd.f32 %v7582_v10, %v6789_v9  ;;  %v896_v40 = vadd.f32 %v865_v13, %v754_v21 }
 0x1ca   : > { %v727_v11 = vpop.f32.mrf.mxu1 }
 0x1cb   : > { %v756_v36 = vadd.f32 %v6789_v9, %v727_v11  ;;  %v899_v42 = vadd.f32 %v7602_v19, %v757_v25  ;;  %v1326_v25 = vld [vmem:[#allocation3 + $0x78] sm:$0xff] }
 0x1cc   : > { %v7585_v14 = vpop.f32.mrf.mxu1  ;;  %7646 = vmatprep.subr.mxu1 %v1326_v25 }
 0x1cd   : > { %v759_v44 = vadd.f32 %v7585_v14, %v6789_v9  ;;  %v898_v53 = vadd.f32 %v875_v33, %v756_v36  ;;  %7647 = vmatpush3.msra.mxu1 %v1326_v25 }
 0x1ce   : > { %v737_v16 = vpop.f32.mrf.mxu1 }
 0x1cf   : > { %v758_v50 = vadd.f32 %v6789_v9, %v737_v16  ;;  %v901_v57 = vadd.f32 %v7605_v48, %v759_v44  ;;  %v1140_v9 = vld [vmem:[#allocation5] sm:$0xff] }
 0x1d0   : > { %v7616_v20 = vpop.f32.mrf.mxu1  ;;  %7632 = vmatprep.subr.mxu0 %v1140_v9 }
 0x1d1   : > { %v8937_v22 = vadd.f32 %v7616_v20, %v895_v18  ;;  %v900_v62 = vadd.f32 %v885_v58, %v758_v50  ;;  %7633 = vmatpush3.msra.mxu0 %v1140_v9 }
 0x1d2   : > { %v997_v27 = vpop.f32.mrf.mxu1 }
 0x1d3   : > { %v6807_v28 = vmul.f32 -1.442695, %v8937_v22  ;;  %v8940_v30 = vadd.f32 %v997_v27, %v894_v24 }
 0x1d4   : > { %v7619_v34 = vpop.f32.mrf.mxu1 }
 0x1d5   : > { %v6806_v37 = vmul.f32 -1.442695, %v8940_v30  ;;  %v8943_v39 = vadd.f32 %v7619_v34, %v897_v31  ;;  %8260 = vpow2.f32 %v6807_v28 }
 0x1d6   : > { %v1007_v41 = vpop.f32.mrf.mxu1 }
 0x1d7   : > { %8262 = vpow2.f32 %v6806_v37  ;;  %v6809_v45 = vmul.f32 -1.442695, %v8943_v39  ;;  %v8946_v47 = vadd.f32 %v1007_v41, %v896_v40 }
 0x1d8   : > { %v7622_v49 = vpop.f32.mrf.mxu1 }
 0x1d9   : > { %v6808_v51 = vmul.f32 -1.442695, %v8946_v47  ;;  %v8949_v52 = vadd.f32 %v7622_v49, %v899_v42  ;;  %8264 = vpow2.f32 %v6809_v45 }
 0x1da   : > { %v1017_v54 = vpop.f32.mrf.mxu1 }
 0x1db   : > { %8266 = vpow2.f32 %v6808_v51  ;;  %v6811_v55 = vmul.f32 -1.442695, %v8949_v52  ;;  %v8952_v56 = vadd.f32 %v1017_v54, %v898_v53 }
 0x1dc   : > { %v7625_v59 = vpop.f32.mrf.mxu1 }
 0x1dd   : > { %v6810_v60 = vmul.f32 -1.442695, %v8952_v56  ;;  %v8955_v61 = vadd.f32 %v7625_v59, %v901_v57  ;;  %8268 = vpow2.f32 %v6811_v55 }
 0x1de   : > { %v1027_v63 = vpop.f32.mrf.mxu1 }
 0x1df   : > { %8270 = vpow2.f32 %v6810_v60  ;;  %v6813_v0 = vmul.f32 -1.442695, %v8955_v61  ;;  %v1042_v1 = vadd.f32 %v1027_v63, %v900_v62  ;;  %v1473_v62 = vld [vmem:[#allocation3 + $0x90] sm:$0xff]  ;;  %v1472_v63 = vld [vmem:[#allocation3 + $0x88] sm:$0xff] }
 0x1e1   : > { %v6812_v2 = vmul.f32 -1.442695, %v1042_v1  ;;  %8272 = vpow2.f32 %v6813_v0  ;;  %v1471_v0 = vld [vmem:[#allocation3 + $0x80] sm:$0xff] }
 0x1e2   : > { %v8261_v3 = vpop.eup %8260 }
 0x1e3   : > { %8274 = vpow2.f32 %v6812_v2  ;;  %v1077_v6 = vadd.f32 1.0, %v8261_v3  ;;  %v1324_v2 = vld [vmem:[#allocation3 + $0x68] sm:$0xff]  ;;  %v1323_v3 = vld [vmem:[#allocation3 + $0x60] sm:$0xff] }
 0x1e4   : > { %v8263_v4 = vpop.eup %8262 }
 0x1e5   : > { %v1076_v5 = vadd.f32 1.0, %v8263_v4  ;;  %v1616_v4 = vld [vmem:[#allocation3 + $0xb8] sm:$0xff] }
 0x1e6   : > { %v8265_v7 = vpop.eup %8264 }
 0x1e7   : > { %8276 = vrcp.f32 %v1076_v5  ;;  %v1079_v11 = vadd.f32 1.0, %v8265_v7  ;;  %v6814_v5 = vld [vmem:[%s10027_s6] ss:$0 sm:$0xff] }
 0x1e8   : > { %v8267_v8 = vpop.eup %8266  ;;  %8278 = vrcp.f32 %v1077_v6 }
 0x1e9   : > { %v1078_v10 = vadd.f32 1.0, %v8267_v8 }
 0x1ea   : > { %v8269_v12 = vpop.eup %8268 }
 0x1eb   : > { %8280 = vrcp.f32 %v1078_v10  ;;  %v1081_v15 = vadd.f32 1.0, %v8269_v12 }
 0x1ec   : > { %v8271_v13 = vpop.eup %8270  ;;  %8282 = vrcp.f32 %v1079_v11 }
 0x1ed   : > { %v1080_v14 = vadd.f32 1.0, %v8271_v13 }
 0x1ee   : > { %v8273_v16 = vpop.eup %8272 }
 0x1ef   : > { %8284 = vrcp.f32 %v1080_v14  ;;  %v1083_v19 = vadd.f32 1.0, %v8273_v16 }
 0x1f0   : > { %v8275_v17 = vpop.eup %8274  ;;  %8286 = vrcp.f32 %v1081_v15 }
 0x1f1   : > { %v1082_v18 = vadd.f32 1.0, %v8275_v17 }
 0x1f3   : > { %8288 = vrcp.f32 %v1082_v18 }
 0x1f4   : > { %v8277_v20 = vpop.eup %8276  ;;  %8290 = vrcp.f32 %v1083_v19 }
 0x1f5   : > { %1108 = vrot.lane.b32.xlu0 %v8277_v20, %s8717_s26  ;;  %v8279_v21 = vpop.eup %8278  ;;  %8292 = vtanh.f32 %v8940_v30 }
 0x1f6   : > { %8294 = vtanh.f32 %v8937_v22 }
 0x1f7   : > { %8296 = vtanh.f32 %v8946_v47 }
 0x1f8   : > { %v8281_v24 = vpop.eup %8280  ;;  %8298 = vtanh.f32 %v8943_v39 }
 0x1f9   : > { %1110 = vrot.lane.b32.xlu0 %v8279_v21, %s8717_s26  ;;  %1112 = vrot.lane.b32.xlu1 %v8281_v24, %s8717_s26  ;;  %v8283_v27 = vpop.eup %8282  ;;  %8300 = vtanh.f32 %v8952_v56 }
 0x1fa   : > { %8302 = vtanh.f32 %v8949_v52 }
 0x1fb   : > { %8304 = vtanh.f32 %v1042_v1  ;;  %v1325_v1 = vld [vmem:[#allocation3 + $0x70] sm:$0xff] }
 0x1fc   : > { %v8285_v28 = vpop.eup %8284  ;;  %8306 = vtanh.f32 %v8955_v61  ;;  %v1474_v61 = vld [vmem:[#allocation3 + $0x98] sm:$0xff]  ;;  %7648 = vmatprep.subr.mxu1 %v1325_v1 }
 0x1fd   : > { %1114 = vrot.lane.b32.xlu1 %v8283_v27, %s8717_s26  ;;  %1116 = vrot.lane.b32.xlu0 %v8285_v28, %s8717_s26  ;;  %v8287_v31 = vpop.eup %8286 }
 0x1fe   : > { %7666 = vmatprep.subr.mxu0 %v1474_v61  ;;  %7649 = vmatpush3.msra.mxu1 %v1325_v1 }
 0x1ff   : > { %7650 = vmatprep.subr.mxu1 %v1324_v2 }
 0x200   : > { %v8289_v33 = vpop.eup %8288  ;;  %7651 = vmatpush3.msra.mxu1 %v1324_v2 }
 0x201   : > { %1118 = vrot.lane.b32.xlu1 %v8287_v31, %s8717_s26  ;;  %1120 = vrot.lane.b32.xlu0 %v8289_v33, %s8717_s26  ;;  %v8291_v34 = vpop.eup %8290 }
 0x202   : > { %v8293_v36 = vpop.eup %8292  ;;  %7652 = vmatprep.subr.mxu1 %v1323_v3 }
 0x203   : > { %v8295_v41 = vpop.eup %8294  ;;  %7653 = vmatpush3.msra.mxu1 %v1323_v3 }
 0x204   : > { %v8297_v30 = vpop.eup %8296  ;;  %7686 = vmatprep.subr.mxu1 %v1616_v4 }
 0x205   : > { %1122 = vrot.lane.b32.xlu1 %v8291_v34, %s8717_s26  ;;  %v8299_v47 = vpop.eup %8298  ;;  %v1614_v34 = vld [vmem:[#allocation3 + $0xa8] sm:$0xff] }
 0x206   : > { %v8301_v39 = vpop.eup %8300 }
 0x207   : > { %v8303_v52 = vpop.eup %8302 }
 0x208   : > { %v8305_v53 = vpop.eup %8304 }
 0x209   : > { %v8307_v58 = vpop.eup %8306 }
 0x267   : > { %v1109_v37 = vpop.permute.xlu0 %1108 }
 0x268   : > { %v1132_v40 = vmul.f32 %v8293_v36, %v1109_v37 }
 0x26a   : > { %7634 = vmatprep.mubr.msk.f32.mxu0 %vm571_vm1, %v1132_v40 }
 0x26b   : > { %v1111_v42 = vpop.permute.xlu0 %1110  ;;  %v1113_v22 = vpop.permute.xlu1 %1112 }
 0x26c   : > { %v1133_v44 = vmul.f32 %v8295_v41, %v1111_v42  ;;  %v1134_v45 = vmul.f32 %v8297_v30, %v1113_v22 }
 0x26e   : > { %7635 = vmatmul.mubr.msk.f32.vlgmr.msra.gmra.mxu0 %vm571_vm1, %v1133_v44 }
 0x26f   : > { %v1115_v48 = vpop.permute.xlu1 %1114  ;;  %7637 = vmatprep.mubr.msk.f32.mxu0 %vm571_vm1, %v1134_v45  ;;  %v1117_v49 = vpop.permute.xlu0 %1116  ;;  %7667 = vmatpush3.msra.mxu0 %v1474_v61 }
 0x270   : > { %v1135_v50 = vmul.f32 %v8299_v47, %v1115_v48  ;;  %v1136_v51 = vmul.f32 %v8301_v39, %v1117_v49  ;;  %7668 = vmatprep.subr.mxu0 %v1473_v62  ;;  %v1854_v49 = vld [vmem:[#allocation5 + $0x38] sm:$0xff] }
 0x271   : > { %7669 = vmatpush3.msra.mxu0 %v1473_v62 }
 0x272   : > { %7638 = vmatmul.mubr.msk.f32.gmra.mxu0 %vm571_vm1, %v1135_v50  ;;  %7670 = vmatprep.subr.mxu0 %v1472_v63  ;;  %v1853_v50 = vld [vmem:[#allocation5 + $0x30] sm:$0xff] }
 0x273   : > { %v1119_v54 = vpop.permute.xlu1 %1118  ;;  %7640 = vmatprep.mubr.msk.f32.mxu0 %vm571_vm1, %v1136_v51  ;;  %v1121_v55 = vpop.permute.xlu0 %1120  ;;  %7671 = vmatpush3.msra.mxu0 %v1472_v63  ;;  %v1852_v51 = vld [vmem:[#allocation5 + $0x28] sm:$0xff] }
 0x274   : > { %v1137_v56 = vmul.f32 %v8303_v52, %v1119_v54  ;;  %v1138_v57 = vmul.f32 %v8305_v53, %v1121_v55  ;;  %7672 = vmatprep.subr.mxu0 %v1471_v0 }
 0x275   : > { %7673 = vmatpush3.msra.mxu0 %v1471_v0 }
 0x276   : > { %7641 = vmatmul.mubr.msk.f32.gmra.mxu0 %vm571_vm1, %v1137_v56  ;;  %7706 = vmatprep.subr.mxu0 %v1854_v49 }
 0x277   : > { %v1123_v59 = vpop.permute.xlu1 %1122  ;;  %7643 = vmatprep.mubr.msk.f32.mxu0 %vm571_vm1, %v1138_v57 }
 0x278   : > { %v1139_v60 = vmul.f32 %v8307_v58, %v1123_v59  ;;  %v6832_v59 = vld [vmem:[%s10025_s4 + $0x1] ss:$0 sm:$0xff] }
 0x27a   : > { %7644 = vmatmul.mubr.msk.f32.gmra.mxu0 %vm571_vm1, %v1139_v60 }
 0x32e   : > { %v7636_v6 = vpop.f32.mrf.mxu0 }
 0x32f   : > { %v8984_v7 = vadd.f32 %v7636_v6, %v6814_v5 }
 0x330   : > { %v1241_v8 = vpop.f32.mrf.mxu0 }
 0x331   : > { %v8988_v9 = vadd.f32 %v8984_v7, %v8870_v23  ;;  %v8990_v10 = vadd.f32 %v6814_v5, %v1241_v8 }
 0x332   : > { %v7639_v11 = vpop.f32.mrf.mxu0 }
 0x333   : > { %1297 = vst.msk [vmem:[#allocation2 + $0x28] sm:$0xff] %vm571_vm1, %v8988_v9  ;;  %v8996_v12 = vadd.f32 %v8990_v10, %v8874_v26  ;;  %v8998_v13 = vadd.f32 %v7639_v11, %v6814_v5 }
 0x334   : > { %v1251_v14 = vpop.f32.mrf.mxu0 }
 0x335   : > { %1296 = vst.msk [vmem:[#allocation2 + $0x20] sm:$0xff] %vm571_vm1, %v8996_v12  ;;  %v9004_v23 = vadd.f32 %v8998_v13, %v8878_v29  ;;  %v9006_v15 = vadd.f32 %v6814_v5, %v1251_v14  ;;  %7674 = vmatprep.mubr.msk.f32.mxu0 %vm571_vm1, %v8996_v12 }
 0x336   : > { %v7642_v16 = vpop.f32.mrf.mxu0  ;;  %7675 = vmatmul.mubr.msk.f32.vlgmr.msra.gmra.mxu0 %vm571_vm1, %v8988_v9 }
 0x337   : > { %1299 = vst.msk [vmem:[#allocation2 + $0x38] sm:$0xff] %vm571_vm1, %v9004_v23  ;;  %v9016_v26 = vadd.f32 %v9006_v15, %v8886_v32  ;;  %v9018_v17 = vadd.f32 %v7642_v16, %v6814_v5  ;;  %7707 = vmatpush3.msra.mxu0 %v1854_v49 }
 0x338   : > { %v1261_v29 = vpop.f32.mrf.mxu0  ;;  %7708 = vmatprep.subr.mxu0 %v1853_v50 }
 0x339   : > { %1298 = vst.msk [vmem:[#allocation2 + $0x30] sm:$0xff] %vm571_vm1, %v9016_v26  ;;  %v9024_v18 = vadd.f32 %v9018_v17, %v8890_v35  ;;  %v9026_v19 = vadd.f32 %v6814_v5, %v1261_v29  ;;  %7677 = vmatprep.mubr.msk.f32.mxu0 %vm571_vm1, %v9016_v26  ;;  %7709 = vmatpush3.msra.mxu0 %v1853_v50 }
 0x33a   : > { %v7645_v20 = vpop.f32.mrf.mxu0  ;;  %7678 = vmatmul.mubr.msk.f32.gmra.mxu0 %vm571_vm1, %v9004_v23  ;;  %7710 = vmatprep.subr.mxu0 %v1852_v51 }
 0x33b   : > { %1301 = vst.msk [vmem:[#allocation2 + $0x48] sm:$0xff] %vm571_vm1, %v9024_v18  ;;  %v9036_v32 = vadd.f32 %v9026_v19, %v8898_v38  ;;  %v9038_v21 = vadd.f32 %v7645_v20, %v6814_v5  ;;  %v1615_v38 = vld [vmem:[#allocation3 + $0xb0] sm:$0xff]  ;;  %7711 = vmatpush3.msra.mxu0 %v1852_v51 }
 0x33c   : > { %v1271_v35 = vpop.f32.mrf.mxu0  ;;  %v1304_v24 = vld [vmem:[#allocation2 + $0x1d] sm:$0xff]  ;;  %v1305_v25 = vld [vmem:[#allocation2 + $0x25] sm:$0xff] }
 0x33d   : > { %1300 = vst.msk [vmem:[#allocation2 + $0x40] sm:$0xff] %vm571_vm1, %v9036_v32  ;;  %v9044_v27 = vadd.f32 %v9038_v21, %v8902_v43  ;;  %v9046_v28 = vadd.f32 %v6814_v5, %v1271_v35  ;;  %7654 = vmatprep.mubr.msk.f32.mxu1 %vm571_vm1, %v1304_v24  ;;  %7680 = vmatprep.mubr.msk.f32.mxu0 %vm571_vm1, %v9036_v32  ;;  %v1312_v30 = vld [vmem:[#allocation2 + $0x23] sm:$0xff] }
 0x33e   : > { %7655 = vmatmul.mubr.msk.f32.vlgmr.msra.gmra.mxu1 %vm571_vm1, %v1305_v25  ;;  %7681 = vmatmul.mubr.msk.f32.gmra.mxu0 %vm571_vm1, %v9024_v18 }
 0x33f   : > { %1303 = vst.msk [vmem:[#allocation2 + $0x58] sm:$0xff] %vm571_vm1, %v9044_v27  ;;  %v9058_v43 = vadd.f32 %v9046_v28, %v8912_v46  ;;  %7687 = vmatpush3.msra.mxu1 %v1616_v4  ;;  %v1613_v46 = vld [vmem:[#allocation3 + $0xa0] sm:$0xff] }
 0x340   : > { %v1306_v31 = vld [vmem:[#allocation2 + $0x2d] sm:$0xff]  ;;  %7688 = vmatprep.subr.mxu1 %v1615_v38  ;;  %v1307_v33 = vld [vmem:[#allocation2 + $0x35] sm:$0xff] }
 0x341   : > { %1302 = vst.msk [vmem:[#allocation2 + $0x50] sm:$0xff] %vm571_vm1, %v9058_v43  ;;  %7657 = vmatprep.mubr.msk.f32.mxu1 %vm571_vm1, %v1306_v31  ;;  %7683 = vmatprep.mubr.msk.f32.mxu0 %vm571_vm1, %v9058_v43  ;;  %v1313_v42 = vld [vmem:[#allocation2 + $0x2b] sm:$0xff]  ;;  %v1314_v22 = vld [vmem:[#allocation2 + $0x33] sm:$0xff] }
 0x342   : > { %7658 = vmatmul.mubr.msk.f32.gmra.mxu1 %vm571_vm1, %v1307_v33  ;;  %7684 = vmatmul.mubr.msk.f32.gmra.mxu0 %vm571_vm1, %v9044_v27 }
 0x343   : > { %7689 = vmatpush3.msra.mxu1 %v1615_v38 }
 0x344   : > { %v1308_v36 = vld [vmem:[#allocation2 + $0x3d] sm:$0xff]  ;;  %7690 = vmatprep.subr.mxu1 %v1614_v34  ;;  %v1309_v37 = vld [vmem:[#allocation2 + $0x45] sm:$0xff] }
 0x345   : > { %7660 = vmatprep.mubr.msk.f32.mxu1 %vm571_vm1, %v1308_v36  ;;  %7691 = vmatpush3.msra.mxu1 %v1614_v34  ;;  %v1315_v44 = vld [vmem:[#allocation2 + $0x3b] sm:$0xff]  ;;  %v1316_v45 = vld [vmem:[#allocation2 + $0x43] sm:$0xff] }
 0x346   : > { %7661 = vmatmul.mubr.msk.f32.gmra.mxu1 %vm571_vm1, %v1309_v37  ;;  %7692 = vmatprep.subr.mxu1 %v1613_v46  ;;  %v1319_v48 = vld [vmem:[#allocation2 + $0x5b] sm:$0xff] }
 0x347   : > { %7693 = vmatpush3.msra.mxu1 %v1613_v46 }
 0x348   : > { %v1310_v40 = vld [vmem:[#allocation2 + $0x4d] sm:$0xff]  ;;  %v1311_v41 = vld [vmem:[#allocation2 + $0x55] sm:$0xff] }
 0x349   : > { %7663 = vmatprep.mubr.msk.f32.mxu1 %vm571_vm1, %v1310_v40  ;;  %v1317_v47 = vld [vmem:[#allocation2 + $0x4b] sm:$0xff]  ;;  %v1318_v39 = vld [vmem:[#allocation2 + $0x53] sm:$0xff] }
 0x34a   : > { %7664 = vmatmul.mubr.msk.f32.gmra.mxu1 %vm571_vm1, %v1311_v41 }
 0x34b   : > { %7694 = vmatprep.mubr.msk.f32.mxu1 %vm571_vm1, %v1312_v30 }
 0x34e   : > { %7695 = vmatmul.mubr.msk.f32.vlgmr.msra.gmra.mxu1 %vm571_vm1, %v1313_v42 }
 0x34f   : > { %7697 = vmatprep.mubr.msk.f32.mxu1 %vm571_vm1, %v1314_v22 }
 0x352   : > { %7698 = vmatmul.mubr.msk.f32.gmra.mxu1 %vm571_vm1, %v1315_v44 }
 0x353   : > { %7700 = vmatprep.mubr.msk.f32.mxu1 %vm571_vm1, %v1316_v45 }
 0x356   : > { %7701 = vmatmul.mubr.msk.f32.gmra.mxu1 %vm571_vm1, %v1317_v47 }
 0x357   : > { %7703 = vmatprep.mubr.msk.f32.mxu1 %vm571_vm1, %v1318_v39 }
 0x35a   : > { %7704 = vmatmul.mubr.msk.f32.gmra.mxu1 %vm571_vm1, %v1319_v48 }
 0x3f6   : > { %v7676_v52 = vpop.f32.mrf.mxu0 }
 0x3f8   : > { %v1565_v55 = vpop.f32.mrf.mxu0 }
 0x3fa   : > { %v7679_v58 = vpop.f32.mrf.mxu0 }
 0x3fc   : > { %v1575_v63 = vpop.f32.mrf.mxu0 }
 0x3fe   : > { %v7656_v53 = vpop.f32.mrf.mxu1  ;;  %v7682_v5 = vpop.f32.mrf.mxu0 }
 0x3ff   : > { %v1463_v62 = vadd.f32 %v7656_v53, %v6832_v59 }
 0x400   : > { %v1417_v54 = vpop.f32.mrf.mxu1  ;;  %v1585_v25 = vpop.f32.mrf.mxu0 }
 0x401   : > { %v1462_v1 = vadd.f32 %v6832_v59, %v1417_v54  ;;  %v1605_v4 = vadd.f32 %v7676_v52, %v1463_v62 }
 0x402   : > { %v7659_v56 = vpop.f32.mrf.mxu1  ;;  %v7685_v42 = vpop.f32.mrf.mxu0 }
 0x403   : > { %v1465_v3 = vadd.f32 %v7659_v56, %v6832_v59  ;;  %v1604_v14 = vadd.f32 %v1565_v55, %v1462_v1 }
 0x404   : > { %v1427_v57 = vpop.f32.mrf.mxu1  ;;  %v1595_v52 = vpop.f32.mrf.mxu0 }
 0x405   : > { %v1464_v8 = vadd.f32 %v6832_v59, %v1427_v57  ;;  %v1607_v24 = vadd.f32 %v7679_v58, %v1465_v3 }
 0x406   : > { %v7662_v60 = vpop.f32.mrf.mxu1 }
 0x407   : > { %v1467_v16 = vadd.f32 %v7662_v60, %v6832_v59  ;;  %v1606_v46 = vadd.f32 %v1575_v63, %v1464_v8 }
 0x408   : > { %v1437_v61 = vpop.f32.mrf.mxu1 }
 0x409   : > { %v1466_v38 = vadd.f32 %v6832_v59, %v1437_v61  ;;  %v1609_v37 = vadd.f32 %v7682_v5, %v1467_v16 }
 0x40a   : > { %v7665_v0 = vpop.f32.mrf.mxu1 }
 0x40b   : > { %v1469_v40 = vadd.f32 %v7665_v0, %v6832_v59  ;;  %v1608_v44 = vadd.f32 %v1585_v25, %v1466_v38 }
 0x40c   : > { %v1447_v2 = vpop.f32.mrf.mxu1 }
 0x40d   : > { %v1468_v45 = vadd.f32 %v6832_v59, %v1447_v2  ;;  %v1611_v51 = vadd.f32 %v7685_v42, %v1469_v40  ;;  %v1851_v2 = vld [vmem:[#allocation5 + $0x20] sm:$0xff] }
 0x40e   : > { %v7696_v6 = vpop.f32.mrf.mxu1  ;;  %7712 = vmatprep.subr.mxu0 %v1851_v2 }
 0x40f   : > { %v9083_v11 = vadd.f32 %v7696_v6, %v1605_v4  ;;  %v1610_v56 = vadd.f32 %v1595_v52, %v1468_v45  ;;  %7713 = vmatpush3.msra.mxu0 %v1851_v2  ;;  %v2183_v2 = vld [vmem:[#allocation3 + $0xe0] sm:$0xff] }
 0x410   : > { %v1707_v29 = vpop.f32.mrf.mxu1 }
 0x411   : > { %v6850_v20 = vmul.f32 -1.442695, %v9083_v11  ;;  %v9086_v35 = vadd.f32 %v1707_v29, %v1604_v14 }
 0x412   : > { %v7699_v31 = vpop.f32.mrf.mxu1 }
 0x413   : > { %8308 = vpow2.f32 %v6850_v20  ;;  %v6849_v33 = vmul.f32 -1.442695, %v9086_v35  ;;  %v9089_v34 = vadd.f32 %v7699_v31, %v1607_v24 }
 0x414   : > { %v1717_v36 = vpop.f32.mrf.mxu1 }
 0x415   : > { %8310 = vpow2.f32 %v6849_v33  ;;  %v6852_v41 = vmul.f32 -1.442695, %v9089_v34  ;;  %v9092_v30 = vadd.f32 %v1717_v36, %v1606_v46  ;;  %v2038_v46 = vld [vmem:[#allocation3 + $0xd8] sm:$0xff] }
 0x416   : > { %v7702_v22 = vpop.f32.mrf.mxu1  ;;  %7726 = vmatprep.subr.mxu1 %v2038_v46 }
 0x417   : > { %8312 = vpow2.f32 %v6852_v41  ;;  %v6851_v47 = vmul.f32 -1.442695, %v9092_v30  ;;  %v9095_v39 = vadd.f32 %v7702_v22, %v1609_v37  ;;  %7727 = vmatpush3.msra.mxu1 %v2038_v46 }
 0x418   : > { %v1727_v48 = vpop.f32.mrf.mxu1 }
 0x419   : > { %8314 = vpow2.f32 %v6851_v47  ;;  %v6854_v49 = vmul.f32 -1.442695, %v9095_v39  ;;  %v9098_v50 = vadd.f32 %v1727_v48, %v1608_v44 }
 0x41a   : > { %v7705_v53 = vpop.f32.mrf.mxu1 }
 0x41b   : > { %8316 = vpow2.f32 %v6854_v49  ;;  %v6853_v54 = vmul.f32 -1.442695, %v9098_v50  ;;  %v9101_v55 = vadd.f32 %v7705_v53, %v1611_v51 }
 0x41c   : > { %v1737_v57 = vpop.f32.mrf.mxu1 }
 0x41d   : > { %8318 = vpow2.f32 %v6853_v54  ;;  %v6856_v58 = vmul.f32 -1.442695, %v9101_v55  ;;  %v1752_v59 = vadd.f32 %v1737_v57, %v1610_v56 }
 0x41f   : > { %8320 = vpow2.f32 %v6856_v58  ;;  %v6855_v60 = vmul.f32 -1.442695, %v1752_v59 }
 0x420   : > { %v8309_v61 = vpop.eup %8308 }
 0x421   : > { %v1787_v62 = vadd.f32 1.0, %v8309_v61  ;;  %8322 = vpow2.f32 %v6855_v60 }
 0x422   : > { %v8311_v63 = vpop.eup %8310 }
 0x423   : > { %8324 = vrcp.f32 %v1787_v62  ;;  %v1786_v0 = vadd.f32 1.0, %v8311_v63  ;;  %v2186_v63 = vld [vmem:[#allocation3 + $0xf8] sm:$0xff] }
 0x424   : > { %v8313_v1 = vpop.eup %8312  ;;  %7746 = vmatprep.subr.mxu0 %v2186_v63 }
 0x425   : > { %8326 = vrcp.f32 %v1786_v0  ;;  %v1789_v3 = vadd.f32 1.0, %v8313_v1  ;;  %v2185_v0 = vld [vmem:[#allocation3 + $0xf0] sm:$0xff]  ;;  %v2184_v1 = vld [vmem:[#allocation3 + $0xe8] sm:$0xff] }
 0x426   : > { %v8315_v4 = vpop.eup %8314 }
 0x427   : > { %8328 = vrcp.f32 %v1789_v3  ;;  %v1788_v5 = vadd.f32 1.0, %v8315_v4  ;;  %v2037_v3 = vld [vmem:[#allocation3 + $0xd0] sm:$0xff]  ;;  %v2036_v4 = vld [vmem:[#allocation3 + $0xc8] sm:$0xff] }
 0x428   : > { %v8317_v6 = vpop.eup %8316  ;;  %7728 = vmatprep.subr.mxu1 %v2037_v3 }
 0x429   : > { %8330 = vrcp.f32 %v1788_v5  ;;  %v1791_v8 = vadd.f32 1.0, %v8317_v6  ;;  %7729 = vmatpush3.msra.mxu1 %v2037_v3  ;;  %v2035_v5 = vld [vmem:[#allocation3 + $0xc0] sm:$0xff]  ;;  %v2016_v6 = vld [vmem:[#allocation2 + $0x17] sm:$0xff] }
 0x42a   : > { %v8319_v14 = vpop.eup %8318  ;;  %7730 = vmatprep.subr.mxu1 %v2036_v4  ;;  %7734 = vmatprep.mubr.msk.f32.mxu1 %vm571_vm1, %v2016_v6 }
 0x42b   : > { %8332 = vrcp.f32 %v1791_v8  ;;  %v1790_v16 = vadd.f32 1.0, %v8319_v14  ;;  %7731 = vmatpush3.msra.mxu1 %v2036_v4  ;;  %v2328_v8 = vld [vmem:[#allocation3 + $0x118] sm:$0xff]  ;;  %v6858_v14 = vld [vmem:[%s10027_s6 + $0x1] ss:$0 sm:$0xff] }
 0x42c   : > { %v8321_v29 = vpop.eup %8320  ;;  %7732 = vmatprep.subr.mxu1 %v2035_v5 }
 0x42d   : > { %8334 = vrcp.f32 %v1790_v16  ;;  %v1793_v20 = vadd.f32 1.0, %v8321_v29  ;;  %7733 = vmatpush3.msra.mxu1 %v2035_v5  ;;  %v6876_v5 = vld [vmem:[%s10025_s4 + $0x2] ss:$0 sm:$0xff] }
 0x42e   : > { %v8323_v24 = vpop.eup %8322  ;;  %7766 = vmatprep.subr.mxu1 %v2328_v8 }
 0x42f   : > { %8336 = vrcp.f32 %v1793_v20  ;;  %v1792_v25 = vadd.f32 1.0, %v8323_v24 }
 0x430   : > { %v8325_v38 = vpop.eup %8324 }
 0x431   : > { %8338 = vrcp.f32 %v1792_v25  ;;  %1820 = vrot.lane.b32.xlu1 %v8325_v38, %s8717_s26 }
 0x432   : > { %v8327_v31 = vpop.eup %8326  ;;  %8340 = vtanh.f32 %v9086_v35 }
 0x433   : > { %1818 = vrot.lane.b32.xlu0 %v8327_v31, %s8717_s26  ;;  %8342 = vtanh.f32 %v9083_v11 }
 0x434   : > { %v8329_v33 = vpop.eup %8328  ;;  %8344 = vtanh.f32 %v9092_v30 }
 0x435   : > { %1824 = vrot.lane.b32.xlu1 %v8329_v33, %s8717_s26  ;;  %8346 = vtanh.f32 %v9089_v34 }
 0x436   : > { %v8331_v36 = vpop.eup %8330  ;;  %8348 = vtanh.f32 %v9098_v50 }
 0x437   : > { %1822 = vrot.lane.b32.xlu0 %v8331_v36, %s8717_s26  ;;  %8350 = vtanh.f32 %v9095_v39 }
 0x438   : > { %v8333_v37 = vpop.eup %8332  ;;  %8352 = vtanh.f32 %v1752_v59 }
 0x439   : > { %1828 = vrot.lane.b32.xlu1 %v8333_v37, %s8717_s26  ;;  %8354 = vtanh.f32 %v9101_v55 }
 0x43a   : > { %v8335_v40 = vpop.eup %8334 }
 0x43b   : > { %1826 = vrot.lane.b32.xlu0 %v8335_v40, %s8717_s26 }
 0x43c   : > { %v8337_v41 = vpop.eup %8336 }
 0x43d   : > { %1832 = vrot.lane.b32.xlu1 %v8337_v41, %s8717_s26 }
 0x43e   : > { %v8339_v42 = vpop.eup %8338 }
 0x43f   : > { %1830 = vrot.lane.b32.xlu0 %v8339_v42, %s8717_s26  ;;  %v8341_v44 = vpop.eup %8340 }
 0x440   : > { %v8343_v47 = vpop.eup %8342 }
 0x441   : > { %v8345_v11 = vpop.eup %8344 }
 0x442   : > { %v8347_v30 = vpop.eup %8346 }
 0x443   : > { %v8349_v52 = vpop.eup %8348 }
 0x444   : > { %v8351_v54 = vpop.eup %8350 }
 0x445   : > { %v8353_v58 = vpop.eup %8352 }
 0x446   : > { %v8355_v60 = vpop.eup %8354 }
 0x4a3   : > { %v1821_v22 = vpop.permute.xlu1 %1820 }
 0x4a4   : > { %v1843_v49 = vmul.f32 %v8343_v47, %v1821_v22 }
 0x4a5   : > { %v1819_v45 = vpop.permute.xlu0 %1818 }
 0x4a6   : > { %v1842_v48 = vmul.f32 %v8341_v44, %v1819_v45 }
 0x4a7   : > { %v1825_v35 = vpop.permute.xlu1 %1824 }
 0x4a8   : > { %7714 = vmatprep.mubr.msk.f32.mxu0 %vm571_vm1, %v1842_v48  ;;  %v1845_v51 = vmul.f32 %v8347_v30, %v1825_v35  ;;  %v2327_v48 = vld [vmem:[#allocation3 + $0x110] sm:$0xff]  ;;  %v2325_v30 = vld [vmem:[#allocation3 + $0x100] sm:$0xff] }
 0x4a9   : > { %7715 = vmatmul.mubr.msk.f32.vlgmr.msra.gmra.mxu0 %vm571_vm1, %v1843_v49  ;;  %v1823_v34 = vpop.permute.xlu0 %1822 }
 0x4aa   : > { %v1844_v50 = vmul.f32 %v8345_v11, %v1823_v34  ;;  %7747 = vmatpush3.msra.mxu0 %v2186_v63 }
 0x4ab   : > { %v1829_v39 = vpop.permute.xlu1 %1828  ;;  %7748 = vmatprep.subr.mxu0 %v2185_v0 }
 0x4ac   : > { %7717 = vmatprep.mubr.msk.f32.mxu0 %vm571_vm1, %v1844_v50  ;;  %v1847_v56 = vmul.f32 %v8351_v54, %v1829_v39  ;;  %7749 = vmatpush3.msra.mxu0 %v2185_v0 }
 0x4ad   : > { %7718 = vmatmul.mubr.msk.f32.gmra.mxu0 %vm571_vm1, %v1845_v51  ;;  %v1827_v53 = vpop.permute.xlu0 %1826  ;;  %7750 = vmatprep.subr.mxu0 %v2184_v1 }
 0x4ae   : > { %v1846_v55 = vmul.f32 %v8349_v52, %v1827_v53  ;;  %7751 = vmatpush3.msra.mxu0 %v2184_v1 }
 0x4af   : > { %v1833_v57 = vpop.permute.xlu1 %1832  ;;  %7752 = vmatprep.subr.mxu0 %v2183_v2 }
 0x4b0   : > { %7720 = vmatprep.mubr.msk.f32.mxu0 %vm571_vm1, %v1846_v55  ;;  %v1849_v62 = vmul.f32 %v8355_v60, %v1833_v57  ;;  %7753 = vmatpush3.msra.mxu0 %v2183_v2  ;;  %v2565_v60 = vld [vmem:[#allocation5 + $0x50] sm:$0xff] }
 0x4b1   : > { %7721 = vmatmul.mubr.msk.f32.gmra.mxu0 %vm571_vm1, %v1847_v56  ;;  %v1831_v59 = vpop.permute.xlu0 %1830 }
 0x4b2   : > { %v1848_v61 = vmul.f32 %v8353_v58, %v1831_v59  ;;  %v2031_v58 = vld [vmem:[#allocation2 + $0x61] sm:$0xff]  ;;  %v2566_v59 = vld [vmem:[#allocation5 + $0x58] sm:$0xff] }
 0x4b3   : > { %7786 = vmatprep.subr.mxu0 %v2566_v59 }
 0x4b4   : > { %7723 = vmatprep.mubr.msk.f32.mxu0 %vm571_vm1, %v1848_v61  ;;  %v2564_v61 = vld [vmem:[#allocation5 + $0x48] sm:$0xff] }
 0x4b5   : > { %7724 = vmatmul.mubr.msk.f32.gmra.mxu0 %vm571_vm1, %v1849_v62 }
 0x569   : > { %v7716_v16 = vpop.f32.mrf.mxu0 }
 0x56a   : > { %v9131_v29 = vadd.f32 %v7716_v16, %v6858_v14 }
 0x56b   : > { %v1953_v20 = vpop.f32.mrf.mxu0 }
 0x56c   : > { %v9135_v24 = vadd.f32 %v9131_v29, %v8988_v9  ;;  %v9137_v25 = vadd.f32 %v6858_v14, %v1953_v20 }
 0x56d   : > { %v7719_v38 = vpop.f32.mrf.mxu0 }
 0x56e   : > { %2009 = vst.msk [vmem:[#allocation2 + $0x28] sm:$0xff] %vm571_vm1, %v9135_v24  ;;  %v9143_v31 = vadd.f32 %v9137_v25, %v8996_v12  ;;  %v9145_v33 = vadd.f32 %v7719_v38, %v6858_v14 }
 0x56f   : > { %v1963_v46 = vpop.f32.mrf.mxu0 }
 0x570   : > { %2008 = vst.msk [vmem:[#allocation2 + $0x20] sm:$0xff] %vm571_vm1, %v9143_v31  ;;  %v9151_v9 = vadd.f32 %v9145_v33, %v9004_v23  ;;  %v9153_v36 = vadd.f32 %v6858_v14, %v1963_v46  ;;  %7754 = vmatprep.mubr.msk.f32.mxu0 %vm571_vm1, %v9143_v31 }
 0x571   : > { %v7722_v37 = vpop.f32.mrf.mxu0  ;;  %7755 = vmatmul.mubr.msk.f32.vlgmr.msra.gmra.mxu0 %vm571_vm1, %v9135_v24 }
 0x572   : > { %2011 = vst.msk [vmem:[#allocation2 + $0x38] sm:$0xff] %vm571_vm1, %v9151_v9  ;;  %v9163_v12 = vadd.f32 %v9153_v36, %v9016_v26  ;;  %v9165_v40 = vadd.f32 %v7722_v37, %v6858_v14  ;;  %7787 = vmatpush3.msra.mxu0 %v2566_v59 }
 0x573   : > { %v1973_v23 = vpop.f32.mrf.mxu0  ;;  %7788 = vmatprep.subr.mxu0 %v2565_v60 }
 0x574   : > { %2010 = vst.msk [vmem:[#allocation2 + $0x30] sm:$0xff] %vm571_vm1, %v9163_v12  ;;  %v9171_v41 = vadd.f32 %v9165_v40, %v9024_v18  ;;  %v9173_v42 = vadd.f32 %v6858_v14, %v1973_v23  ;;  %7757 = vmatprep.mubr.msk.f32.mxu0 %vm571_vm1, %v9163_v12  ;;  %7789 = vmatpush3.msra.mxu0 %v2565_v60 }
 0x575   : > { %v7725_v22 = vpop.f32.mrf.mxu0  ;;  %7758 = vmatmul.mubr.msk.f32.gmra.mxu0 %vm571_vm1, %v9151_v9  ;;  %7790 = vmatprep.subr.mxu0 %v2564_v61 }
 0x576   : > { %2013 = vst.msk [vmem:[#allocation2 + $0x48] sm:$0xff] %vm571_vm1, %v9171_v41  ;;  %v9183_v26 = vadd.f32 %v9173_v42, %v9036_v32  ;;  %v9185_v44 = vadd.f32 %v7725_v22, %v6858_v14  ;;  %7791 = vmatpush3.msra.mxu0 %v2564_v61 }
 0x577   : > { %v1983_v18 = vpop.f32.mrf.mxu0  ;;  %v2017_v45 = vld [vmem:[#allocation2 + $0x1f] sm:$0xff]  ;;  %v2018_v47 = vld [vmem:[#allocation2 + $0x27] sm:$0xff] }
 0x578   : > { %2012 = vst.msk [vmem:[#allocation2 + $0x40] sm:$0xff] %vm571_vm1, %v9183_v26  ;;  %v9191_v49 = vadd.f32 %v9185_v44, %v9044_v27  ;;  %v9193_v35 = vadd.f32 %v6858_v14, %v1983_v18  ;;  %7735 = vmatmul.mubr.msk.f32.vlgmr.msra.gmra.mxu1 %vm571_vm1, %v2017_v45  ;;  %7760 = vmatprep.mubr.msk.f32.mxu0 %vm571_vm1, %v9183_v26  ;;  %v2326_v27 = vld [vmem:[#allocation3 + $0x108] sm:$0xff] }
 0x579   : > { %7767 = vmatpush3.msra.mxu1 %v2328_v8  ;;  %7737 = vmatprep.mubr.msk.f32.mxu1 %vm571_vm1, %v2018_v47 }
 0x57a   : > { %2015 = vst.msk [vmem:[#allocation2 + $0x58] sm:$0xff] %vm571_vm1, %v9191_v49  ;;  %v9203_v32 = vadd.f32 %v9193_v35, %v9058_v43  ;;  %7761 = vmatmul.mubr.msk.f32.gmra.mxu0 %vm571_vm1, %v9171_v41  ;;  %7768 = vmatprep.subr.mxu1 %v2327_v48 }
 0x57b   : > { %v2019_v11 = vld [vmem:[#allocation2 + $0x2f] sm:$0xff]  ;;  %7769 = vmatpush3.msra.mxu1 %v2327_v48  ;;  %v2020_v34 = vld [vmem:[#allocation2 + $0x37] sm:$0xff] }
 0x57c   : > { %2014 = vst.msk [vmem:[#allocation2 + $0x50] sm:$0xff] %vm571_vm1, %v9203_v32  ;;  %7738 = vmatmul.mubr.msk.f32.gmra.mxu1 %vm571_vm1, %v2019_v11  ;;  %7763 = vmatprep.mubr.msk.f32.mxu0 %vm571_vm1, %v9203_v32  ;;  %v2024_v39 = vld [vmem:[#allocation2 + $0x29] sm:$0xff]  ;;  %v2025_v52 = vld [vmem:[#allocation2 + $0x31] sm:$0xff] }
 0x57d   : > { %7740 = vmatprep.mubr.msk.f32.mxu1 %vm571_vm1, %v2020_v34  ;;  %7770 = vmatprep.subr.mxu1 %v2326_v27 }
 0x57e   : > { %7764 = vmatmul.mubr.msk.f32.gmra.mxu0 %vm571_vm1, %v9191_v49  ;;  %7771 = vmatpush3.msra.mxu1 %v2326_v27 }
 0x57f   : > { %v2021_v43 = vld [vmem:[#allocation2 + $0x3f] sm:$0xff]  ;;  %v2022_v50 = vld [vmem:[#allocation2 + $0x47] sm:$0xff]  ;;  %7772 = vmatprep.subr.mxu1 %v2325_v30 }
 0x580   : > { %7741 = vmatmul.mubr.msk.f32.gmra.mxu1 %vm571_vm1, %v2021_v43  ;;  %v2026_v53 = vld [vmem:[#allocation2 + $0x39] sm:$0xff]  ;;  %v2027_v54 = vld [vmem:[#allocation2 + $0x41] sm:$0xff] }
 0x581   : > { %7743 = vmatprep.mubr.msk.f32.mxu1 %vm571_vm1, %v2022_v50  ;;  %7773 = vmatpush3.msra.mxu1 %v2325_v30  ;;  %v2030_v57 = vld [vmem:[#allocation2 + $0x59] sm:$0xff] }
 0x583   : > { %v2023_v51 = vld [vmem:[#allocation2 + $0x4f] sm:$0xff] }
 0x584   : > { %7744 = vmatmul.mubr.msk.f32.gmra.mxu1 %vm571_vm1, %v2023_v51  ;;  %v2028_v55 = vld [vmem:[#allocation2 + $0x49] sm:$0xff]  ;;  %v2029_v56 = vld [vmem:[#allocation2 + $0x51] sm:$0xff] }
 0x585   : > { %7774 = vmatprep.mubr.msk.f32.mxu1 %vm571_vm1, %v2024_v39 }
 0x588   : > { %7775 = vmatmul.mubr.msk.f32.vlgmr.msra.gmra.mxu1 %vm571_vm1, %v2025_v52 }
 0x589   : > { %7777 = vmatprep.mubr.msk.f32.mxu1 %vm571_vm1, %v2026_v53 }
 0x58c   : > { %7778 = vmatmul.mubr.msk.f32.gmra.mxu1 %vm571_vm1, %v2027_v54 }
 0x58d   : > { %7780 = vmatprep.mubr.msk.f32.mxu1 %vm571_vm1, %v2028_v55 }
 0x590   : > { %7781 = vmatmul.mubr.msk.f32.gmra.mxu1 %vm571_vm1, %v2029_v56 }
 0x591   : > { %7783 = vmatprep.mubr.msk.f32.mxu1 %vm571_vm1, %v2030_v57 }
 0x594   : > { %7784 = vmatmul.mubr.msk.f32.gmra.mxu1 %vm571_vm1, %v2031_v58 }
 0x631   : > { %v7756_v62 = vpop.f32.mrf.mxu0 }
 0x633   : > { %v2277_v1 = vpop.f32.mrf.mxu0 }
 0x635   : > { %v7759_v4 = vpop.f32.mrf.mxu0 }
 0x637   : > { %v2287_v16 = vpop.f32.mrf.mxu0 }
 0x638   : > { %v7736_v63 = vpop.f32.mrf.mxu1 }
 0x639   : > { %v2175_v14 = vadd.f32 %v7736_v63, %v6876_v5 }
 0x63a   : > { %v2129_v0 = vpop.f32.mrf.mxu1  ;;  %v7762_v22 = vpop.f32.mrf.mxu0 }
 0x63b   : > { %v2174_v38 = vadd.f32 %v6876_v5, %v2129_v0  ;;  %v2317_v23 = vadd.f32 %v7756_v62, %v2175_v14 }
 0x63c   : > { %v7739_v2 = vpop.f32.mrf.mxu1  ;;  %v2297_v50 = vpop.f32.mrf.mxu0 }
 0x63d   : > { %v2177_v37 = vadd.f32 %v7739_v2, %v6876_v5  ;;  %v2316_v48 = vadd.f32 %v2277_v1, %v2174_v38 }
 0x63e   : > { %v2139_v3 = vpop.f32.mrf.mxu1  ;;  %v7765_v60 = vpop.f32.mrf.mxu0 }
 0x63f   : > { %v2176_v45 = vadd.f32 %v6876_v5, %v2139_v3  ;;  %v2319_v43 = vadd.f32 %v7759_v4, %v2177_v37 }
 0x640   : > { %v7742_v6 = vpop.f32.mrf.mxu1 }
 0x641   : > { %v2179_v27 = vadd.f32 %v7742_v6, %v6876_v5  ;;  %v2318_v54 = vadd.f32 %v2287_v16, %v2176_v45 }
 0x642   : > { %v2149_v8 = vpop.f32.mrf.mxu1 }
 0x643   : > { %v2178_v51 = vadd.f32 %v6876_v5, %v2149_v8  ;;  %v2321_v56 = vadd.f32 %v7762_v22, %v2179_v27  ;;  %v2307_v8 = vpop.f32.mrf.mxu0 }
 0x644   : > { %v7745_v20 = vpop.f32.mrf.mxu1 }
 0x645   : > { %v2181_v57 = vadd.f32 %v7745_v20, %v6876_v5  ;;  %v2320_v62 = vadd.f32 %v2297_v50, %v2178_v51 }
 0x646   : > { %v2159_v46 = vpop.f32.mrf.mxu1 }
 0x647   : > { %v2180_v63 = vadd.f32 %v6876_v5, %v2159_v46  ;;  %v2323_v6 = vadd.f32 %v7765_v60, %v2181_v57 }
 0x648   : > { %v7776_v18 = vpop.f32.mrf.mxu1 }
 0x649   : > { %v9229_v47 = vadd.f32 %v7776_v18, %v2317_v23  ;;  %v2322_v5 = vadd.f32 %v2307_v8, %v2180_v63  ;;  %v2750_v63 = vld [vmem:[#allocation3 + $0x138] sm:$0xff] }
 0x64a   : > { %v2419_v11 = vpop.f32.mrf.mxu1  ;;  %7806 = vmatprep.subr.mxu1 %v2750_v63 }
 0x64b   : > { %v6894_v34 = vmul.f32 -1.442695, %v9229_v47  ;;  %v9232_v30 = vadd.f32 %v2419_v11, %v2316_v48  ;;  %v2563_v11 = vld [vmem:[#allocation5 + $0x40] sm:$0xff]  ;;  %7807 = vmatpush3.msra.mxu1 %v2750_v63  ;;  %v3040_v63 = vld [vmem:[#allocation3 + $0x178] sm:$0xff] }
 0x64c   : > { %v7779_v39 = vpop.f32.mrf.mxu1  ;;  %7792 = vmatprep.subr.mxu0 %v2563_v11 }
 0x64d   : > { %8356 = vpow2.f32 %v6894_v34  ;;  %v6893_v52 = vmul.f32 -1.442695, %v9232_v30  ;;  %v9235_v53 = vadd.f32 %v7779_v39, %v2319_v43  ;;  %7793 = vmatpush3.msra.mxu0 %v2563_v11 }
 0x64e   : > { %v2429_v55 = vpop.f32.mrf.mxu1 }
 0x64f   : > { %8358 = vpow2.f32 %v6893_v52  ;;  %v6896_v58 = vmul.f32 -1.442695, %v9235_v53  ;;  %v9238_v59 = vadd.f32 %v2429_v55, %v2318_v54 }
 0x650   : > { %v7782_v61 = vpop.f32.mrf.mxu1 }
 0x651   : > { %8360 = vpow2.f32 %v6896_v58  ;;  %v6895_v0 = vmul.f32 -1.442695, %v9238_v59  ;;  %v9241_v1 = vadd.f32 %v7782_v61, %v2321_v56 }
 0x652   : > { %v2439_v2 = vpop.f32.mrf.mxu1 }
 0x653   : > { %8362 = vpow2.f32 %v6895_v0  ;;  %v6898_v3 = vmul.f32 -1.442695, %v9241_v1  ;;  %v9244_v4 = vadd.f32 %v2439_v2, %v2320_v62  ;;  %v2749_v0 = vld [vmem:[#allocation3 + $0x130] sm:$0xff] }
 0x654   : > { %v7785_v14 = vpop.f32.mrf.mxu1  ;;  %7808 = vmatprep.subr.mxu1 %v2749_v0 }
 0x655   : > { %8364 = vpow2.f32 %v6898_v3  ;;  %v6897_v16 = vmul.f32 -1.442695, %v9244_v4  ;;  %v9247_v20 = vadd.f32 %v7785_v14, %v2323_v6  ;;  %7809 = vmatpush3.msra.mxu1 %v2749_v0  ;;  %v3039_v0 = vld [vmem:[#allocation3 + $0x170] sm:$0xff] }
 0x656   : > { %v2449_v38 = vpop.f32.mrf.mxu1 }
 0x657   : > { %8366 = vpow2.f32 %v6897_v16  ;;  %v6900_v46 = vmul.f32 -1.442695, %v9247_v20  ;;  %v2464_v37 = vadd.f32 %v2449_v38, %v2322_v5 }
 0x659   : > { %8368 = vpow2.f32 %v6900_v46  ;;  %v6899_v23 = vmul.f32 -1.442695, %v2464_v37 }
 0x65a   : > { %v8357_v22 = vpop.eup %8356 }
 0x65b   : > { %v2499_v18 = vadd.f32 1.0, %v8357_v22  ;;  %8370 = vpow2.f32 %v6899_v23 }
 0x65c   : > { %v8359_v45 = vpop.eup %8358 }
 0x65d   : > { %8372 = vrcp.f32 %v2499_v18  ;;  %v2498_v48 = vadd.f32 1.0, %v8359_v45 }
 0x65e   : > { %v8361_v27 = vpop.eup %8360 }
 0x65f   : > { %8374 = vrcp.f32 %v2498_v48  ;;  %v2501_v34 = vadd.f32 1.0, %v8361_v27 }
 0x660   : > { %v8363_v43 = vpop.eup %8362 }
 0x661   : > { %8376 = vrcp.f32 %v2501_v34  ;;  %v2500_v50 = vadd.f32 1.0, %v8363_v43 }
 0x662   : > { %v8365_v51 = vpop.eup %8364 }
 0x663   : > { %8378 = vrcp.f32 %v2500_v50  ;;  %v2503_v39 = vadd.f32 1.0, %v8365_v51 }
 0x664   : > { %v8367_v52 = vpop.eup %8366 }
 0x665   : > { %8380 = vrcp.f32 %v2503_v39  ;;  %v2502_v54 = vadd.f32 1.0, %v8367_v52  ;;  %v2898_v52 = vld [vmem:[#allocation3 + $0x158] sm:$0xff] }
 0x666   : > { %v8369_v55 = vpop.eup %8368  ;;  %7826 = vmatprep.subr.mxu0 %v2898_v52 }
 0x667   : > { %8382 = vrcp.f32 %v2502_v54  ;;  %v2505_v56 = vadd.f32 1.0, %v8369_v55  ;;  %v2748_v54 = vld [vmem:[#allocation3 + $0x128] sm:$0xff]  ;;  %v2897_v55 = vld [vmem:[#allocation3 + $0x150] sm:$0xff] }
 0x668   : > { %v8371_v57 = vpop.eup %8370  ;;  %7810 = vmatprep.subr.mxu1 %v2748_v54 }
 0x669   : > { %8384 = vrcp.f32 %v2505_v56  ;;  %v2504_v58 = vadd.f32 1.0, %v8371_v57  ;;  %7811 = vmatpush3.msra.mxu1 %v2748_v54  ;;  %v2747_v56 = vld [vmem:[#allocation3 + $0x120] sm:$0xff]  ;;  %v2896_v57 = vld [vmem:[#allocation3 + $0x148] sm:$0xff] }
 0x66a   : > { %v8373_v60 = vpop.eup %8372  ;;  %7812 = vmatprep.subr.mxu1 %v2747_v56  ;;  %v2742_v54 = vld [vmem:[#allocation2 + $0x6b] sm:$0xff] }
 0x66b   : > { %8386 = vrcp.f32 %v2504_v58  ;;  %2532 = vrot.lane.b32.xlu1 %v8373_v60, %s8717_s26  ;;  %v2728_v58 = vld [vmem:[#allocation2 + $0x5] sm:$0xff]  ;;  %7813 = vmatpush3.msra.mxu1 %v2747_v56  ;;  %v2729_v60 = vld [vmem:[#allocation2 + $0xd] sm:$0xff]  ;;  %v3277_v56 = vld [vmem:[%s10028_s7 + $0x18] sm:$0xff] }
 0x66c   : > { %v8375_v61 = vpop.eup %8374  ;;  %8388 = vtanh.f32 %v9232_v30  ;;  %7814 = vmatprep.mubr.msk.f32.mxu1 %vm571_vm1, %v2728_v58  ;;  %7846 = vmatprep.subr.mxu1 %v3040_v63  ;;  %v3275_v58 = vld [vmem:[%s10028_s7 + $0x8] sm:$0xff] }
 0x66d   : > { %2530 = vrot.lane.b32.xlu0 %v8375_v61, %s8717_s26  ;;  %8390 = vtanh.f32 %v9229_v47  ;;  %v2895_v61 = vld [vmem:[#allocation3 + $0x140] sm:$0xff]  ;;  %7815 = vmatmul.mubr.msk.f32.vlgmr.msra.gmra.mxu1 %vm571_vm1, %v2729_v60 }
 0x66e   : > { %v8377_v62 = vpop.eup %8376  ;;  %8392 = vtanh.f32 %v9238_v59  ;;  %7847 = vmatpush3.msra.mxu1 %v3040_v63 }
 0x66f   : > { %2536 = vrot.lane.b32.xlu1 %v8377_v62, %s8717_s26  ;;  %8394 = vtanh.f32 %v9235_v53  ;;  %v2730_v62 = vld [vmem:[#allocation2 + $0x15] sm:$0xff]  ;;  %7848 = vmatprep.subr.mxu1 %v3039_v0 }
 0x670   : > { %v8379_v2 = vpop.eup %8378  ;;  %8396 = vtanh.f32 %v9244_v4  ;;  %7817 = vmatprep.mubr.msk.f32.mxu1 %vm571_vm1, %v2730_v62  ;;  %7849 = vmatpush3.msra.mxu1 %v3039_v0 }
 0x671   : > { %2534 = vrot.lane.b32.xlu0 %v8379_v2, %s8717_s26  ;;  %8398 = vtanh.f32 %v9241_v1  ;;  %v3038_v2 = vld [vmem:[#allocation3 + $0x168] sm:$0xff] }
 0x672   : > { %v8381_v3 = vpop.eup %8380  ;;  %8400 = vtanh.f32 %v2464_v37  ;;  %7850 = vmatprep.subr.mxu1 %v3038_v2 }
 0x673   : > { %2540 = vrot.lane.b32.xlu1 %v8381_v3, %s8717_s26  ;;  %8402 = vtanh.f32 %v9247_v20  ;;  %v3037_v3 = vld [vmem:[#allocation3 + $0x160] sm:$0xff]  ;;  %7851 = vmatpush3.msra.mxu1 %v3038_v2 }
 0x674   : > { %v8383_v6 = vpop.eup %8382  ;;  %7852 = vmatprep.subr.mxu1 %v3037_v3 }
 0x675   : > { %2538 = vrot.lane.b32.xlu0 %v8383_v6, %s8717_s26  ;;  %7853 = vmatpush3.msra.mxu1 %v3037_v3  ;;  %v6902_v6 = vld [vmem:[%s10027_s6 + $0x2] ss:$0 sm:$0xff]  ;;  %v6920_v3 = vld [vmem:[%s10025_s4 + $0x3] ss:$0 sm:$0xff] }
 0x676   : > { %v8385_v8 = vpop.eup %8384 }
 0x677   : > { %2544 = vrot.lane.b32.xlu1 %v8385_v8, %s8717_s26 }
 0x678   : > { %v8387_v14 = vpop.eup %8386 }
 0x679   : > { %2542 = vrot.lane.b32.xlu0 %v8387_v14, %s8717_s26  ;;  %v8389_v5 = vpop.eup %8388  ;;  %v2001_v14 = vadd.f32 %v9131_v29, %v8984_v7 }
 0x67a   : > { %v8391_v46 = vpop.eup %8390 }
 0x67b   : > { %v8393_v47 = vpop.eup %8392 }
 0x67c   : > { %v8395_v59 = vpop.eup %8394 }
 0x67d   : > { %v8397_v37 = vpop.eup %8396 }
 0x67e   : > { %v8399_v45 = vpop.eup %8398 }
 0x67f   : > { %v8401_v34 = vpop.eup %8400 }
 0x680   : > { %v8403_v50 = vpop.eup %8402 }
 0x6dd   : > { %v2533_v16 = vpop.permute.xlu1 %2532 }
 0x6de   : > { %v2555_v22 = vmul.f32 %v8391_v46, %v2533_v16 }
 0x6df   : > { %v2531_v38 = vpop.permute.xlu0 %2530 }
 0x6e0   : > { %v2554_v23 = vmul.f32 %v8389_v5, %v2531_v38  ;;  %v2000_v38 = vadd.f32 %v9137_v25, %v8990_v10  ;;  %v2002_v10 = vadd.f32 %v9153_v36, %v9006_v15 }
 0x6e1   : > { %v2537_v30 = vpop.permute.xlu1 %2536 }
 0x6e2   : > { %7794 = vmatprep.mubr.msk.f32.mxu0 %vm571_vm1, %v2554_v23  ;;  %v2557_v18 = vmul.f32 %v8395_v59, %v2537_v30 }
 0x6e3   : > { %7795 = vmatmul.mubr.msk.f32.vlgmr.msra.gmra.mxu0 %vm571_vm1, %v2555_v22  ;;  %v2535_v53 = vpop.permute.xlu0 %2534 }
 0x6e4   : > { %v2556_v4 = vmul.f32 %v8393_v47, %v2535_v53  ;;  %7827 = vmatpush3.msra.mxu0 %v2898_v52  ;;  %v2003_v47 = vadd.f32 %v9145_v33, %v8998_v13  ;;  %v2741_v52 = vld [vmem:[#allocation2 + $0x63] sm:$0xff] }
 0x6e5   : > { %v2541_v1 = vpop.permute.xlu1 %2540  ;;  %7828 = vmatprep.subr.mxu0 %v2897_v55 }
 0x6e6   : > { %7797 = vmatprep.mubr.msk.f32.mxu0 %vm571_vm1, %v2556_v4  ;;  %v2559_v27 = vmul.f32 %v8399_v45, %v2541_v1  ;;  %7829 = vmatpush3.msra.mxu0 %v2897_v55  ;;  %v2743_v55 = vld [vmem:[#allocation2 + $0x73] sm:$0xff] }
 0x6e7   : > { %7798 = vmatmul.mubr.msk.f32.gmra.mxu0 %vm571_vm1, %v2557_v18  ;;  %v2539_v20 = vpop.permute.xlu0 %2538  ;;  %7830 = vmatprep.subr.mxu0 %v2896_v57 }
 0x6e8   : > { %v2558_v48 = vmul.f32 %v8397_v37, %v2539_v20  ;;  %7831 = vmatpush3.msra.mxu0 %v2896_v57  ;;  %v3276_v57 = vld [vmem:[%s10028_s7 + $0x10] sm:$0xff] }
 0x6e9   : > { %v2545_v11 = vpop.permute.xlu1 %2544  ;;  %7832 = vmatprep.subr.mxu0 %v2895_v61 }
 0x6ea   : > { %7800 = vmatprep.mubr.msk.f32.mxu0 %vm571_vm1, %v2558_v48  ;;  %v2561_v39 = vmul.f32 %v8403_v50, %v2545_v11  ;;  %7833 = vmatpush3.msra.mxu0 %v2895_v61 }
 0x6eb   : > { %7801 = vmatmul.mubr.msk.f32.gmra.mxu0 %vm571_vm1, %v2559_v27  ;;  %v2543_v43 = vpop.permute.xlu0 %2542  ;;  %7866 = vmatprep.subr.mxu0 %v3277_v56 }
 0x6ec   : > { %v2560_v51 = vmul.f32 %v8401_v34, %v2543_v43 }
 0x6ee   : > { %7803 = vmatprep.mubr.msk.f32.mxu0 %vm571_vm1, %v2560_v51 }
 0x6ef   : > { %7804 = vmatmul.mubr.msk.f32.gmra.mxu0 %vm571_vm1, %v2561_v39 }
 0x72d   : > { %v7816_v60 = vpop.f32.mrf.mxu1 }
 0x72f   : > { %v2841_v62 = vpop.f32.mrf.mxu1 }
 0x7a3   : > { %v7796_v8 = vpop.f32.mrf.mxu0 }
 0x7a4   : > { %v2671_v16 = vadd.f32 %v7796_v8, %v6902_v6 }
 0x7a5   : > { %v2665_v5 = vpop.f32.mrf.mxu0 }
 0x7a6   : > { %v2705_v46 = vadd.f32 %v2671_v16, %v9135_v24  ;;  %v9284_v23 = vadd.f32 %v2671_v16, %v2001_v14  ;;  %v2666_v22 = vadd.f32 %v6902_v6, %v2665_v5  ;;  %v2887_v16 = vadd.f32 %v7816_v60, %v6920_v3 }
 0x7a7   : > { %v7799_v30 = vpop.f32.mrf.mxu0 }
 0x7a8   : > { %2721 = vst.msk [vmem:[#allocation2 + $0x28] sm:$0xff] %vm571_vm1, %v2705_v46  ;;  %v2704_v53 = vadd.f32 %v2666_v22, %v9143_v31  ;;  %v9290_v59 = vadd.f32 %v2666_v22, %v2000_v38  ;;  %v2681_v7 = vadd.f32 %v7799_v30, %v6902_v6  ;;  %v2005_v31 = vadd.f32 %v9165_v40, %v9018_v17 }
 0x7a9   : > { %v2675_v29 = vpop.f32.mrf.mxu0 }
 0x7aa   : > { %2720 = vst.msk [vmem:[#allocation2 + $0x20] sm:$0xff] %vm571_vm1, %v2704_v53  ;;  %v2707_v24 = vadd.f32 %v2681_v7, %v9151_v9  ;;  %v9296_v25 = vadd.f32 %v2681_v7, %v2003_v47  ;;  %v2676_v4 = vadd.f32 %v6902_v6, %v2675_v29  ;;  %7834 = vmatprep.mubr.msk.f32.mxu0 %vm571_vm1, %v2704_v53 }
 0x7ab   : > { %v7802_v13 = vpop.f32.mrf.mxu0  ;;  %7835 = vmatmul.mubr.msk.f32.vlgmr.msra.gmra.mxu0 %vm571_vm1, %v2705_v46  ;;  %v2004_v9 = vadd.f32 %v9173_v42, %v9026_v19  ;;  %v2886_v46 = vadd.f32 %v6920_v3, %v2841_v62 }
 0x7ac   : > { %2723 = vst.msk [vmem:[#allocation2 + $0x38] sm:$0xff] %vm571_vm1, %v2707_v24  ;;  %v2706_v33 = vadd.f32 %v2676_v4, %v9163_v12  ;;  %v9304_v15 = vadd.f32 %v2676_v4, %v2002_v10  ;;  %v2691_v36 = vadd.f32 %v7802_v13, %v6902_v6  ;;  %v2007_v12 = vadd.f32 %v9185_v44, %v9038_v21 }
 0x7ad   : > { %v2685_v18 = vpop.f32.mrf.mxu0  ;;  %7867 = vmatpush3.msra.mxu0 %v3277_v56 }
 0x7ae   : > { %2722 = vst.msk [vmem:[#allocation2 + $0x30] sm:$0xff] %vm571_vm1, %v2706_v33  ;;  %v2709_v1 = vadd.f32 %v2691_v36, %v9171_v41  ;;  %v9310_v37 = vadd.f32 %v2691_v36, %v2005_v31  ;;  %v2686_v20 = vadd.f32 %v6902_v6, %v2685_v18  ;;  %7837 = vmatprep.mubr.msk.f32.mxu0 %vm571_vm1, %v2706_v33 }
 0x7af   : > { %v7805_v17 = vpop.f32.mrf.mxu0  ;;  %7838 = vmatmul.mubr.msk.f32.gmra.mxu0 %vm571_vm1, %v2707_v24  ;;  %v2006_v41 = vadd.f32 %v9193_v35, %v9046_v28  ;;  %7868 = vmatprep.subr.mxu0 %v3276_v57 }
 0x7b0   : > { %2725 = vst.msk [vmem:[#allocation2 + $0x48] sm:$0xff] %vm571_vm1, %v2709_v1  ;;  %v2708_v40 = vadd.f32 %v2686_v20, %v9183_v26  ;;  %v9318_v19 = vadd.f32 %v2686_v20, %v2004_v9  ;;  %v2701_v42 = vadd.f32 %v7805_v17, %v6902_v6  ;;  %7869 = vmatpush3.msra.mxu0 %v3276_v57 }
 0x7b1   : > { %v2695_v45 = vpop.f32.mrf.mxu0  ;;  %v2731_v48 = vld [vmem:[#allocation2 + $0x1d] sm:$0xff]  ;;  %v2732_v27 = vld [vmem:[#allocation2 + $0x25] sm:$0xff]  ;;  %7870 = vmatprep.subr.mxu0 %v3275_v58 }
 0x7b2   : > { %2724 = vst.msk [vmem:[#allocation2 + $0x40] sm:$0xff] %vm571_vm1, %v2708_v40  ;;  %v2711_v11 = vadd.f32 %v2701_v42, %v9191_v49  ;;  %v9324_v34 = vadd.f32 %v2701_v42, %v2007_v12  ;;  %v2696_v21 = vadd.f32 %v6902_v6, %v2695_v45  ;;  %7818 = vmatmul.mubr.msk.f32.gmra.mxu1 %vm571_vm1, %v2731_v48 }
 0x7b3   : > { %7840 = vmatprep.mubr.msk.f32.mxu0 %vm571_vm1, %v2708_v40  ;;  %7820 = vmatprep.mubr.msk.f32.mxu1 %vm571_vm1, %v2732_v27 }
 0x7b4   : > { %7841 = vmatmul.mubr.msk.f32.gmra.mxu0 %vm571_vm1, %v2709_v1  ;;  %2727 = vst.msk [vmem:[#allocation2 + $0x58] sm:$0xff] %vm571_vm1, %v2711_v11  ;;  %v2710_v28 = vadd.f32 %v2696_v21, %v9203_v32  ;;  %v9332_v26 = vadd.f32 %v2696_v21, %v2006_v41 }
 0x7b5   : > { %v2733_v44 = vld [vmem:[#allocation2 + $0x2d] sm:$0xff]  ;;  %v2734_v35 = vld [vmem:[#allocation2 + $0x35] sm:$0xff]  ;;  %7871 = vmatpush3.msra.mxu0 %v3275_v58 }
 0x7b6   : > { %2726 = vst.msk [vmem:[#allocation2 + $0x50] sm:$0xff] %vm571_vm1, %v2710_v28  ;;  %7821 = vmatmul.mubr.msk.f32.gmra.mxu1 %vm571_vm1, %v2733_v44  ;;  %7843 = vmatprep.mubr.msk.f32.mxu0 %vm571_vm1, %v2710_v28 }
 0x7b7   : > { %7823 = vmatprep.mubr.msk.f32.mxu1 %vm571_vm1, %v2734_v35 }
 0x7b8   : > { %7844 = vmatmul.mubr.msk.f32.gmra.mxu0 %vm571_vm1, %v2711_v11 }
 0x7b9   : > { %v2735_v49 = vld [vmem:[#allocation2 + $0x3d] sm:$0xff] }
 0x7ba   : > { %v2736_v43 = vld [vmem:[#allocation2 + $0x3b] sm:$0xff]  ;;  %7824 = vmatmul.mubr.msk.f32.gmra.mxu1 %vm571_vm1, %v2735_v49  ;;  %v2737_v32 = vld [vmem:[#allocation2 + $0x43] sm:$0xff] }
 0x7bb   : > { %7854 = vmatprep.mubr.msk.f32.mxu1 %vm571_vm1, %v2736_v43  ;;  %v2740_v39 = vld [vmem:[#allocation2 + $0x5b] sm:$0xff] }
 0x7bd   : > { %v2738_v50 = vld [vmem:[#allocation2 + $0x4b] sm:$0xff]  ;;  %v2739_v51 = vld [vmem:[#allocation2 + $0x53] sm:$0xff] }
 0x7be   : > { %7855 = vmatmul.mubr.msk.f32.vlgmr.msra.gmra.mxu1 %vm571_vm1, %v2737_v32 }
 0x7bf   : > { %7857 = vmatprep.mubr.msk.f32.mxu1 %vm571_vm1, %v2738_v50 }
 0x7c2   : > { %7858 = vmatmul.mubr.msk.f32.gmra.mxu1 %vm571_vm1, %v2739_v51 }
 0x7c3   : > { %7860 = vmatprep.mubr.msk.f32.mxu1 %vm571_vm1, %v2740_v39 }
 0x7c6   : > { %7861 = vmatmul.mubr.msk.f32.gmra.mxu1 %vm571_vm1, %v2741_v52 }
 0x7c7   : > { %7863 = vmatprep.mubr.msk.f32.mxu1 %vm571_vm1, %v2742_v54 }
 0x7ca   : > { %7864 = vmatmul.mubr.msk.f32.gmra.mxu1 %vm571_vm1, %v2743_v55 }
 0x86b   : > { %v7836_v61 = vpop.f32.mrf.mxu0 }
 0x86c   : > { %v3029_v30 = vadd.f32 %v7836_v61, %v2887_v16 }
 0x86d   : > { %v2989_v63 = vpop.f32.mrf.mxu0 }
 0x86e   : > { %v3028_v29 = vadd.f32 %v2989_v63, %v2886_v46 }
 0x86f   : > { %v7839_v6 = vpop.f32.mrf.mxu0 }
 0x871   : > { %v2999_v5 = vpop.f32.mrf.mxu0 }
 0x872   : > { %v7819_v0 = vpop.f32.mrf.mxu1 }
 0x873   : > { %v2889_v47 = vadd.f32 %v7819_v0, %v6920_v3 }
 0x874   : > { %v2851_v2 = vpop.f32.mrf.mxu1  ;;  %v7842_v53 = vpop.f32.mrf.mxu0 }
 0x875   : > { %v2888_v10 = vadd.f32 %v6920_v3, %v2851_v2  ;;  %v3031_v36 = vadd.f32 %v7839_v6, %v2889_v47 }
 0x876   : > { %v7822_v8 = vpop.f32.mrf.mxu1  ;;  %v3009_v18 = vpop.f32.mrf.mxu0 }
 0x877   : > { %v2891_v4 = vadd.f32 %v7822_v8, %v6920_v3  ;;  %v3030_v12 = vadd.f32 %v2999_v5, %v2888_v10 }
 0x878   : > { %v2861_v14 = vpop.f32.mrf.mxu1  ;;  %v7845_v27 = vpop.f32.mrf.mxu0 }
 0x879   : > { %v2890_v9 = vadd.f32 %v6920_v3, %v2861_v14  ;;  %v3033_v42 = vadd.f32 %v7842_v53, %v2891_v4 }
 0x87a   : > { %v7825_v38 = vpop.f32.mrf.mxu1  ;;  %v3019_v51 = vpop.f32.mrf.mxu0 }
 0x87b   : > { %v2893_v41 = vadd.f32 %v7825_v38, %v6920_v3  ;;  %v3032_v21 = vadd.f32 %v3009_v18, %v2890_v9 }
 0x87c   : > { %v2871_v22 = vpop.f32.mrf.mxu1 }
 0x87d   : > { %v2892_v28 = vadd.f32 %v6920_v3, %v2871_v22  ;;  %v3035_v50 = vadd.f32 %v7845_v27, %v2893_v41  ;;  %v3274_v3 = vld [vmem:[%s10028_s7] sm:$0xff] }
 0x87e   : > { %v7856_v7 = vpop.f32.mrf.mxu1  ;;  %7872 = vmatprep.subr.mxu0 %v3274_v3 }
 0x87f   : > { %v9360_v24 = vadd.f32 %v7856_v7, %v3029_v30  ;;  %v3034_v55 = vadd.f32 %v3019_v51, %v2892_v28  ;;  %7873 = vmatpush3.msra.mxu0 %v3274_v3  ;;  %v3515_v3 = vld [vmem:[#allocation3 + $0x190] sm:$0xff] }
 0x880   : > { %v3131_v13 = vpop.f32.mrf.mxu1 }
 0x881   : > { %v6938_v31 = vmul.f32 -1.442695, %v9360_v24  ;;  %v9363_v33 = vadd.f32 %v3131_v13, %v3028_v29 }
 0x882   : > { %v7859_v1 = vpop.f32.mrf.mxu1 }
 0x883   : > { %8404 = vpow2.f32 %v6938_v31  ;;  %v6937_v20 = vmul.f32 -1.442695, %v9363_v33  ;;  %v9366_v17 = vadd.f32 %v7859_v1, %v3031_v36 }
 0x884   : > { %v3141_v40 = vpop.f32.mrf.mxu1 }
 0x885   : > { %8406 = vpow2.f32 %v6937_v20  ;;  %v6940_v45 = vmul.f32 -1.442695, %v9366_v17  ;;  %v9369_v48 = vadd.f32 %v3141_v40, %v3030_v12 }
 0x886   : > { %v7862_v11 = vpop.f32.mrf.mxu1 }
 0x887   : > { %8408 = vpow2.f32 %v6940_v45  ;;  %v6939_v44 = vmul.f32 -1.442695, %v9369_v48  ;;  %v9372_v35 = vadd.f32 %v7862_v11, %v3033_v42 }
 0x888   : > { %v3151_v49 = vpop.f32.mrf.mxu1 }
 0x889   : > { %8410 = vpow2.f32 %v6939_v44  ;;  %v6942_v43 = vmul.f32 -1.442695, %v9372_v35  ;;  %v3174_v32 = vadd.f32 %v3151_v49, %v3032_v21 }
 0x88a   : > { %v7865_v39 = vpop.f32.mrf.mxu1 }
 0x88b   : > { %8412 = vpow2.f32 %v6942_v43  ;;  %v6941_v52 = vmul.f32 -1.442695, %v3174_v32  ;;  %v3177_v54 = vadd.f32 %v7865_v39, %v3035_v50 }
 0x88c   : > { %v3161_v56 = vpop.f32.mrf.mxu1 }
 0x88d   : > { %8414 = vpow2.f32 %v6941_v52  ;;  %v6944_v57 = vmul.f32 -1.442695, %v3177_v54  ;;  %v3176_v58 = vadd.f32 %v3161_v56, %v3034_v55  ;;  %v6945_v52 = vld [vmem:[%s10029_s8] ss:$0 sm:$0xff] }
 0x88f   : > { %8416 = vpow2.f32 %v6944_v57  ;;  %v6943_v60 = vmul.f32 -1.442695, %v3176_v58 }
 0x890   : > { %v8405_v61 = vpop.eup %8404 }
 0x891   : > { %v3211_v62 = vadd.f32 1.0, %v8405_v61  ;;  %8418 = vpow2.f32 %v6943_v60 }
 0x892   : > { %v8407_v63 = vpop.eup %8406 }
 0x893   : > { %8420 = vrcp.f32 %v3211_v62  ;;  %v3210_v0 = vadd.f32 1.0, %v8407_v63  ;;  %v3516_v62 = vld [vmem:[#allocation3 + $0x198] sm:$0xff] }
 0x894   : > { %v8409_v2 = vpop.eup %8408  ;;  %v3664_v63 = vld [vmem:[#allocation3 + $0x1b8] sm:$0xff]  ;;  %7886 = vmatprep.subr.mxu1 %v3516_v62 }
 0x895   : > { %8422 = vrcp.f32 %v3210_v0  ;;  %v3213_v6 = vadd.f32 1.0, %v8409_v2  ;;  %v3663_v2 = vld [vmem:[#allocation3 + $0x1b0] sm:$0xff]  ;;  %7887 = vmatpush3.msra.mxu1 %v3516_v62  ;;  %7906 = vmatprep.subr.mxu0 %v3664_v63 }
 0x896   : > { %v8411_v8 = vpop.eup %8410  ;;  %7888 = vmatprep.subr.mxu1 %v3515_v3 }
 0x897   : > { %8424 = vrcp.f32 %v3213_v6  ;;  %v3212_v14 = vadd.f32 1.0, %v8411_v8  ;;  %7889 = vmatpush3.msra.mxu1 %v3515_v3 }
 0x898   : > { %v8413_v16 = vpop.eup %8412 }
 0x899   : > { %8426 = vrcp.f32 %v3212_v14  ;;  %v3215_v5 = vadd.f32 1.0, %v8413_v16  ;;  %v3662_v14 = vld [vmem:[#allocation3 + $0x1a8] sm:$0xff] }
 0x89a   : > { %v8415_v38 = vpop.eup %8414 }
 0x89b   : > { %8428 = vrcp.f32 %v3215_v5  ;;  %v3214_v46 = vadd.f32 1.0, %v8415_v38 }
 0x89c   : > { %v8417_v22 = vpop.eup %8416 }
 0x89d   : > { %8430 = vrcp.f32 %v3214_v46  ;;  %v3217_v30 = vadd.f32 1.0, %v8417_v22 }
 0x89e   : > { %v8419_v47 = vpop.eup %8418 }
 0x89f   : > { %8432 = vrcp.f32 %v3217_v30  ;;  %v3216_v53 = vadd.f32 1.0, %v8419_v47  ;;  %v3661_v47 = vld [vmem:[#allocation3 + $0x1a0] sm:$0xff] }
 0x8a0   : > { %v8421_v7 = vpop.eup %8420 }
 0x8a1   : > { %8434 = vrcp.f32 %v3216_v53  ;;  %3244 = vrot.lane.b32.xlu1 %v8421_v7, %s8717_s26  ;;  %v3514_v53 = vld [vmem:[#allocation3 + $0x188] sm:$0xff]  ;;  %v3513_v7 = vld [vmem:[#allocation3 + $0x180] sm:$0xff] }
 0x8a2   : > { %v8423_v29 = vpop.eup %8422  ;;  %8436 = vtanh.f32 %v9363_v33  ;;  %7890 = vmatprep.subr.mxu1 %v3514_v53 }
 0x8a3   : > { %3242 = vrot.lane.b32.xlu0 %v8423_v29, %s8717_s26  ;;  %8438 = vtanh.f32 %v9360_v24  ;;  %7891 = vmatpush3.msra.mxu1 %v3514_v53 }
 0x8a4   : > { %v8425_v10 = vpop.eup %8424  ;;  %8440 = vtanh.f32 %v9369_v48  ;;  %7892 = vmatprep.subr.mxu1 %v3513_v7 }
 0x8a5   : > { %3248 = vrot.lane.b32.xlu1 %v8425_v10, %s8717_s26  ;;  %8442 = vtanh.f32 %v9366_v17  ;;  %7893 = vmatpush3.msra.mxu1 %v3513_v7  ;;  %v3798_v10 = vld [vmem:[#allocation3 + $0x1d8] sm:$0xff] }
 0x8a6   : > { %v8427_v4 = vpop.eup %8426  ;;  %8444 = vtanh.f32 %v3174_v32  ;;  %7926 = vmatprep.subr.mxu1 %v3798_v10 }
 0x8a7   : > { %3246 = vrot.lane.b32.xlu0 %v8427_v4, %s8717_s26  ;;  %8446 = vtanh.f32 %v9372_v35 }
 0x8a8   : > { %v8429_v13 = vpop.eup %8428  ;;  %8448 = vtanh.f32 %v3176_v58 }
 0x8a9   : > { %3252 = vrot.lane.b32.xlu1 %v8429_v13, %s8717_s26  ;;  %8450 = vtanh.f32 %v3177_v54 }
 0x8aa   : > { %v8431_v31 = vpop.eup %8430 }
 0x8ab   : > { %3250 = vrot.lane.b32.xlu0 %v8431_v31, %s8717_s26 }
 0x8ac   : > { %v8433_v36 = vpop.eup %8432 }
 0x8ad   : > { %3256 = vrot.lane.b32.xlu1 %v8433_v36, %s8717_s26 }
 0x8ae   : > { %v8435_v18 = vpop.eup %8434 }
 0x8af   : > { %3254 = vrot.lane.b32.xlu0 %v8435_v18, %s8717_s26  ;;  %v8437_v1 = vpop.eup %8436 }
 0x8b0   : > { %v8439_v12 = vpop.eup %8438 }
 0x8b1   : > { %v8441_v33 = vpop.eup %8440 }
 0x8b2   : > { %v8443_v45 = vpop.eup %8442 }
 0x8b3   : > { %v8445_v11 = vpop.eup %8444 }
 0x8b4   : > { %v8447_v28 = vpop.eup %8446 }
 0x8b5   : > { %v8449_v43 = vpop.eup %8448 }
 0x8b6   : > { %v8451_v50 = vpop.eup %8450 }
 0x913   : > { %v3245_v9 = vpop.permute.xlu1 %3244 }
 0x914   : > { %v3267_v42 = vmul.f32 %v8439_v12, %v3245_v9 }
 0x915   : > { %v3243_v20 = vpop.permute.xlu0 %3242 }
 0x916   : > { %v3266_v40 = vmul.f32 %v8437_v1, %v3243_v20 }
 0x917   : > { %v3249_v41 = vpop.permute.xlu1 %3248 }
 0x918   : > { %7874 = vmatprep.mubr.msk.f32.mxu0 %vm571_vm1, %v3266_v40  ;;  %v3269_v48 = vmul.f32 %v8443_v45, %v3249_v41 }
 0x919   : > { %7875 = vmatmul.mubr.msk.f32.vlgmr.msra.gmra.mxu0 %vm571_vm1, %v3267_v42  ;;  %v3247_v24 = vpop.permute.xlu0 %3246 }
 0x91a   : > { %v3268_v17 = vmul.f32 %v8441_v33, %v3247_v24  ;;  %7907 = vmatpush3.msra.mxu0 %v3664_v63 }
 0x91b   : > { %v3253_v27 = vpop.permute.xlu1 %3252  ;;  %7908 = vmatprep.subr.mxu0 %v3663_v2 }
 0x91c   : > { %7877 = vmatprep.mubr.msk.f32.mxu0 %vm571_vm1, %v3268_v17  ;;  %v3271_v35 = vmul.f32 %v8447_v28, %v3253_v27  ;;  %7909 = vmatpush3.msra.mxu0 %v3663_v2  ;;  %v3797_v17 = vld [vmem:[#allocation3 + $0x1d0] sm:$0xff]  ;;  %v3796_v28 = vld [vmem:[#allocation3 + $0x1c8] sm:$0xff] }
 0x91d   : > { %7878 = vmatmul.mubr.msk.f32.gmra.mxu0 %vm571_vm1, %v3269_v48  ;;  %v3251_v21 = vpop.permute.xlu0 %3250  ;;  %7910 = vmatprep.subr.mxu0 %v3662_v14 }
 0x91e   : > { %v3270_v44 = vmul.f32 %v8445_v11, %v3251_v21  ;;  %7911 = vmatpush3.msra.mxu0 %v3662_v14  ;;  %v6963_v14 = vld [vmem:[%s10025_s4 + $0x4] ss:$0 sm:$0xff] }
 0x91f   : > { %v3257_v49 = vpop.permute.xlu1 %3256  ;;  %7912 = vmatprep.subr.mxu0 %v3661_v47 }
 0x920   : > { %7880 = vmatprep.mubr.msk.f32.mxu0 %vm571_vm1, %v3270_v44  ;;  %v3273_v39 = vmul.f32 %v8451_v50, %v3257_v49  ;;  %7913 = vmatpush3.msra.mxu0 %v3661_v47  ;;  %v3795_v44 = vld [vmem:[#allocation3 + $0x1c0] sm:$0xff] }
 0x921   : > { %7881 = vmatmul.mubr.msk.f32.gmra.mxu0 %vm571_vm1, %v3271_v35  ;;  %v3255_v32 = vpop.permute.xlu0 %3254 }
 0x922   : > { %v3272_v51 = vmul.f32 %v8449_v43, %v3255_v32 }
 0x924   : > { %7883 = vmatprep.mubr.msk.f32.mxu0 %vm571_vm1, %v3272_v51 }
 0x925   : > { %7884 = vmatmul.mubr.msk.f32.gmra.mxu0 %vm571_vm1, %v3273_v39 }
 0x9d9   : > { %v7876_v54 = vpop.f32.mrf.mxu0 }
 0x9da   : > { %v3381_v55 = vadd.f32 %v7876_v54, %v6945_v52 }
 0x9db   : > { %v3375_v56 = vpop.f32.mrf.mxu0 }
 0x9dc   : > { %v3376_v57 = vadd.f32 %v6945_v52, %v3375_v56  ;;  %3424 = vrot.lane.b32.xlu1 %v3381_v55, %s8718_s16 }
 0x9dd   : > { %v7879_v58 = vpop.f32.mrf.mxu0 }
 0x9de   : > { %v3391_v60 = vadd.f32 %v7879_v58, %v6945_v52  ;;  %3422 = vrot.lane.b32.xlu0 %v3376_v57, %s8718_s16  ;;  %v4036_v58 = vld [vmem:[#allocation5 + $0x78] sm:$0xff] }
 0x9df   : > { %v3385_v61 = vpop.f32.mrf.mxu0  ;;  %7946 = vmatprep.subr.mxu0 %v4036_v58 }
 0x9e0   : > { %v3386_v0 = vadd.f32 %v6945_v52, %v3385_v61  ;;  %3428 = vrot.lane.b32.xlu1 %v3391_v60, %s8718_s16  ;;  %v4035_v60 = vld [vmem:[#allocation5 + $0x70] sm:$0xff]  ;;  %v4034_v61 = vld [vmem:[#allocation5 + $0x68] sm:$0xff] }
 0x9e1   : > { %v7882_v6 = vpop.f32.mrf.mxu0 }
 0x9e2   : > { %v3401_v8 = vadd.f32 %v7882_v6, %v6945_v52  ;;  %3426 = vrot.lane.b32.xlu0 %v3386_v0, %s8718_s16 }
 0x9e3   : > { %v3395_v16 = vpop.f32.mrf.mxu0 }
 0x9e4   : > { %v3396_v5 = vadd.f32 %v6945_v52, %v3395_v16  ;;  %3432 = vrot.lane.b32.xlu1 %v3401_v8, %s8718_s16 }
 0x9e5   : > { %v7885_v38 = vpop.f32.mrf.mxu0 }
 0x9e6   : > { %v3411_v46 = vadd.f32 %v7885_v38, %v6945_v52  ;;  %3430 = vrot.lane.b32.xlu0 %v3396_v5, %s8718_s16 }
 0x9e7   : > { %v3405_v22 = vpop.f32.mrf.mxu0 }
 0x9e8   : > { %v3406_v30 = vadd.f32 %v6945_v52, %v3405_v22  ;;  %3436 = vrot.lane.b32.xlu1 %v3411_v46, %s8718_s16 }
 0x9ea   : > { %3434 = vrot.lane.b32.xlu0 %v3406_v30, %s8718_s16 }
 0xa4e   : > { %v3425_v29 = vpop.permute.xlu1 %3424 }
 0xa4f   : > { %v9411_v4 = vadd.f32 %v3425_v29, %v9284_v23 }
 0xa50   : > { %v3423_v13 = vpop.permute.xlu0 %3422 }
 0xa51   : > { %v9414_v31 = vadd.f32 %v3423_v13, %v9290_v59  ;;  %3464 = vrot.lane.b32.xlu1 %v9411_v4, %s8717_s26 }
 0xa52   : > { %v3429_v36 = vpop.permute.xlu1 %3428 }
 0xa53   : > { %v9419_v18 = vadd.f32 %v3429_v36, %v9296_v25  ;;  %3462 = vrot.lane.b32.xlu0 %v9414_v31, %s8717_s26 }
 0xa54   : > { %v3427_v9 = vpop.permute.xlu0 %3426 }
 0xa55   : > { %v9424_v1 = vadd.f32 %v3427_v9, %v9304_v15  ;;  %3468 = vrot.lane.b32.xlu1 %v9419_v18, %s8717_s26 }
 0xa56   : > { %v3433_v23 = vpop.permute.xlu1 %3432 }
 0xa57   : > { %v9429_v59 = vadd.f32 %v3433_v23, %v9310_v37  ;;  %3466 = vrot.lane.b32.xlu0 %v9424_v1, %s8717_s26 }
 0xa58   : > { %v3431_v20 = vpop.permute.xlu0 %3430 }
 0xa59   : > { %v9434_v25 = vadd.f32 %v3431_v20, %v9318_v19  ;;  %3472 = vrot.lane.b32.xlu1 %v9429_v59, %s8717_s26 }
 0xa5a   : > { %v3437_v12 = vpop.permute.xlu1 %3436 }
 0xa5b   : > { %v9439_v15 = vadd.f32 %v3437_v12, %v9324_v34  ;;  %3470 = vrot.lane.b32.xlu0 %v9434_v25, %s8717_s26 }
 0xa5c   : > { %v3435_v40 = vpop.permute.xlu0 %3434 }
 0xa5d   : > { %v9444_v37 = vadd.f32 %v3435_v40, %v9332_v26  ;;  %3476 = vrot.lane.b32.xlu1 %v9439_v15, %s8717_s26 }
 0xa5f   : > { %3474 = vrot.lane.b32.xlu0 %v9444_v37, %s8717_s26 }
 0xac3   : > { %v3465_v19 = vpop.permute.xlu1 %3464 }
 0xac4   : > { %3487 = vst.msk [vmem:[#allocation2 + $0x28] sm:$0xff] %vm571_vm1, %v3465_v19 }
 0xac5   : > { %v3463_v42 = vpop.permute.xlu0 %3462 }
 0xac6   : > { %3486 = vst.msk [vmem:[#allocation2 + $0x20] sm:$0xff] %vm571_vm1, %v3463_v42  ;;  %7914 = vmatprep.mubr.msk.f32.mxu0 %vm571_vm1, %v3463_v42 }
 0xac7   : > { %v3469_v34 = vpop.permute.xlu1 %3468  ;;  %7915 = vmatmul.mubr.msk.f32.vlgmr.msra.gmra.mxu0 %vm571_vm1, %v3465_v19 }
 0xac8   : > { %3489 = vst.msk [vmem:[#allocation2 + $0x38] sm:$0xff] %vm571_vm1, %v3469_v34  ;;  %7947 = vmatpush3.msra.mxu0 %v4036_v58 }
 0xac9   : > { %v3467_v26 = vpop.permute.xlu0 %3466  ;;  %7948 = vmatprep.subr.mxu0 %v4035_v60 }
 0xaca   : > { %3488 = vst.msk [vmem:[#allocation2 + $0x30] sm:$0xff] %vm571_vm1, %v3467_v26  ;;  %7917 = vmatprep.mubr.msk.f32.mxu0 %vm571_vm1, %v3467_v26  ;;  %7949 = vmatpush3.msra.mxu0 %v4035_v60 }
 0xacb   : > { %v3473_v41 = vpop.permute.xlu1 %3472  ;;  %7918 = vmatmul.mubr.msk.f32.gmra.mxu0 %vm571_vm1, %v3469_v34  ;;  %7950 = vmatprep.subr.mxu0 %v4034_v61 }
 0xacc   : > { %3491 = vst.msk [vmem:[#allocation2 + $0x48] sm:$0xff] %vm571_vm1, %v3473_v41  ;;  %7951 = vmatpush3.msra.mxu0 %v4034_v61 }
 0xacd   : > { %v3471_v33 = vpop.permute.xlu0 %3470  ;;  %v3494_v24 = vld [vmem:[#allocation2 + $0x1f] sm:$0xff]  ;;  %v3495_v45 = vld [vmem:[#allocation2 + $0x27] sm:$0xff] }
 0xace   : > { %3490 = vst.msk [vmem:[#allocation2 + $0x40] sm:$0xff] %vm571_vm1, %v3471_v33  ;;  %7894 = vmatprep.mubr.msk.f32.mxu1 %vm571_vm1, %v3494_v24  ;;  %7920 = vmatprep.mubr.msk.f32.mxu0 %vm571_vm1, %v3471_v33  ;;  %v3502_v50 = vld [vmem:[#allocation2 + $0x21] sm:$0xff] }
 0xacf   : > { %v3477_v48 = vpop.permute.xlu1 %3476  ;;  %7895 = vmatmul.mubr.msk.f32.vlgmr.msra.gmra.mxu1 %vm571_vm1, %v3495_v45  ;;  %7921 = vmatmul.mubr.msk.f32.gmra.mxu0 %vm571_vm1, %v3473_v41 }
 0xad0   : > { %3493 = vst.msk [vmem:[#allocation2 + $0x58] sm:$0xff] %vm571_vm1, %v3477_v48  ;;  %7927 = vmatpush3.msra.mxu1 %v3798_v10 }
 0xad1   : > { %v3475_v27 = vpop.permute.xlu0 %3474  ;;  %v3496_v11 = vld [vmem:[#allocation2 + $0x2f] sm:$0xff]  ;;  %7928 = vmatprep.subr.mxu1 %v3797_v17  ;;  %v3497_v21 = vld [vmem:[#allocation2 + $0x37] sm:$0xff] }
 0xad2   : > { %3492 = vst.msk [vmem:[#allocation2 + $0x50] sm:$0xff] %vm571_vm1, %v3475_v27  ;;  %7897 = vmatprep.mubr.msk.f32.mxu1 %vm571_vm1, %v3496_v11  ;;  %7923 = vmatprep.mubr.msk.f32.mxu0 %vm571_vm1, %v3475_v27  ;;  %v3503_v51 = vld [vmem:[#allocation2 + $0x29] sm:$0xff]  ;;  %v3504_v39 = vld [vmem:[#allocation2 + $0x31] sm:$0xff] }
 0xad3   : > { %7898 = vmatmul.mubr.msk.f32.gmra.mxu1 %vm571_vm1, %v3497_v21  ;;  %7924 = vmatmul.mubr.msk.f32.gmra.mxu0 %vm571_vm1, %v3477_v48 }
 0xad4   : > { %7929 = vmatpush3.msra.mxu1 %v3797_v17 }
 0xad5   : > { %v3498_v35 = vld [vmem:[#allocation2 + $0x3f] sm:$0xff]  ;;  %7930 = vmatprep.subr.mxu1 %v3796_v28  ;;  %v3499_v49 = vld [vmem:[#allocation2 + $0x47] sm:$0xff] }
 0xad6   : > { %7900 = vmatprep.mubr.msk.f32.mxu1 %vm571_vm1, %v3498_v35  ;;  %7931 = vmatpush3.msra.mxu1 %v3796_v28  ;;  %v3505_v52 = vld [vmem:[#allocation2 + $0x39] sm:$0xff]  ;;  %v3506_v54 = vld [vmem:[#allocation2 + $0x41] sm:$0xff] }
 0xad7   : > { %7901 = vmatmul.mubr.msk.f32.gmra.mxu1 %vm571_vm1, %v3499_v49  ;;  %7932 = vmatprep.subr.mxu1 %v3795_v44  ;;  %v3509_v57 = vld [vmem:[#allocation2 + $0x59] sm:$0xff] }
 0xad8   : > { %7933 = vmatpush3.msra.mxu1 %v3795_v44 }
 0xad9   : > { %v3500_v43 = vld [vmem:[#allocation2 + $0x4f] sm:$0xff]  ;;  %v3501_v32 = vld [vmem:[#allocation2 + $0x57] sm:$0xff] }
 0xada   : > { %7903 = vmatprep.mubr.msk.f32.mxu1 %vm571_vm1, %v3500_v43  ;;  %v3507_v55 = vld [vmem:[#allocation2 + $0x49] sm:$0xff]  ;;  %v3508_v56 = vld [vmem:[#allocation2 + $0x51] sm:$0xff] }
 0xadb   : > { %7904 = vmatmul.mubr.msk.f32.gmra.mxu1 %vm571_vm1, %v3501_v32 }
 0xadc   : > { %7934 = vmatprep.mubr.msk.f32.mxu1 %vm571_vm1, %v3502_v50 }
 0xadf   : > { %7935 = vmatmul.mubr.msk.f32.vlgmr.msra.gmra.mxu1 %vm571_vm1, %v3503_v51 }
 0xae0   : > { %7937 = vmatprep.mubr.msk.f32.mxu1 %vm571_vm1, %v3504_v39 }
 0xae3   : > { %7938 = vmatmul.mubr.msk.f32.gmra.mxu1 %vm571_vm1, %v3505_v52 }
 0xae4   : > { %7940 = vmatprep.mubr.msk.f32.mxu1 %vm571_vm1, %v3506_v54 }
 0xae7   : > { %7941 = vmatmul.mubr.msk.f32.gmra.mxu1 %vm571_vm1, %v3507_v55 }
 0xae8   : > { %7943 = vmatprep.mubr.msk.f32.mxu1 %vm571_vm1, %v3508_v56 }
 0xaeb   : > { %7944 = vmatmul.mubr.msk.f32.gmra.mxu1 %vm571_vm1, %v3509_v57 }
 0xb87   : > { %v7916_v62 = vpop.f32.mrf.mxu0 }
 0xb89   : > { %v3747_v2 = vpop.f32.mrf.mxu0 }
 0xb8b   : > { %v7919_v8 = vpop.f32.mrf.mxu0 }
 0xb8d   : > { %v3757_v46 = vpop.f32.mrf.mxu0 }
 0xb8f   : > { %v7896_v63 = vpop.f32.mrf.mxu1  ;;  %v7922_v29 = vpop.f32.mrf.mxu0 }
 0xb90   : > { %v3653_v38 = vadd.f32 %v7896_v63, %v6963_v14 }
 0xb91   : > { %v3607_v0 = vpop.f32.mrf.mxu1  ;;  %v3767_v42 = vpop.f32.mrf.mxu0 }
 0xb92   : > { %v3652_v30 = vadd.f32 %v6963_v14, %v3607_v0  ;;  %v3787_v7 = vadd.f32 %v7916_v62, %v3653_v38 }
 0xb93   : > { %v7899_v3 = vpop.f32.mrf.mxu1  ;;  %v7925_v21 = vpop.f32.mrf.mxu0 }
 0xb94   : > { %v3655_v53 = vadd.f32 %v7899_v3, %v6963_v14  ;;  %v3786_v9 = vadd.f32 %v3747_v2, %v3652_v30 }
 0xb95   : > { %v3617_v6 = vpop.f32.mrf.mxu1  ;;  %v3777_v52 = vpop.f32.mrf.mxu0 }
 0xb96   : > { %v3654_v13 = vadd.f32 %v6963_v14, %v3617_v6  ;;  %v3789_v19 = vadd.f32 %v7919_v8, %v3655_v53  ;;  %v4033_v8 = vld [vmem:[#allocation5 + $0x60] sm:$0xff] }
 0xb97   : > { %v7902_v16 = vpop.f32.mrf.mxu1  ;;  %7952 = vmatprep.subr.mxu0 %v4033_v8 }
 0xb98   : > { %v3657_v23 = vadd.f32 %v7902_v16, %v6963_v14  ;;  %v3788_v24 = vadd.f32 %v3757_v46, %v3654_v13  ;;  %7953 = vmatpush3.msra.mxu0 %v4033_v8  ;;  %v4283_v8 = vld [vmem:[#allocation3 + $0x1f0] sm:$0xff] }
 0xb99   : > { %v3627_v5 = vpop.f32.mrf.mxu1 }
 0xb9a   : > { %v3656_v34 = vadd.f32 %v6963_v14, %v3627_v5  ;;  %v3791_v17 = vadd.f32 %v7922_v29, %v3657_v23 }
 0xb9b   : > { %v7905_v22 = vpop.f32.mrf.mxu1 }
 0xb9c   : > { %v3659_v48 = vadd.f32 %v7905_v22, %v6963_v14  ;;  %v3790_v44 = vadd.f32 %v3767_v42, %v3656_v34 }
 0xb9d   : > { %v3637_v47 = vpop.f32.mrf.mxu1 }
 0xb9e   : > { %v3658_v35 = vadd.f32 %v6963_v14, %v3637_v47  ;;  %v3793_v39 = vadd.f32 %v7925_v21, %v3659_v48 }
 0xb9f   : > { %v7936_v10 = vpop.f32.mrf.mxu1 }
 0xba0   : > { %v9485_v36 = vadd.f32 %v7936_v10, %v3787_v7  ;;  %v3792_v57 = vadd.f32 %v3777_v52, %v3658_v35 }
 0xba1   : > { %v3889_v20 = vpop.f32.mrf.mxu1 }
 0xba2   : > { %v6981_v12 = vmul.f32 -1.442695, %v9485_v36  ;;  %v9488_v40 = vadd.f32 %v3889_v20, %v3786_v9 }
 0xba3   : > { %v7939_v26 = vpop.f32.mrf.mxu1 }
 0xba4   : > { %8452 = vpow2.f32 %v6981_v12  ;;  %v6980_v41 = vmul.f32 -1.442695, %v9488_v40  ;;  %v9491_v33 = vadd.f32 %v7939_v26, %v3789_v19 }
 0xba5   : > { %v3899_v45 = vpop.f32.mrf.mxu1 }
 0xba6   : > { %8454 = vpow2.f32 %v6980_v41  ;;  %v6983_v27 = vmul.f32 -1.442695, %v9491_v33  ;;  %v9494_v11 = vadd.f32 %v3899_v45, %v3788_v24 }
 0xba7   : > { %v7942_v28 = vpop.f32.mrf.mxu1 }
 0xba8   : > { %8456 = vpow2.f32 %v6983_v27  ;;  %v6982_v49 = vmul.f32 -1.442695, %v9494_v11  ;;  %v9497_v43 = vadd.f32 %v7942_v28, %v3791_v17 }
 0xba9   : > { %v3909_v32 = vpop.f32.mrf.mxu1 }
 0xbaa   : > { %8458 = vpow2.f32 %v6982_v49  ;;  %v6985_v50 = vmul.f32 -1.442695, %v9497_v43  ;;  %v3932_v51 = vadd.f32 %v3909_v32, %v3790_v44 }
 0xbab   : > { %v7945_v54 = vpop.f32.mrf.mxu1 }
 0xbac   : > { %8460 = vpow2.f32 %v6985_v50  ;;  %v6984_v55 = vmul.f32 -1.442695, %v3932_v51  ;;  %v3935_v56 = vadd.f32 %v7945_v54, %v3793_v39 }
 0xbad   : > { %v3919_v58 = vpop.f32.mrf.mxu1 }
 0xbae   : > { %8462 = vpow2.f32 %v6984_v55  ;;  %v6987_v60 = vmul.f32 -1.442695, %v3935_v56  ;;  %v3934_v61 = vadd.f32 %v3919_v58, %v3792_v57  ;;  %v6989_v55 = vld [vmem:[%s10027_s6 + $0x3] ss:$0 sm:$0xff] }
 0xbb0   : > { %8464 = vpow2.f32 %v6987_v60  ;;  %v6986_v62 = vmul.f32 -1.442695, %v3934_v61 }
 0xbb1   : > { %v8453_v63 = vpop.eup %8452 }
 0xbb2   : > { %v3969_v0 = vadd.f32 1.0, %v8453_v63  ;;  %8466 = vpow2.f32 %v6986_v62 }
 0xbb3   : > { %v8455_v2 = vpop.eup %8454 }
 0xbb4   : > { %8468 = vrcp.f32 %v3969_v0  ;;  %v3968_v3 = vadd.f32 1.0, %v8455_v2  ;;  %v4284_v0 = vld [vmem:[#allocation3 + $0x1f8] sm:$0xff] }
 0xbb5   : > { %v8457_v6 = vpop.eup %8456  ;;  %v4432_v2 = vld [vmem:[#allocation3 + $0x218] sm:$0xff]  ;;  %7966 = vmatprep.subr.mxu1 %v4284_v0 }
 0xbb6   : > { %8470 = vrcp.f32 %v3968_v3  ;;  %v3971_v14 = vadd.f32 1.0, %v8457_v6  ;;  %v4431_v6 = vld [vmem:[#allocation3 + $0x210] sm:$0xff]  ;;  %7967 = vmatpush3.msra.mxu1 %v4284_v0  ;;  %7986 = vmatprep.subr.mxu0 %v4432_v2  ;;  %v4804_v0 = vld [vmem:[#allocation5 + $0x98] sm:$0xff] }
 0xbb7   : > { %v8459_v16 = vpop.eup %8458  ;;  %7968 = vmatprep.subr.mxu1 %v4283_v8 }
 0xbb8   : > { %8472 = vrcp.f32 %v3971_v14  ;;  %v3970_v5 = vadd.f32 1.0, %v8459_v16  ;;  %7969 = vmatpush3.msra.mxu1 %v4283_v8 }
 0xbb9   : > { %v8461_v38 = vpop.eup %8460 }
 0xbba   : > { %8474 = vrcp.f32 %v3970_v5  ;;  %v3973_v46 = vadd.f32 1.0, %v8461_v38  ;;  %v4430_v5 = vld [vmem:[#allocation3 + $0x208] sm:$0xff] }
 0xbbb   : > { %v8463_v22 = vpop.eup %8462 }
 0xbbc   : > { %8476 = vrcp.f32 %v3973_v46  ;;  %v3972_v30 = vadd.f32 1.0, %v8463_v22 }
 0xbbd   : > { %v8465_v47 = vpop.eup %8464 }
 0xbbe   : > { %8478 = vrcp.f32 %v3972_v30  ;;  %v3975_v53 = vadd.f32 1.0, %v8465_v47 }
 0xbbf   : > { %v8467_v7 = vpop.eup %8466 }
 0xbc0   : > { %8480 = vrcp.f32 %v3975_v53  ;;  %v3974_v29 = vadd.f32 1.0, %v8467_v7  ;;  %v4429_v7 = vld [vmem:[#allocation3 + $0x200] sm:$0xff] }
 0xbc1   : > { %v8469_v10 = vpop.eup %8468 }
 0xbc2   : > { %8482 = vrcp.f32 %v3974_v29  ;;  %4002 = vrot.lane.b32.xlu1 %v8469_v10, %s8717_s26  ;;  %v4282_v29 = vld [vmem:[#allocation3 + $0x1e8] sm:$0xff]  ;;  %v4281_v10 = vld [vmem:[#allocation3 + $0x1e0] sm:$0xff] }
 0xbc3   : > { %v8471_v13 = vpop.eup %8470  ;;  %8484 = vtanh.f32 %v9488_v40  ;;  %7970 = vmatprep.subr.mxu1 %v4282_v29 }
 0xbc4   : > { %4000 = vrot.lane.b32.xlu0 %v8471_v13, %s8717_s26  ;;  %8486 = vtanh.f32 %v9485_v36  ;;  %7971 = vmatpush3.msra.mxu1 %v4282_v29  ;;  %v7007_v29 = vld [vmem:[%s10025_s4 + $0x5] ss:$0 sm:$0xff] }
 0xbc5   : > { %v8473_v9 = vpop.eup %8472  ;;  %8488 = vtanh.f32 %v9494_v11  ;;  %7972 = vmatprep.subr.mxu1 %v4281_v10 }
 0xbc6   : > { %4006 = vrot.lane.b32.xlu1 %v8473_v9, %s8717_s26  ;;  %8490 = vtanh.f32 %v9491_v33  ;;  %7973 = vmatpush3.msra.mxu1 %v4281_v10  ;;  %v4566_v9 = vld [vmem:[#allocation3 + $0x238] sm:$0xff] }
 0xbc7   : > { %v8475_v23 = vpop.eup %8474  ;;  %8492 = vtanh.f32 %v3932_v51  ;;  %8006 = vmatprep.subr.mxu1 %v4566_v9 }
 0xbc8   : > { %4004 = vrot.lane.b32.xlu0 %v8475_v23, %s8717_s26  ;;  %8494 = vtanh.f32 %v9497_v43 }
 0xbc9   : > { %v8477_v20 = vpop.eup %8476  ;;  %8496 = vtanh.f32 %v3934_v61 }
 0xbca   : > { %4010 = vrot.lane.b32.xlu1 %v8477_v20, %s8717_s26  ;;  %8498 = vtanh.f32 %v3935_v56 }
 0xbcb   : > { %v8479_v12 = vpop.eup %8478 }
 0xbcc   : > { %4008 = vrot.lane.b32.xlu0 %v8479_v12, %s8717_s26 }
 0xbcd   : > { %v8481_v19 = vpop.eup %8480 }
 0xbce   : > { %4014 = vrot.lane.b32.xlu1 %v8481_v19, %s8717_s26 }
 0xbcf   : > { %v8483_v42 = vpop.eup %8482 }
 0xbd0   : > { %4012 = vrot.lane.b32.xlu0 %v8483_v42, %s8717_s26  ;;  %v8485_v26 = vpop.eup %8484 }
 0xbd1   : > { %v8487_v24 = vpop.eup %8486 }
 0xbd2   : > { %v8489_v40 = vpop.eup %8488 }
 0xbd3   : > { %v8491_v27 = vpop.eup %8490 }
 0xbd4   : > { %v8493_v28 = vpop.eup %8492 }
 0xbd5   : > { %v8495_v35 = vpop.eup %8494 }
 0xbd6   : > { %v8497_v50 = vpop.eup %8496 }
 0xbd7   : > { %v8499_v39 = vpop.eup %8498 }
 0xc34   : > { %v4003_v34 = vpop.permute.xlu1 %4002 }
 0xc35   : > { %v4025_v17 = vmul.f32 %v8487_v24, %v4003_v34 }
 0xc36   : > { %v4001_v41 = vpop.permute.xlu0 %4000 }
 0xc37   : > { %v4024_v45 = vmul.f32 %v8485_v26, %v4001_v41 }
 0xc38   : > { %v4007_v48 = vpop.permute.xlu1 %4006 }
 0xc39   : > { %7954 = vmatprep.mubr.msk.f32.mxu0 %vm571_vm1, %v4024_v45  ;;  %v4027_v11 = vmul.f32 %v8491_v27, %v4007_v48 }
 0xc3a   : > { %7955 = vmatmul.mubr.msk.f32.vlgmr.msra.gmra.mxu0 %vm571_vm1, %v4025_v17  ;;  %v4005_v36 = vpop.permute.xlu0 %4004 }
 0xc3b   : > { %v4026_v33 = vmul.f32 %v8489_v40, %v4005_v36  ;;  %7987 = vmatpush3.msra.mxu0 %v4432_v2  ;;  %v4803_v2 = vld [vmem:[#allocation5 + $0x90] sm:$0xff] }
 0xc3c   : > { %v4011_v21 = vpop.permute.xlu1 %4010  ;;  %7988 = vmatprep.subr.mxu0 %v4431_v6 }
 0xc3d   : > { %7957 = vmatprep.mubr.msk.f32.mxu0 %vm571_vm1, %v4026_v33  ;;  %v4029_v43 = vmul.f32 %v8495_v35, %v4011_v21  ;;  %7989 = vmatpush3.msra.mxu0 %v4431_v6  ;;  %v4565_v33 = vld [vmem:[#allocation3 + $0x230] sm:$0xff]  ;;  %v4564_v35 = vld [vmem:[#allocation3 + $0x228] sm:$0xff] }
 0xc3e   : > { %7958 = vmatmul.mubr.msk.f32.gmra.mxu0 %vm571_vm1, %v4027_v11  ;;  %v4009_v44 = vpop.permute.xlu0 %4008  ;;  %7990 = vmatprep.subr.mxu0 %v4430_v5  ;;  %v4802_v6 = vld [vmem:[#allocation5 + $0x88] sm:$0xff] }
 0xc3f   : > { %v4028_v49 = vmul.f32 %v8493_v28, %v4009_v44  ;;  %7991 = vmatpush3.msra.mxu0 %v4430_v5 }
 0xc40   : > { %v4015_v32 = vpop.permute.xlu1 %4014  ;;  %7992 = vmatprep.subr.mxu0 %v4429_v7 }
 0xc41   : > { %7960 = vmatprep.mubr.msk.f32.mxu0 %vm571_vm1, %v4028_v49  ;;  %v4031_v54 = vmul.f32 %v8499_v39, %v4015_v32  ;;  %7993 = vmatpush3.msra.mxu0 %v4429_v7  ;;  %v4563_v49 = vld [vmem:[#allocation3 + $0x220] sm:$0xff] }
 0xc42   : > { %7961 = vmatmul.mubr.msk.f32.gmra.mxu0 %vm571_vm1, %v4029_v43  ;;  %v4013_v51 = vpop.permute.xlu0 %4012  ;;  %8026 = vmatprep.subr.mxu0 %v4804_v0 }
 0xc43   : > { %v4030_v52 = vmul.f32 %v8497_v50, %v4013_v51 }
 0xc45   : > { %7963 = vmatprep.mubr.msk.f32.mxu0 %vm571_vm1, %v4030_v52 }
 0xc46   : > { %7964 = vmatmul.mubr.msk.f32.gmra.mxu0 %vm571_vm1, %v4031_v54 }
 0xcfa   : > { %v7956_v56 = vpop.f32.mrf.mxu0 }
 0xcfb   : > { %v9524_v57 = vadd.f32 %v7956_v56, %v6989_v55 }
 0xcfc   : > { %v4135_v58 = vpop.f32.mrf.mxu0 }
 0xcfd   : > { %v9526_v60 = vadd.f32 %v6989_v55, %v4135_v58  ;;  %4184 = vrot.lane.b32.xlu1 %v9524_v57, %s8718_s16 }
 0xcfe   : > { %v7959_v61 = vpop.f32.mrf.mxu0 }
 0xcff   : > { %v9530_v62 = vadd.f32 %v7959_v61, %v6989_v55  ;;  %4182 = vrot.lane.b32.xlu0 %v9526_v60, %s8718_s16 }
 0xd00   : > { %v4145_v63 = vpop.f32.mrf.mxu0 }
 0xd01   : > { %v9534_v3 = vadd.f32 %v6989_v55, %v4145_v63  ;;  %4188 = vrot.lane.b32.xlu1 %v9530_v62, %s8718_s16 }
 0xd02   : > { %v7962_v14 = vpop.f32.mrf.mxu0 }
 0xd03   : > { %v9538_v16 = vadd.f32 %v7962_v14, %v6989_v55  ;;  %4186 = vrot.lane.b32.xlu0 %v9534_v3, %s8718_s16 }
 0xd04   : > { %v4155_v38 = vpop.f32.mrf.mxu0 }
 0xd05   : > { %v9542_v46 = vadd.f32 %v6989_v55, %v4155_v38  ;;  %4192 = vrot.lane.b32.xlu1 %v9538_v16, %s8718_s16 }
 0xd06   : > { %v7965_v22 = vpop.f32.mrf.mxu0 }
 0xd07   : > { %v9546_v30 = vadd.f32 %v7965_v22, %v6989_v55  ;;  %4190 = vrot.lane.b32.xlu0 %v9542_v46, %s8718_s16 }
 0xd08   : > { %v4165_v47 = vpop.f32.mrf.mxu0 }
 0xd09   : > { %v9550_v53 = vadd.f32 %v6989_v55, %v4165_v47  ;;  %4196 = vrot.lane.b32.xlu1 %v9546_v30, %s8718_s16 }
 0xd0b   : > { %4194 = vrot.lane.b32.xlu0 %v9550_v53, %s8718_s16 }
 0xd6f   : > { %v4185_v13 = vpop.permute.xlu1 %4184 }
 0xd70   : > { %v9557_v23 = vadd.f32 %v4185_v13, %v9411_v4 }
 0xd71   : > { %v4183_v20 = vpop.permute.xlu0 %4182 }
 0xd72   : > { %v9560_v12 = vadd.f32 %v4183_v20, %v9414_v31  ;;  %4232 = vrot.lane.b32.xlu1 %v9557_v23, %s8717_s26 }
 0xd73   : > { %v4189_v19 = vpop.permute.xlu1 %4188 }
 0xd74   : > { %v9565_v42 = vadd.f32 %v4189_v19, %v9419_v18  ;;  %4230 = vrot.lane.b32.xlu0 %v9560_v12, %s8717_s26 }
 0xd75   : > { %v4187_v34 = vpop.permute.xlu0 %4186 }
 0xd76   : > { %v9570_v26 = vadd.f32 %v4187_v34, %v9424_v1  ;;  %4236 = vrot.lane.b32.xlu1 %v9565_v42, %s8717_s26 }
 0xd77   : > { %v4193_v4 = vpop.permute.xlu1 %4192 }
 0xd78   : > { %v9575_v31 = vadd.f32 %v4193_v4, %v9429_v59  ;;  %4234 = vrot.lane.b32.xlu0 %v9570_v26, %s8717_s26 }
 0xd79   : > { %v4191_v41 = vpop.permute.xlu0 %4190 }
 0xd7a   : > { %v9580_v18 = vadd.f32 %v4191_v41, %v9434_v25  ;;  %4240 = vrot.lane.b32.xlu1 %v9575_v31, %s8717_s26 }
 0xd7b   : > { %v4197_v24 = vpop.permute.xlu1 %4196 }
 0xd7c   : > { %v9585_v1 = vadd.f32 %v4197_v24, %v9439_v15  ;;  %4238 = vrot.lane.b32.xlu0 %v9580_v18, %s8717_s26 }
 0xd7d   : > { %v4195_v45 = vpop.permute.xlu0 %4194 }
 0xd7e   : > { %v9590_v59 = vadd.f32 %v4195_v45, %v9444_v37  ;;  %4244 = vrot.lane.b32.xlu1 %v9585_v1, %s8717_s26 }
 0xd80   : > { %4242 = vrot.lane.b32.xlu0 %v9590_v59, %s8717_s26 }
 0xde4   : > { %v4233_v25 = vpop.permute.xlu1 %4232 }
 0xde5   : > { %4255 = vst.msk [vmem:[#allocation2 + $0x28] sm:$0xff] %vm571_vm1, %v4233_v25 }
 0xde6   : > { %v4231_v17 = vpop.permute.xlu0 %4230 }
 0xde7   : > { %4254 = vst.msk [vmem:[#allocation2 + $0x20] sm:$0xff] %vm571_vm1, %v4231_v17  ;;  %7994 = vmatprep.mubr.msk.f32.mxu0 %vm571_vm1, %v4231_v17 }
 0xde8   : > { %v4237_v15 = vpop.permute.xlu1 %4236  ;;  %7995 = vmatmul.mubr.msk.f32.vlgmr.msra.gmra.mxu0 %vm571_vm1, %v4233_v25 }
 0xde9   : > { %4257 = vst.msk [vmem:[#allocation2 + $0x38] sm:$0xff] %vm571_vm1, %v4237_v15  ;;  %8027 = vmatpush3.msra.mxu0 %v4804_v0 }
 0xdea   : > { %v4235_v37 = vpop.permute.xlu0 %4234  ;;  %8028 = vmatprep.subr.mxu0 %v4803_v2 }
 0xdeb   : > { %4256 = vst.msk [vmem:[#allocation2 + $0x30] sm:$0xff] %vm571_vm1, %v4235_v37  ;;  %7997 = vmatprep.mubr.msk.f32.mxu0 %vm571_vm1, %v4235_v37  ;;  %8029 = vmatpush3.msra.mxu0 %v4803_v2 }
 0xdec   : > { %v4241_v48 = vpop.permute.xlu1 %4240  ;;  %7998 = vmatmul.mubr.msk.f32.gmra.mxu0 %vm571_vm1, %v4237_v15  ;;  %8030 = vmatprep.subr.mxu0 %v4802_v6 }
 0xded   : > { %4259 = vst.msk [vmem:[#allocation2 + $0x48] sm:$0xff] %vm571_vm1, %v4241_v48  ;;  %8031 = vmatpush3.msra.mxu0 %v4802_v6 }
 0xdee   : > { %v4239_v40 = vpop.permute.xlu0 %4238  ;;  %v4262_v36 = vld [vmem:[#allocation2 + $0x1d] sm:$0xff]  ;;  %v4263_v27 = vld [vmem:[#allocation2 + $0x25] sm:$0xff] }
 0xdef   : > { %4258 = vst.msk [vmem:[#allocation2 + $0x40] sm:$0xff] %vm571_vm1, %v4239_v40  ;;  %7974 = vmatprep.mubr.msk.f32.mxu1 %vm571_vm1, %v4262_v36  ;;  %8000 = vmatprep.mubr.msk.f32.mxu0 %vm571_vm1, %v4239_v40  ;;  %v4270_v39 = vld [vmem:[#allocation2 + $0x23] sm:$0xff] }
 0xdf0   : > { %v4245_v11 = vpop.permute.xlu1 %4244  ;;  %7975 = vmatmul.mubr.msk.f32.vlgmr.msra.gmra.mxu1 %vm571_vm1, %v4263_v27  ;;  %8001 = vmatmul.mubr.msk.f32.gmra.mxu0 %vm571_vm1, %v4241_v48 }
 0xdf1   : > { %4261 = vst.msk [vmem:[#allocation2 + $0x58] sm:$0xff] %vm571_vm1, %v4245_v11  ;;  %8007 = vmatpush3.msra.mxu1 %v4566_v9 }
 0xdf2   : > { %v4243_v21 = vpop.permute.xlu0 %4242  ;;  %v4264_v28 = vld [vmem:[#allocation2 + $0x2d] sm:$0xff]  ;;  %8008 = vmatprep.subr.mxu1 %v4565_v33  ;;  %v4265_v44 = vld [vmem:[#allocation2 + $0x35] sm:$0xff] }
 0xdf3   : > { %4260 = vst.msk [vmem:[#allocation2 + $0x50] sm:$0xff] %vm571_vm1, %v4243_v21  ;;  %7977 = vmatprep.mubr.msk.f32.mxu1 %vm571_vm1, %v4264_v28  ;;  %8003 = vmatprep.mubr.msk.f32.mxu0 %vm571_vm1, %v4243_v21  ;;  %v4271_v52 = vld [vmem:[#allocation2 + $0x2b] sm:$0xff]  ;;  %v4272_v54 = vld [vmem:[#allocation2 + $0x33] sm:$0xff] }
 0xdf4   : > { %7978 = vmatmul.mubr.msk.f32.gmra.mxu1 %vm571_vm1, %v4265_v44  ;;  %8004 = vmatmul.mubr.msk.f32.gmra.mxu0 %vm571_vm1, %v4245_v11 }
 0xdf5   : > { %8009 = vmatpush3.msra.mxu1 %v4565_v33 }
 0xdf6   : > { %v4266_v43 = vld [vmem:[#allocation2 + $0x3d] sm:$0xff]  ;;  %8010 = vmatprep.subr.mxu1 %v4564_v35  ;;  %v4267_v32 = vld [vmem:[#allocation2 + $0x45] sm:$0xff] }
 0xdf7   : > { %7980 = vmatprep.mubr.msk.f32.mxu1 %vm571_vm1, %v4266_v43  ;;  %8011 = vmatpush3.msra.mxu1 %v4564_v35  ;;  %v4273_v55 = vld [vmem:[#allocation2 + $0x3b] sm:$0xff]  ;;  %v4274_v56 = vld [vmem:[#allocation2 + $0x43] sm:$0xff] }
 0xdf8   : > { %7981 = vmatmul.mubr.msk.f32.gmra.mxu1 %vm571_vm1, %v4267_v32  ;;  %8012 = vmatprep.subr.mxu1 %v4563_v49  ;;  %v4277_v63 = vld [vmem:[#allocation2 + $0x5b] sm:$0xff] }
 0xdf9   : > { %8013 = vmatpush3.msra.mxu1 %v4563_v49 }
 0xdfa   : > { %v4268_v50 = vld [vmem:[#allocation2 + $0x4d] sm:$0xff]  ;;  %v4269_v51 = vld [vmem:[#allocation2 + $0x55] sm:$0xff] }
 0xdfb   : > { %7983 = vmatprep.mubr.msk.f32.mxu1 %vm571_vm1, %v4268_v50  ;;  %v4275_v58 = vld [vmem:[#allocation2 + $0x4b] sm:$0xff]  ;;  %v4276_v61 = vld [vmem:[#allocation2 + $0x53] sm:$0xff] }
 0xdfc   : > { %7984 = vmatmul.mubr.msk.f32.gmra.mxu1 %vm571_vm1, %v4269_v51 }
 0xdfd   : > { %8014 = vmatprep.mubr.msk.f32.mxu1 %vm571_vm1, %v4270_v39 }
 0xe00   : > { %8015 = vmatmul.mubr.msk.f32.vlgmr.msra.gmra.mxu1 %vm571_vm1, %v4271_v52 }
 0xe01   : > { %8017 = vmatprep.mubr.msk.f32.mxu1 %vm571_vm1, %v4272_v54 }
 0xe04   : > { %8018 = vmatmul.mubr.msk.f32.gmra.mxu1 %vm571_vm1, %v4273_v55 }
 0xe05   : > { %8020 = vmatprep.mubr.msk.f32.mxu1 %vm571_vm1, %v4274_v56 }
 0xe08   : > { %8021 = vmatmul.mubr.msk.f32.gmra.mxu1 %vm571_vm1, %v4275_v58 }
 0xe09   : > { %8023 = vmatprep.mubr.msk.f32.mxu1 %vm571_vm1, %v4276_v61 }
 0xe0c   : > { %8024 = vmatmul.mubr.msk.f32.gmra.mxu1 %vm571_vm1, %v4277_v63 }
 0xea8   : > { %v7996_v8 = vpop.f32.mrf.mxu0 }
 0xeaa   : > { %v4515_v38 = vpop.f32.mrf.mxu0 }
 0xeac   : > { %v7999_v7 = vpop.f32.mrf.mxu0 }
 0xeae   : > { %v4525_v20 = vpop.f32.mrf.mxu0 }
 0xeb0   : > { %v7976_v14 = vpop.f32.mrf.mxu1  ;;  %v8002_v45 = vpop.f32.mrf.mxu0 }
 0xeb1   : > { %v4421_v9 = vadd.f32 %v7976_v14, %v7007_v29 }
 0xeb2   : > { %v4375_v5 = vpop.f32.mrf.mxu1  ;;  %v4535_v11 = vpop.f32.mrf.mxu0 }
 0xeb3   : > { %v4420_v34 = vadd.f32 %v7007_v29, %v4375_v5  ;;  %v4555_v24 = vadd.f32 %v7996_v8, %v4421_v9 }
 0xeb4   : > { %v7979_v22 = vpop.f32.mrf.mxu1  ;;  %v8005_v52 = vpop.f32.mrf.mxu0 }
 0xeb5   : > { %v4423_v41 = vadd.f32 %v7979_v22, %v7007_v29  ;;  %v4554_v37 = vadd.f32 %v4515_v38, %v4420_v34 }
 0xeb6   : > { %v4385_v47 = vpop.f32.mrf.mxu1  ;;  %v4545_v8 = vpop.f32.mrf.mxu0 }
 0xeb7   : > { %v4422_v17 = vadd.f32 %v7007_v29, %v4385_v47  ;;  %v4557_v33 = vadd.f32 %v7999_v7, %v4423_v41 }
 0xeb8   : > { %v7982_v10 = vpop.f32.mrf.mxu1 }
 0xeb9   : > { %v4425_v48 = vadd.f32 %v7982_v10, %v7007_v29  ;;  %v4556_v49 = vadd.f32 %v4525_v20, %v4422_v17 }
 0xeba   : > { %v4395_v13 = vpop.f32.mrf.mxu1 }
 0xebb   : > { %v4424_v21 = vadd.f32 %v7007_v29, %v4395_v13  ;;  %v4559_v32 = vadd.f32 %v8002_v45, %v4425_v48 }
 0xebc   : > { %v7985_v19 = vpop.f32.mrf.mxu1 }
 0xebd   : > { %v4427_v50 = vadd.f32 %v7985_v19, %v7007_v29  ;;  %v4558_v55 = vadd.f32 %v4535_v11, %v4424_v21 }
 0xebe   : > { %v4405_v4 = vpop.f32.mrf.mxu1 }
 0xebf   : > { %v4426_v56 = vadd.f32 %v7007_v29, %v4405_v4  ;;  %v4561_v6 = vadd.f32 %v8005_v52, %v4427_v50  ;;  %v4801_v4 = vld [vmem:[#allocation5 + $0x80] sm:$0xff] }
 0xec0   : > { %v8016_v25 = vpop.f32.mrf.mxu1  ;;  %8032 = vmatprep.subr.mxu0 %v4801_v4 }
 0xec1   : > { %v9631_v15 = vadd.f32 %v8016_v25, %v4555_v24  ;;  %v4560_v22 = vadd.f32 %v4545_v8, %v4426_v56  ;;  %8033 = vmatpush3.msra.mxu0 %v4801_v4 }
 0xec2   : > { %v4657_v40 = vpop.f32.mrf.mxu1 }
 0xec3   : > { %v7025_v36 = vmul.f32 -1.442695, %v9631_v15  ;;  %v9634_v27 = vadd.f32 %v4657_v40, %v4554_v37 }
 0xec4   : > { %v8019_v28 = vpop.f32.mrf.mxu1 }
 0xec5   : > { %8500 = vpow2.f32 %v7025_v36  ;;  %v7024_v44 = vmul.f32 -1.442695, %v9634_v27  ;;  %v9637_v35 = vadd.f32 %v8019_v28, %v4557_v33 }
 0xec6   : > { %v4667_v43 = vpop.f32.mrf.mxu1 }
 0xec7   : > { %8502 = vpow2.f32 %v7024_v44  ;;  %v7027_v51 = vmul.f32 -1.442695, %v9637_v35  ;;  %v9640_v39 = vadd.f32 %v4667_v43, %v4556_v49 }
 0xec8   : > { %v8022_v54 = vpop.f32.mrf.mxu1 }
 0xec9   : > { %8504 = vpow2.f32 %v7027_v51  ;;  %v7026_v58 = vmul.f32 -1.442695, %v9640_v39  ;;  %v9643_v61 = vadd.f32 %v8022_v54, %v4559_v32 }
 0xeca   : > { %v4677_v63 = vpop.f32.mrf.mxu1 }
 0xecb   : > { %8506 = vpow2.f32 %v7026_v58  ;;  %v7029_v0 = vmul.f32 -1.442695, %v9643_v61  ;;  %v4700_v2 = vadd.f32 %v4677_v63, %v4558_v55 }
 0xecc   : > { %v8025_v14 = vpop.f32.mrf.mxu1 }
 0xecd   : > { %8508 = vpow2.f32 %v7029_v0  ;;  %v7028_v5 = vmul.f32 -1.442695, %v4700_v2  ;;  %v4703_v38 = vadd.f32 %v8025_v14, %v4561_v6 }
 0xece   : > { %v4687_v47 = vpop.f32.mrf.mxu1 }
 0xecf   : > { %8510 = vpow2.f32 %v7028_v5  ;;  %v7031_v7 = vmul.f32 -1.442695, %v4703_v38  ;;  %v4702_v29 = vadd.f32 %v4687_v47, %v4560_v22 }
 0xed1   : > { %8512 = vpow2.f32 %v7031_v7  ;;  %v7030_v10 = vmul.f32 -1.442695, %v4702_v29 }
 0xed2   : > { %v8501_v13 = vpop.eup %8500 }
 0xed3   : > { %v4737_v9 = vadd.f32 1.0, %v8501_v13  ;;  %8514 = vpow2.f32 %v7030_v10 }
 0xed4   : > { %v8503_v20 = vpop.eup %8502 }
 0xed5   : > { %8516 = vrcp.f32 %v4737_v9  ;;  %v4736_v19 = vadd.f32 1.0, %v8503_v20  ;;  %v7033_v9 = vld [vmem:[%s10027_s6 + $0x4] ss:$0 sm:$0xff] }
 0xed6   : > { %v8505_v34 = vpop.eup %8504 }
 0xed7   : > { %8518 = vrcp.f32 %v4736_v19  ;;  %v4739_v41 = vadd.f32 1.0, %v8505_v34 }
 0xed8   : > { %v8507_v24 = vpop.eup %8506 }
 0xed9   : > { %8520 = vrcp.f32 %v4739_v41  ;;  %v4738_v45 = vadd.f32 1.0, %v8507_v24 }
 0xeda   : > { %v8509_v25 = vpop.eup %8508 }
 0xedb   : > { %8522 = vrcp.f32 %v4738_v45  ;;  %v4741_v17 = vadd.f32 1.0, %v8509_v25  ;;  %v5052_v25 = vld [vmem:[#allocation3 + $0x258] sm:$0xff] }
 0xedc   : > { %v8511_v37 = vpop.eup %8510  ;;  %8046 = vmatprep.subr.mxu1 %v5052_v25 }
 0xedd   : > { %8524 = vrcp.f32 %v4741_v17  ;;  %v4740_v48 = vadd.f32 1.0, %v8511_v37  ;;  %v5200_v17 = vld [vmem:[#allocation3 + $0x278] sm:$0xff]  ;;  %8047 = vmatpush3.msra.mxu1 %v5052_v25 }
 0xede   : > { %v8513_v40 = vpop.eup %8512  ;;  %8066 = vmatprep.subr.mxu0 %v5200_v17 }
 0xedf   : > { %8526 = vrcp.f32 %v4740_v48  ;;  %v4743_v36 = vadd.f32 1.0, %v8513_v40  ;;  %v5051_v48 = vld [vmem:[#allocation3 + $0x250] sm:$0xff] }
 0xee0   : > { %v8515_v33 = vpop.eup %8514  ;;  %v5199_v40 = vld [vmem:[#allocation3 + $0x270] sm:$0xff]  ;;  %8048 = vmatprep.subr.mxu1 %v5051_v48 }
 0xee1   : > { %8528 = vrcp.f32 %v4743_v36  ;;  %v4742_v11 = vadd.f32 1.0, %v8515_v33  ;;  %8049 = vmatpush3.msra.mxu1 %v5051_v48 }
 0xee2   : > { %v8517_v21 = vpop.eup %8516 }
 0xee3   : > { %8530 = vrcp.f32 %v4742_v11  ;;  %4770 = vrot.lane.b32.xlu1 %v8517_v21, %s8717_s26  ;;  %v5198_v21 = vld [vmem:[#allocation3 + $0x268] sm:$0xff] }
 0xee4   : > { %v8519_v28 = vpop.eup %8518  ;;  %8532 = vtanh.f32 %v9634_v27 }
 0xee5   : > { %4768 = vrot.lane.b32.xlu0 %v8519_v28, %s8717_s26  ;;  %8534 = vtanh.f32 %v9631_v15 }
 0xee6   : > { %v8521_v44 = vpop.eup %8520  ;;  %8536 = vtanh.f32 %v9640_v39 }
 0xee7   : > { %4774 = vrot.lane.b32.xlu1 %v8521_v44, %s8717_s26  ;;  %8538 = vtanh.f32 %v9637_v35 }
 0xee8   : > { %v8523_v49 = vpop.eup %8522  ;;  %8540 = vtanh.f32 %v4700_v2 }
 0xee9   : > { %4772 = vrot.lane.b32.xlu0 %v8523_v49, %s8717_s26  ;;  %8542 = vtanh.f32 %v9643_v61 }
 0xeea   : > { %v8525_v43 = vpop.eup %8524  ;;  %8544 = vtanh.f32 %v4702_v29 }
 0xeeb   : > { %4778 = vrot.lane.b32.xlu1 %v8525_v43, %s8717_s26  ;;  %8546 = vtanh.f32 %v4703_v38 }
 0xeec   : > { %v8527_v32 = vpop.eup %8526 }
 0xeed   : > { %4776 = vrot.lane.b32.xlu0 %v8527_v32, %s8717_s26 }
 0xeee   : > { %v8529_v50 = vpop.eup %8528 }
 0xeef   : > { %4782 = vrot.lane.b32.xlu1 %v8529_v50, %s8717_s26  ;;  %v5050_v50 = vld [vmem:[#allocation3 + $0x248] sm:$0xff] }
 0xef0   : > { %v8531_v51 = vpop.eup %8530  ;;  %8050 = vmatprep.subr.mxu1 %v5050_v50 }
 0xef1   : > { %4780 = vrot.lane.b32.xlu0 %v8531_v51, %s8717_s26  ;;  %v8533_v54 = vpop.eup %8532  ;;  %v5197_v51 = vld [vmem:[#allocation3 + $0x260] sm:$0xff]  ;;  %8051 = vmatpush3.msra.mxu1 %v5050_v50  ;;  %v5571_v50 = vld [vmem:[#allocation5 + $0xb0] sm:$0xff] }
 0xef2   : > { %v8535_v56 = vpop.eup %8534 }
 0xef3   : > { %v8537_v27 = vpop.eup %8536 }
 0xef4   : > { %v8539_v39 = vpop.eup %8538 }
 0xef5   : > { %v8541_v61 = vpop.eup %8540 }
 0xef6   : > { %v8543_v14 = vpop.eup %8542 }
 0xef7   : > { %v8545_v47 = vpop.eup %8544 }
 0xef8   : > { %v8547_v29 = vpop.eup %8546 }
 0xf55   : > { %v4771_v52 = vpop.permute.xlu1 %4770 }
 0xf56   : > { %v4793_v63 = vmul.f32 %v8535_v56, %v4771_v52  ;;  %v5049_v52 = vld [vmem:[#allocation3 + $0x240] sm:$0xff] }
 0xf57   : > { %v4769_v55 = vpop.permute.xlu0 %4768  ;;  %8052 = vmatprep.subr.mxu1 %v5049_v52 }
 0xf58   : > { %v4792_v58 = vmul.f32 %v8533_v54, %v4769_v55  ;;  %8053 = vmatpush3.msra.mxu1 %v5049_v52  ;;  %v5030_v54 = vld [vmem:[#allocation2 + $0x17] sm:$0xff] }
 0xf59   : > { %v4775_v0 = vpop.permute.xlu1 %4774  ;;  %v5334_v55 = vld [vmem:[#allocation3 + $0x298] sm:$0xff]  ;;  %8054 = vmatprep.mubr.msk.f32.mxu1 %vm571_vm1, %v5030_v54 }
 0xf5a   : > { %8034 = vmatprep.mubr.msk.f32.mxu0 %vm571_vm1, %v4792_v58  ;;  %v4795_v2 = vmul.f32 %v8539_v39, %v4775_v0  ;;  %8086 = vmatprep.subr.mxu1 %v5334_v55 }
 0xf5b   : > { %8035 = vmatmul.mubr.msk.f32.vlgmr.msra.gmra.mxu0 %vm571_vm1, %v4793_v63  ;;  %v4773_v15 = vpop.permute.xlu0 %4772 }
 0xf5c   : > { %v4794_v35 = vmul.f32 %v8537_v27, %v4773_v15  ;;  %8067 = vmatpush3.msra.mxu0 %v5200_v17 }
 0xf5d   : > { %v4779_v6 = vpop.permute.xlu1 %4778  ;;  %8068 = vmatprep.subr.mxu0 %v5199_v40 }
 0xf5e   : > { %8037 = vmatprep.mubr.msk.f32.mxu0 %vm571_vm1, %v4794_v35  ;;  %v4797_v38 = vmul.f32 %v8543_v14, %v4779_v6  ;;  %8069 = vmatpush3.msra.mxu0 %v5199_v40 }
 0xf5f   : > { %8038 = vmatmul.mubr.msk.f32.gmra.mxu0 %vm571_vm1, %v4795_v2  ;;  %v4777_v8 = vpop.permute.xlu0 %4776  ;;  %8070 = vmatprep.subr.mxu0 %v5198_v21 }
 0xf60   : > { %v4796_v5 = vmul.f32 %v8541_v61, %v4777_v8  ;;  %8071 = vmatpush3.msra.mxu0 %v5198_v21 }
 0xf61   : > { %v4783_v22 = vpop.permute.xlu1 %4782  ;;  %8072 = vmatprep.subr.mxu0 %v5197_v51 }
 0xf62   : > { %8040 = vmatprep.mubr.msk.f32.mxu0 %vm571_vm1, %v4796_v5  ;;  %v4799_v13 = vmul.f32 %v8547_v29, %v4783_v22  ;;  %8073 = vmatpush3.msra.mxu0 %v5197_v51  ;;  %v5332_v29 = vld [vmem:[#allocation3 + $0x288] sm:$0xff] }
 0xf63   : > { %8041 = vmatmul.mubr.msk.f32.gmra.mxu0 %vm571_vm1, %v4797_v38  ;;  %v4781_v7 = vpop.permute.xlu0 %4780  ;;  %v5570_v51 = vld [vmem:[#allocation5 + $0xa8] sm:$0xff] }
 0xf64   : > { %v4798_v10 = vmul.f32 %v8545_v47, %v4781_v7  ;;  %v5333_v47 = vld [vmem:[#allocation3 + $0x290] sm:$0xff] }
 0xf66   : > { %8043 = vmatprep.mubr.msk.f32.mxu0 %vm571_vm1, %v4798_v10 }
 0xf67   : > { %8044 = vmatmul.mubr.msk.f32.gmra.mxu0 %vm571_vm1, %v4799_v13 }
0x101b   : > { %v8036_v20 = vpop.f32.mrf.mxu0 }
0x101c   : > { %v9670_v19 = vadd.f32 %v8036_v20, %v7033_v9  ;;  %v5331_v20 = vld [vmem:[#allocation3 + $0x280] sm:$0xff] }
0x101d   : > { %v4903_v34 = vpop.f32.mrf.mxu0 }
0x101e   : > { %v9672_v4 = vadd.f32 %v7033_v9, %v4903_v34  ;;  %4952 = vrot.lane.b32.xlu1 %v9670_v19, %s8718_s16 }
0x101f   : > { %v8039_v41 = vpop.f32.mrf.mxu0 }
0x1020   : > { %v9676_v24 = vadd.f32 %v8039_v41, %v7033_v9  ;;  %4950 = vrot.lane.b32.xlu0 %v9672_v4, %s8718_s16 }
0x1021   : > { %v4913_v45 = vpop.f32.mrf.mxu0 }
0x1022   : > { %v9680_v37 = vadd.f32 %v7033_v9, %v4913_v45  ;;  %4956 = vrot.lane.b32.xlu1 %v9676_v24, %s8718_s16 }
0x1023   : > { %v8042_v36 = vpop.f32.mrf.mxu0 }
0x1024   : > { %v9684_v33 = vadd.f32 %v8042_v36, %v7033_v9  ;;  %4954 = vrot.lane.b32.xlu0 %v9680_v37, %s8718_s16 }
0x1025   : > { %v4923_v11 = vpop.f32.mrf.mxu0 }
0x1026   : > { %v9688_v28 = vadd.f32 %v7033_v9, %v4923_v11  ;;  %4960 = vrot.lane.b32.xlu1 %v9684_v33, %s8718_s16 }
0x1027   : > { %v8045_v44 = vpop.f32.mrf.mxu0 }
0x1028   : > { %v9692_v49 = vadd.f32 %v8045_v44, %v7033_v9  ;;  %4958 = vrot.lane.b32.xlu0 %v9688_v28, %s8718_s16  ;;  %v5045_v44 = vld [vmem:[#allocation2 + $0x61] sm:$0xff] }
0x1029   : > { %v4933_v43 = vpop.f32.mrf.mxu0 }
0x102a   : > { %v9696_v32 = vadd.f32 %v7033_v9, %v4933_v43  ;;  %4964 = vrot.lane.b32.xlu1 %v9692_v49, %s8718_s16  ;;  %v5572_v43 = vld [vmem:[#allocation5 + $0xb8] sm:$0xff] }
0x102b   : > { %8106 = vmatprep.subr.mxu0 %v5572_v43 }
0x102c   : > { %4962 = vrot.lane.b32.xlu0 %v9696_v32, %s8718_s16 }
0x1090   : > { %v4953_v56 = vpop.permute.xlu1 %4952 }
0x1091   : > { %v9704_v58 = vadd.f32 %v4953_v56, %v9557_v23 }
0x1092   : > { %v4951_v63 = vpop.permute.xlu0 %4950 }
0x1093   : > { %v9707_v0 = vadd.f32 %v4951_v63, %v9560_v12  ;;  %5000 = vrot.lane.b32.xlu1 %v9704_v58, %s8717_s26 }
0x1094   : > { %v4957_v27 = vpop.permute.xlu1 %4956 }
0x1095   : > { %v9712_v15 = vadd.f32 %v4957_v27, %v9565_v42  ;;  %4998 = vrot.lane.b32.xlu0 %v9707_v0, %s8717_s26 }
0x1096   : > { %v4955_v39 = vpop.permute.xlu0 %4954 }
0x1097   : > { %v9717_v35 = vadd.f32 %v4955_v39, %v9570_v26  ;;  %5004 = vrot.lane.b32.xlu1 %v9712_v15, %s8717_s26 }
0x1098   : > { %v4961_v23 = vpop.permute.xlu1 %4960 }
0x1099   : > { %v9722_v12 = vadd.f32 %v4961_v23, %v9575_v31  ;;  %5002 = vrot.lane.b32.xlu0 %v9717_v35, %s8717_s26  ;;  %v7051_v23 = vld [vmem:[%s10025_s4 + $0x6] ss:$0 sm:$0xff] }
0x109a   : > { %v4959_v2 = vpop.permute.xlu0 %4958 }
0x109b   : > { %v9727_v42 = vadd.f32 %v4959_v2, %v9580_v18  ;;  %5008 = vrot.lane.b32.xlu1 %v9722_v12, %s8717_s26 }
0x109c   : > { %v4965_v6 = vpop.permute.xlu1 %4964 }
0x109d   : > { %v9732_v26 = vadd.f32 %v4965_v6, %v9585_v1  ;;  %5006 = vrot.lane.b32.xlu0 %v9727_v42, %s8717_s26 }
0x109e   : > { %v4963_v61 = vpop.permute.xlu0 %4962 }
0x109f   : > { %v9737_v31 = vadd.f32 %v4963_v61, %v9590_v59  ;;  %5012 = vrot.lane.b32.xlu1 %v9732_v26, %s8717_s26 }
0x10a1   : > { %5010 = vrot.lane.b32.xlu0 %v9737_v31, %s8717_s26 }
0x1105   : > { %v5001_v18 = vpop.permute.xlu1 %5000 }
0x1106   : > { %5023 = vst.msk [vmem:[#allocation2 + $0x28] sm:$0xff] %vm571_vm1, %v5001_v18 }
0x1107   : > { %v4999_v8 = vpop.permute.xlu0 %4998 }
0x1108   : > { %5022 = vst.msk [vmem:[#allocation2 + $0x20] sm:$0xff] %vm571_vm1, %v4999_v8  ;;  %8074 = vmatprep.mubr.msk.f32.mxu0 %vm571_vm1, %v4999_v8 }
0x1109   : > { %v5005_v1 = vpop.permute.xlu1 %5004  ;;  %8075 = vmatmul.mubr.msk.f32.vlgmr.msra.gmra.mxu0 %vm571_vm1, %v5001_v18 }
0x110a   : > { %5025 = vst.msk [vmem:[#allocation2 + $0x38] sm:$0xff] %vm571_vm1, %v5005_v1  ;;  %8107 = vmatpush3.msra.mxu0 %v5572_v43 }
0x110b   : > { %v5003_v59 = vpop.permute.xlu0 %5002  ;;  %8108 = vmatprep.subr.mxu0 %v5571_v50 }
0x110c   : > { %5024 = vst.msk [vmem:[#allocation2 + $0x30] sm:$0xff] %vm571_vm1, %v5003_v59  ;;  %8077 = vmatprep.mubr.msk.f32.mxu0 %vm571_vm1, %v5003_v59  ;;  %8109 = vmatpush3.msra.mxu0 %v5571_v50 }
0x110d   : > { %v5009_v14 = vpop.permute.xlu1 %5008  ;;  %8078 = vmatmul.mubr.msk.f32.gmra.mxu0 %vm571_vm1, %v5005_v1  ;;  %8110 = vmatprep.subr.mxu0 %v5570_v51 }
0x110e   : > { %5027 = vst.msk [vmem:[#allocation2 + $0x48] sm:$0xff] %vm571_vm1, %v5009_v14  ;;  %8111 = vmatpush3.msra.mxu0 %v5570_v51 }
0x110f   : > { %v5007_v5 = vpop.permute.xlu0 %5006  ;;  %v5031_v38 = vld [vmem:[#allocation2 + $0x1f] sm:$0xff]  ;;  %v5032_v22 = vld [vmem:[#allocation2 + $0x27] sm:$0xff] }
0x1110   : > { %5026 = vst.msk [vmem:[#allocation2 + $0x40] sm:$0xff] %vm571_vm1, %v5007_v5  ;;  %8055 = vmatmul.mubr.msk.f32.vlgmr.msra.gmra.mxu1 %vm571_vm1, %v5031_v38  ;;  %8080 = vmatprep.mubr.msk.f32.mxu0 %vm571_vm1, %v5007_v5 }
0x1111   : > { %8087 = vmatpush3.msra.mxu1 %v5334_v55  ;;  %v5013_v7 = vpop.permute.xlu1 %5012  ;;  %8057 = vmatprep.mubr.msk.f32.mxu1 %vm571_vm1, %v5032_v22 }
0x1112   : > { %5029 = vst.msk [vmem:[#allocation2 + $0x58] sm:$0xff] %vm571_vm1, %v5013_v7  ;;  %8081 = vmatmul.mubr.msk.f32.gmra.mxu0 %vm571_vm1, %v5009_v14  ;;  %8088 = vmatprep.subr.mxu1 %v5333_v47 }
0x1113   : > { %v5011_v10 = vpop.permute.xlu0 %5010  ;;  %v5033_v13 = vld [vmem:[#allocation2 + $0x2f] sm:$0xff]  ;;  %8089 = vmatpush3.msra.mxu1 %v5333_v47  ;;  %v5034_v9 = vld [vmem:[#allocation2 + $0x37] sm:$0xff] }
0x1114   : > { %5028 = vst.msk [vmem:[#allocation2 + $0x50] sm:$0xff] %vm571_vm1, %v5011_v10  ;;  %8058 = vmatmul.mubr.msk.f32.gmra.mxu1 %vm571_vm1, %v5033_v13  ;;  %8083 = vmatprep.mubr.msk.f32.mxu0 %vm571_vm1, %v5011_v10  ;;  %v5038_v25 = vld [vmem:[#allocation2 + $0x29] sm:$0xff]  ;;  %v5039_v17 = vld [vmem:[#allocation2 + $0x31] sm:$0xff] }
0x1115   : > { %8060 = vmatprep.mubr.msk.f32.mxu1 %vm571_vm1, %v5034_v9  ;;  %8090 = vmatprep.subr.mxu1 %v5332_v29 }
0x1116   : > { %8084 = vmatmul.mubr.msk.f32.gmra.mxu0 %vm571_vm1, %v5013_v7  ;;  %8091 = vmatpush3.msra.mxu1 %v5332_v29 }
0x1117   : > { %v5035_v34 = vld [vmem:[#allocation2 + $0x3f] sm:$0xff]  ;;  %v5036_v41 = vld [vmem:[#allocation2 + $0x47] sm:$0xff]  ;;  %8092 = vmatprep.subr.mxu1 %v5331_v20 }
0x1118   : > { %8061 = vmatmul.mubr.msk.f32.gmra.mxu1 %vm571_vm1, %v5035_v34  ;;  %v5040_v48 = vld [vmem:[#allocation2 + $0x39] sm:$0xff]  ;;  %v5041_v40 = vld [vmem:[#allocation2 + $0x41] sm:$0xff] }
0x1119   : > { %8063 = vmatprep.mubr.msk.f32.mxu1 %vm571_vm1, %v5036_v41  ;;  %8093 = vmatpush3.msra.mxu1 %v5331_v20  ;;  %v5044_v21 = vld [vmem:[#allocation2 + $0x59] sm:$0xff] }
0x111b   : > { %v5037_v45 = vld [vmem:[#allocation2 + $0x4f] sm:$0xff] }
0x111c   : > { %8064 = vmatmul.mubr.msk.f32.gmra.mxu1 %vm571_vm1, %v5037_v45  ;;  %v5042_v36 = vld [vmem:[#allocation2 + $0x49] sm:$0xff]  ;;  %v5043_v11 = vld [vmem:[#allocation2 + $0x51] sm:$0xff] }
0x111d   : > { %8094 = vmatprep.mubr.msk.f32.mxu1 %vm571_vm1, %v5038_v25 }
0x1120   : > { %8095 = vmatmul.mubr.msk.f32.vlgmr.msra.gmra.mxu1 %vm571_vm1, %v5039_v17 }
0x1121   : > { %8097 = vmatprep.mubr.msk.f32.mxu1 %vm571_vm1, %v5040_v48 }
0x1124   : > { %8098 = vmatmul.mubr.msk.f32.gmra.mxu1 %vm571_vm1, %v5041_v40 }
0x1125   : > { %8100 = vmatprep.mubr.msk.f32.mxu1 %vm571_vm1, %v5042_v36 }
0x1128   : > { %8101 = vmatmul.mubr.msk.f32.gmra.mxu1 %vm571_vm1, %v5043_v11 }
0x1129   : > { %8103 = vmatprep.mubr.msk.f32.mxu1 %vm571_vm1, %v5044_v21 }
0x112c   : > { %8104 = vmatmul.mubr.msk.f32.gmra.mxu1 %vm571_vm1, %v5045_v44 }
0x11c9   : > { %v8076_v52 = vpop.f32.mrf.mxu0 }
0x11cb   : > { %v5283_v56 = vpop.f32.mrf.mxu0 }
0x11cd   : > { %v8079_v39 = vpop.f32.mrf.mxu0 }
0x11cf   : > { %v5293_v18 = vpop.f32.mrf.mxu0 }
0x11d0   : > { %v8056_v54 = vpop.f32.mrf.mxu1 }
0x11d1   : > { %v5189_v61 = vadd.f32 %v8056_v54, %v7051_v23 }
0x11d2   : > { %v5143_v55 = vpop.f32.mrf.mxu1  ;;  %v8082_v38 = vpop.f32.mrf.mxu0 }
0x11d3   : > { %v5188_v1 = vadd.f32 %v7051_v23, %v5143_v55  ;;  %v5323_v5 = vadd.f32 %v8076_v52, %v5189_v61 }
0x11d4   : > { %v8059_v63 = vpop.f32.mrf.mxu1  ;;  %v5303_v41 = vpop.f32.mrf.mxu0 }
0x11d5   : > { %v5191_v14 = vadd.f32 %v8059_v63, %v7051_v23  ;;  %v5322_v29 = vadd.f32 %v5283_v56, %v5188_v1 }
0x11d6   : > { %v5153_v27 = vpop.f32.mrf.mxu1  ;;  %v8085_v50 = vpop.f32.mrf.mxu0 }
0x11d7   : > { %v5190_v47 = vadd.f32 %v7051_v23, %v5153_v27  ;;  %v5325_v34 = vadd.f32 %v8079_v39, %v5191_v14 }
0x11d8   : > { %v8062_v2 = vpop.f32.mrf.mxu1 }
0x11d9   : > { %v5193_v10 = vadd.f32 %v8062_v2, %v7051_v23  ;;  %v5324_v40 = vadd.f32 %v5293_v18, %v5190_v47 }
0x11da   : > { %v5163_v6 = vpop.f32.mrf.mxu1 }
0x11db   : > { %v5192_v45 = vadd.f32 %v7051_v23, %v5163_v6  ;;  %v5327_v11 = vadd.f32 %v8082_v38, %v5193_v10  ;;  %v5313_v6 = vpop.f32.mrf.mxu0 }
0x11dc   : > { %v8065_v8 = vpop.f32.mrf.mxu1 }
0x11dd   : > { %v5195_v21 = vadd.f32 %v8065_v8, %v7051_v23  ;;  %v5326_v52 = vadd.f32 %v5303_v41, %v5192_v45 }
0x11de   : > { %v5173_v59 = vpop.f32.mrf.mxu1 }
0x11df   : > { %v5194_v54 = vadd.f32 %v7051_v23, %v5173_v59  ;;  %v5329_v2 = vadd.f32 %v8085_v50, %v5195_v21 }
0x11e0   : > { %v8096_v22 = vpop.f32.mrf.mxu1 }
0x11e1   : > { %v9777_v7 = vadd.f32 %v8096_v22, %v5323_v5  ;;  %v5328_v1 = vadd.f32 %v5313_v6, %v5194_v54 }
0x11e2   : > { %v5425_v13 = vpop.f32.mrf.mxu1 }
0x11e3   : > { %v7069_v9 = vmul.f32 -1.442695, %v9777_v7  ;;  %v9780_v20 = vadd.f32 %v5425_v13, %v5322_v29  ;;  %v5569_v13 = vld [vmem:[#allocation5 + $0xa0] sm:$0xff] }
0x11e4   : > { %v8099_v25 = vpop.f32.mrf.mxu1  ;;  %8112 = vmatprep.subr.mxu0 %v5569_v13 }
0x11e5   : > { %8548 = vpow2.f32 %v7069_v9  ;;  %v7068_v17 = vmul.f32 -1.442695, %v9780_v20  ;;  %v9783_v48 = vadd.f32 %v8099_v25, %v5325_v34  ;;  %8113 = vmatpush3.msra.mxu0 %v5569_v13 }
0x11e6   : > { %v5435_v36 = vpop.f32.mrf.mxu1 }
0x11e7   : > { %8550 = vpow2.f32 %v7068_v17  ;;  %v7071_v44 = vmul.f32 -1.442695, %v9783_v48  ;;  %v9786_v43 = vadd.f32 %v5435_v36, %v5324_v40 }
0x11e8   : > { %v8102_v51 = vpop.f32.mrf.mxu1 }
0x11e9   : > { %8552 = vpow2.f32 %v7071_v44  ;;  %v7070_v55 = vmul.f32 -1.442695, %v9786_v43  ;;  %v9789_v56 = vadd.f32 %v8102_v51, %v5327_v11 }
0x11ea   : > { %v5445_v63 = vpop.f32.mrf.mxu1 }
0x11eb   : > { %8554 = vpow2.f32 %v7070_v55  ;;  %v7073_v27 = vmul.f32 -1.442695, %v9789_v56  ;;  %v5468_v39 = vadd.f32 %v5445_v63, %v5326_v52 }
0x11ec   : > { %v8105_v61 = vpop.f32.mrf.mxu1 }
0x11ed   : > { %8556 = vpow2.f32 %v7073_v27  ;;  %v7072_v18 = vmul.f32 -1.442695, %v5468_v39  ;;  %v5471_v8 = vadd.f32 %v8105_v61, %v5329_v2 }
0x11ee   : > { %v5455_v14 = vpop.f32.mrf.mxu1 }
0x11ef   : > { %8558 = vpow2.f32 %v7072_v18  ;;  %v7075_v23 = vmul.f32 -1.442695, %v5471_v8  ;;  %v5470_v59 = vadd.f32 %v5455_v14, %v5328_v1 }
0x11f1   : > { %8560 = vpow2.f32 %v7075_v23  ;;  %v7074_v5 = vmul.f32 -1.442695, %v5470_v59 }
0x11f2   : > { %v8549_v38 = vpop.eup %8548 }
0x11f3   : > { %v5505_v22 = vadd.f32 1.0, %v8549_v38  ;;  %8562 = vpow2.f32 %v7074_v5 }
0x11f4   : > { %v8551_v47 = vpop.eup %8550 }
0x11f5   : > { %8564 = vrcp.f32 %v5505_v22  ;;  %v5504_v29 = vadd.f32 1.0, %v8551_v47 }
0x11f6   : > { %v8553_v10 = vpop.eup %8552 }
0x11f7   : > { %8566 = vrcp.f32 %v5504_v29  ;;  %v5507_v9 = vadd.f32 1.0, %v8553_v10 }
0x11f8   : > { %v8555_v34 = vpop.eup %8554 }
0x11f9   : > { %8568 = vrcp.f32 %v5507_v9  ;;  %v5506_v41 = vadd.f32 1.0, %v8555_v34 }
0x11fa   : > { %v8557_v45 = vpop.eup %8556 }
0x11fb   : > { %8570 = vrcp.f32 %v5506_v41  ;;  %v5509_v25 = vadd.f32 1.0, %v8557_v45  ;;  %v7077_v45 = vld [vmem:[%s10027_s6 + $0x5] ss:$0 sm:$0xff] }
0x11fc   : > { %v8559_v17 = vpop.eup %8558 }
0x11fd   : > { %8572 = vrcp.f32 %v5509_v25  ;;  %v5508_v40 = vadd.f32 1.0, %v8559_v17  ;;  %v4983_v17 = vadd.f32 %v9670_v19, %v9524_v57  ;;  %v5820_v19 = vld [vmem:[#allocation3 + $0x2b8] sm:$0xff] }
0x11fe   : > { %v8561_v36 = vpop.eup %8560  ;;  %8126 = vmatprep.subr.mxu1 %v5820_v19 }
0x11ff   : > { %8574 = vrcp.f32 %v5508_v40  ;;  %v5511_v11 = vadd.f32 1.0, %v8561_v36  ;;  %8127 = vmatpush3.msra.mxu1 %v5820_v19 }
0x1200   : > { %v8563_v21 = vpop.eup %8562 }
0x1201   : > { %8576 = vrcp.f32 %v5511_v11  ;;  %v5510_v44 = vadd.f32 1.0, %v8563_v21  ;;  %v4982_v11 = vadd.f32 %v9672_v4, %v9526_v60  ;;  %v4984_v60 = vadd.f32 %v9680_v37, %v9534_v3 }
0x1202   : > { %v8565_v50 = vpop.eup %8564  ;;  %v4986_v37 = vadd.f32 %v9688_v28, %v9542_v46  ;;  %v4988_v28 = vadd.f32 %v9696_v32, %v9550_v53  ;;  %v6102_v53 = vld [vmem:[#allocation3 + $0x2f8] sm:$0xff] }
0x1203   : > { %8578 = vrcp.f32 %v5510_v44  ;;  %5538 = vrot.lane.b32.xlu1 %v8565_v50, %s8717_s26  ;;  %v5800_v32 = vld [vmem:[#allocation2 + $0x15] sm:$0xff] }
0x1204   : > { %v8567_v51 = vpop.eup %8566  ;;  %8580 = vtanh.f32 %v9780_v20 }
0x1205   : > { %5536 = vrot.lane.b32.xlu0 %v8567_v51, %s8717_s26  ;;  %8582 = vtanh.f32 %v9777_v7  ;;  %v4985_v51 = vadd.f32 %v9676_v24, %v9530_v62  ;;  %v5818_v62 = vld [vmem:[#allocation3 + $0x2a8] sm:$0xff]  ;;  %v4987_v24 = vadd.f32 %v9684_v33, %v9538_v16 }
0x1206   : > { %v8569_v52 = vpop.eup %8568  ;;  %8584 = vtanh.f32 %v9786_v43 }
0x1207   : > { %5542 = vrot.lane.b32.xlu1 %v8569_v52, %s8717_s26  ;;  %8586 = vtanh.f32 %v9783_v48 }
0x1208   : > { %v8571_v54 = vpop.eup %8570  ;;  %8588 = vtanh.f32 %v5468_v39 }
0x1209   : > { %5540 = vrot.lane.b32.xlu0 %v8571_v54, %s8717_s26  ;;  %8590 = vtanh.f32 %v9789_v56 }
0x120a   : > { %v8573_v55 = vpop.eup %8572  ;;  %8592 = vtanh.f32 %v5470_v59 }
0x120b   : > { %5546 = vrot.lane.b32.xlu1 %v8573_v55, %s8717_s26  ;;  %8594 = vtanh.f32 %v5471_v8  ;;  %v5819_v55 = vld [vmem:[#allocation3 + $0x2b0] sm:$0xff] }
0x120c   : > { %v8575_v63 = vpop.eup %8574  ;;  %8128 = vmatprep.subr.mxu1 %v5819_v55 }
0x120d   : > { %5544 = vrot.lane.b32.xlu0 %v8575_v63, %s8717_s26  ;;  %v5968_v63 = vld [vmem:[#allocation3 + $0x2d8] sm:$0xff]  ;;  %8129 = vmatpush3.msra.mxu1 %v5819_v55 }
0x120e   : > { %v8577_v27 = vpop.eup %8576  ;;  %8146 = vmatprep.subr.mxu0 %v5968_v63  ;;  %8130 = vmatprep.subr.mxu1 %v5818_v62 }
0x120f   : > { %5550 = vrot.lane.b32.xlu1 %v8577_v27, %s8717_s26  ;;  %8131 = vmatpush3.msra.mxu1 %v5818_v62 }
0x1210   : > { %v8579_v2 = vpop.eup %8578 }
0x1211   : > { %5548 = vrot.lane.b32.xlu0 %v8579_v2, %s8717_s26  ;;  %v8581_v61 = vpop.eup %8580 }
0x1212   : > { %v8583_v1 = vpop.eup %8582 }
0x1213   : > { %v8585_v20 = vpop.eup %8584 }
0x1214   : > { %v8587_v43 = vpop.eup %8586 }
0x1215   : > { %v8589_v56 = vpop.eup %8588 }
0x1216   : > { %v8591_v59 = vpop.eup %8590 }
0x1217   : > { %v8593_v10 = vpop.eup %8592 }
0x1218   : > { %v8595_v9 = vpop.eup %8594 }
0x1275   : > { %v5539_v6 = vpop.permute.xlu1 %5538 }
0x1276   : > { %v5561_v23 = vmul.f32 %v8583_v1, %v5539_v6 }
0x1277   : > { %v5537_v18 = vpop.permute.xlu0 %5536 }
0x1278   : > { %v5560_v14 = vmul.f32 %v8581_v61, %v5537_v18  ;;  %v5967_v61 = vld [vmem:[#allocation3 + $0x2d0] sm:$0xff] }
0x1279   : > { %v5543_v5 = vpop.permute.xlu1 %5542 }
0x127a   : > { %8114 = vmatprep.mubr.msk.f32.mxu0 %vm571_vm1, %v5560_v14  ;;  %v5563_v39 = vmul.f32 %v8587_v43, %v5543_v5  ;;  %v5817_v14 = vld [vmem:[#allocation3 + $0x2a0] sm:$0xff]  ;;  %v4989_v5 = vadd.f32 %v9692_v49, %v9546_v30 }
0x127b   : > { %8115 = vmatmul.mubr.msk.f32.vlgmr.msra.gmra.mxu0 %vm571_vm1, %v5561_v23  ;;  %v5541_v7 = vpop.permute.xlu0 %5540  ;;  %v5966_v23 = vld [vmem:[#allocation3 + $0x2c8] sm:$0xff]  ;;  %8132 = vmatprep.subr.mxu1 %v5817_v14 }
0x127c   : > { %v5562_v48 = vmul.f32 %v8585_v20, %v5541_v7  ;;  %8147 = vmatpush3.msra.mxu0 %v5968_v63  ;;  %8133 = vmatpush3.msra.mxu1 %v5817_v14  ;;  %v5798_v49 = vld [vmem:[#allocation2 + $0x5] sm:$0xff] }
0x127d   : > { %v5547_v38 = vpop.permute.xlu1 %5546  ;;  %8148 = vmatprep.subr.mxu0 %v5967_v61  ;;  %8134 = vmatprep.mubr.msk.f32.mxu1 %vm571_vm1, %v5798_v49 }
0x127e   : > { %8117 = vmatprep.mubr.msk.f32.mxu0 %vm571_vm1, %v5562_v48  ;;  %v5565_v47 = vmul.f32 %v8591_v59, %v5547_v38  ;;  %8149 = vmatpush3.msra.mxu0 %v5967_v61  ;;  %v5965_v38 = vld [vmem:[#allocation3 + $0x2c0] sm:$0xff]  ;;  %v5813_v61 = vld [vmem:[#allocation2 + $0x73] sm:$0xff] }
0x127f   : > { %8118 = vmatmul.mubr.msk.f32.gmra.mxu0 %vm571_vm1, %v5563_v39  ;;  %v5545_v8 = vpop.permute.xlu0 %5544  ;;  %8150 = vmatprep.subr.mxu0 %v5966_v23  ;;  %v5799_v39 = vld [vmem:[#allocation2 + $0xd] sm:$0xff] }
0x1280   : > { %v5564_v22 = vmul.f32 %v8589_v56, %v5545_v8  ;;  %8151 = vmatpush3.msra.mxu0 %v5966_v23  ;;  %8135 = vmatmul.mubr.msk.f32.vlgmr.msra.gmra.mxu1 %vm571_vm1, %v5799_v39  ;;  %v6101_v56 = vld [vmem:[#allocation3 + $0x2f0] sm:$0xff] }
0x1281   : > { %v5551_v29 = vpop.permute.xlu1 %5550  ;;  %8152 = vmatprep.subr.mxu0 %v5965_v38  ;;  %8166 = vmatprep.subr.mxu1 %v6102_v53 }
0x1282   : > { %8120 = vmatprep.mubr.msk.f32.mxu0 %vm571_vm1, %v5564_v22  ;;  %v5567_v41 = vmul.f32 %v8595_v9, %v5551_v29  ;;  %8153 = vmatpush3.msra.mxu0 %v5965_v38  ;;  %v6099_v9 = vld [vmem:[#allocation3 + $0x2e0] sm:$0xff] }
0x1283   : > { %8121 = vmatmul.mubr.msk.f32.gmra.mxu0 %vm571_vm1, %v5565_v47  ;;  %v5549_v13 = vpop.permute.xlu0 %5548  ;;  %8167 = vmatpush3.msra.mxu1 %v6102_v53  ;;  %v6100_v47 = vld [vmem:[#allocation3 + $0x2e8] sm:$0xff] }
0x1284   : > { %v5566_v34 = vmul.f32 %v8593_v10, %v5549_v13  ;;  %8137 = vmatprep.mubr.msk.f32.mxu1 %vm571_vm1, %v5800_v32  ;;  %8168 = vmatprep.subr.mxu1 %v6101_v56 }
0x1285   : > { %8169 = vmatpush3.msra.mxu1 %v6101_v56 }
0x1286   : > { %8123 = vmatprep.mubr.msk.f32.mxu0 %vm571_vm1, %v5566_v34  ;;  %8170 = vmatprep.subr.mxu1 %v6100_v47 }
0x1287   : > { %8124 = vmatmul.mubr.msk.f32.gmra.mxu0 %vm571_vm1, %v5567_v41  ;;  %8171 = vmatpush3.msra.mxu1 %v6100_v47 }
0x1288   : > { %8172 = vmatprep.subr.mxu1 %v6099_v9 }
0x1289   : > { %8173 = vmatpush3.msra.mxu1 %v6099_v9 }
0x133b   : > { %v8116_v25 = vpop.f32.mrf.mxu0 }
0x133c   : > { %v5677_v40 = vadd.f32 %v8116_v25, %v7077_v45 }
0x133d   : > { %v5671_v36 = vpop.f32.mrf.mxu0 }
0x133e   : > { %v5672_v21 = vadd.f32 %v7077_v45, %v5671_v36  ;;  %5720 = vrot.lane.b32.xlu1 %v5677_v40, %s8718_s16  ;;  %v9821_v44 = vadd.f32 %v5677_v40, %v4983_v17 }
0x133f   : > { %v8119_v50 = vpop.f32.mrf.mxu0 }
0x1340   : > { %v5687_v52 = vadd.f32 %v8119_v50, %v7077_v45  ;;  %5718 = vrot.lane.b32.xlu0 %v5672_v21, %s8718_s16  ;;  %v9826_v54 = vadd.f32 %v5672_v21, %v4982_v11  ;;  %v8136_v14 = vpop.f32.mrf.mxu1 }
0x1341   : > { %v5681_v57 = vpop.f32.mrf.mxu0 }
0x1342   : > { %v5682_v4 = vadd.f32 %v7077_v45, %v5681_v57  ;;  %5724 = vrot.lane.b32.xlu1 %v5687_v52, %s8718_s16  ;;  %v9831_v27 = vadd.f32 %v5687_v52, %v4985_v51 }
0x1343   : > { %v8122_v2 = vpop.f32.mrf.mxu0 }
0x1344   : > { %v5697_v6 = vadd.f32 %v8122_v2, %v7077_v45  ;;  %5722 = vrot.lane.b32.xlu0 %v5682_v4, %s8718_s16  ;;  %v9836_v18 = vadd.f32 %v5682_v4, %v4984_v60 }
0x1345   : > { %v5691_v3 = vpop.f32.mrf.mxu0 }
0x1346   : > { %v5692_v1 = vadd.f32 %v7077_v45, %v5691_v3  ;;  %5728 = vrot.lane.b32.xlu1 %v5697_v6, %s8718_s16  ;;  %v9841_v16 = vadd.f32 %v5697_v6, %v4987_v24  ;;  %v5811_v24 = vld [vmem:[#allocation2 + $0x63] sm:$0xff]  ;;  %v5812_v6 = vld [vmem:[#allocation2 + $0x6b] sm:$0xff]  ;;  %v7123_v3 = vld [vmem:[%s10028_s7 + $0x38] sm:$0xff] }
0x1347   : > { %v8125_v33 = vpop.f32.mrf.mxu0  ;;  %8186 = vmatprep.subr.mxu0 %v7123_v3 }
0x1348   : > { %v5707_v20 = vadd.f32 %v8125_v33, %v7077_v45  ;;  %5726 = vrot.lane.b32.xlu0 %v5692_v1, %s8718_s16  ;;  %v9846_v7 = vadd.f32 %v5692_v1, %v4986_v37  ;;  %v7122_v37 = vld [vmem:[%s10028_s7 + $0x30] sm:$0xff]  ;;  %v7121_v1 = vld [vmem:[%s10028_s7 + $0x28] sm:$0xff]  ;;  %v5911_v33 = vpop.f32.mrf.mxu1 }
0x1349   : > { %v5701_v46 = vpop.f32.mrf.mxu0 }
0x134a   : > { %v5702_v43 = vadd.f32 %v7077_v45, %v5701_v46  ;;  %5732 = vrot.lane.b32.xlu1 %v5707_v20, %s8718_s16  ;;  %v9851_v48 = vadd.f32 %v5707_v20, %v4989_v5 }
0x134c   : > { %5730 = vrot.lane.b32.xlu0 %v5702_v43, %s8718_s16  ;;  %v9854_v30 = vadd.f32 %v5702_v43, %v4988_v28  ;;  %v7095_v28 = vld [vmem:[%s10025_s4 + $0x7] ss:$0 sm:$0xff] }
0x134d   : > { %v5957_v38 = vadd.f32 %v8136_v14, %v7095_v28  ;;  %v5956_v56 = vadd.f32 %v7095_v28, %v5911_v33 }
0x13b0   : > { %v5721_v8 = vpop.permute.xlu1 %5720 }
0x13b1   : > { %v5743_v59 = vadd.f32 %v5721_v8, %v9704_v58 }
0x13b2   : > { %v5719_v22 = vpop.permute.xlu0 %5718 }
0x13b3   : > { %v5742_v29 = vadd.f32 %v5719_v22, %v9707_v0  ;;  %5768 = vrot.lane.b32.xlu1 %v5743_v59, %s8717_s26 }
0x13b4   : > { %v5725_v10 = vpop.permute.xlu1 %5724 }
0x13b5   : > { %v5745_v13 = vadd.f32 %v5725_v10, %v9712_v15  ;;  %5766 = vrot.lane.b32.xlu0 %v5742_v29, %s8717_s26 }
0x13b6   : > { %v5723_v34 = vpop.permute.xlu0 %5722 }
0x13b7   : > { %v5744_v41 = vadd.f32 %v5723_v34, %v9717_v35  ;;  %5772 = vrot.lane.b32.xlu1 %v5745_v13, %s8717_s26 }
0x13b8   : > { %v5729_v58 = vpop.permute.xlu1 %5728 }
0x13b9   : > { %v5747_v0 = vadd.f32 %v5729_v58, %v9722_v12  ;;  %5770 = vrot.lane.b32.xlu0 %v5744_v41, %s8717_s26 }
0x13ba   : > { %v5727_v45 = vpop.permute.xlu0 %5726 }
0x13bb   : > { %v5746_v25 = vadd.f32 %v5727_v45, %v9727_v42  ;;  %5776 = vrot.lane.b32.xlu1 %v5747_v0, %s8717_s26 }
0x13bc   : > { %v5733_v15 = vpop.permute.xlu1 %5732 }
0x13bd   : > { %v5749_v17 = vadd.f32 %v5733_v15, %v9732_v26  ;;  %5774 = vrot.lane.b32.xlu0 %v5746_v25, %s8717_s26 }
0x13be   : > { %v5731_v40 = vpop.permute.xlu0 %5730 }
0x13bf   : > { %v5748_v35 = vadd.f32 %v5731_v40, %v9737_v31  ;;  %5780 = vrot.lane.b32.xlu1 %v5749_v17, %s8717_s26 }
0x13c1   : > { %5778 = vrot.lane.b32.xlu0 %v5748_v35, %s8717_s26 }
0x1425   : > { %v5769_v12 = vpop.permute.xlu1 %5768 }
0x1426   : > { %5791 = vst.msk [vmem:[#allocation2 + $0x28] sm:$0xff] %vm571_vm1, %v5769_v12 }
0x1427   : > { %v5767_v36 = vpop.permute.xlu0 %5766 }
0x1428   : > { %5790 = vst.msk [vmem:[#allocation2 + $0x20] sm:$0xff] %vm571_vm1, %v5767_v36  ;;  %8154 = vmatprep.mubr.msk.f32.mxu0 %vm571_vm1, %v5767_v36 }
0x1429   : > { %v5773_v42 = vpop.permute.xlu1 %5772  ;;  %8155 = vmatmul.mubr.msk.f32.vlgmr.msra.gmra.mxu0 %vm571_vm1, %v5769_v12 }
0x142a   : > { %5793 = vst.msk [vmem:[#allocation2 + $0x38] sm:$0xff] %vm571_vm1, %v5773_v42  ;;  %8187 = vmatpush3.msra.mxu0 %v7123_v3 }
0x142b   : > { %v5771_v26 = vpop.permute.xlu0 %5770  ;;  %8188 = vmatprep.subr.mxu0 %v7122_v37 }
0x142c   : > { %5792 = vst.msk [vmem:[#allocation2 + $0x30] sm:$0xff] %vm571_vm1, %v5771_v26  ;;  %8157 = vmatprep.mubr.msk.f32.mxu0 %vm571_vm1, %v5771_v26  ;;  %8189 = vmatpush3.msra.mxu0 %v7122_v37 }
0x142d   : > { %v5777_v31 = vpop.permute.xlu1 %5776  ;;  %8158 = vmatmul.mubr.msk.f32.gmra.mxu0 %vm571_vm1, %v5773_v42  ;;  %8190 = vmatprep.subr.mxu0 %v7121_v1 }
0x142e   : > { %5795 = vst.msk [vmem:[#allocation2 + $0x48] sm:$0xff] %vm571_vm1, %v5777_v31  ;;  %8191 = vmatpush3.msra.mxu0 %v7121_v1 }
0x142f   : > { %v5775_v11 = vpop.permute.xlu0 %5774  ;;  %v5801_v21 = vld [vmem:[#allocation2 + $0x1d] sm:$0xff]  ;;  %v5802_v50 = vld [vmem:[#allocation2 + $0x25] sm:$0xff] }
0x1430   : > { %5794 = vst.msk [vmem:[#allocation2 + $0x40] sm:$0xff] %vm571_vm1, %v5775_v11  ;;  %8138 = vmatmul.mubr.msk.f32.gmra.mxu1 %vm571_vm1, %v5801_v21  ;;  %8160 = vmatprep.mubr.msk.f32.mxu0 %vm571_vm1, %v5775_v11 }
0x1431   : > { %v5781_v51 = vpop.permute.xlu1 %5780  ;;  %8140 = vmatprep.mubr.msk.f32.mxu1 %vm571_vm1, %v5802_v50  ;;  %8161 = vmatmul.mubr.msk.f32.gmra.mxu0 %vm571_vm1, %v5777_v31 }
0x1432   : > { %5797 = vst.msk [vmem:[#allocation2 + $0x58] sm:$0xff] %vm571_vm1, %v5781_v51 }
0x1433   : > { %v5779_v52 = vpop.permute.xlu0 %5778  ;;  %v5803_v57 = vld [vmem:[#allocation2 + $0x2d] sm:$0xff]  ;;  %v5804_v19 = vld [vmem:[#allocation2 + $0x35] sm:$0xff] }
0x1434   : > { %5796 = vst.msk [vmem:[#allocation2 + $0x50] sm:$0xff] %vm571_vm1, %v5779_v52  ;;  %8141 = vmatmul.mubr.msk.f32.gmra.mxu1 %vm571_vm1, %v5803_v57  ;;  %8163 = vmatprep.mubr.msk.f32.mxu0 %vm571_vm1, %v5779_v52 }
0x1435   : > { %8143 = vmatprep.mubr.msk.f32.mxu1 %vm571_vm1, %v5804_v19  ;;  %8164 = vmatmul.mubr.msk.f32.gmra.mxu0 %vm571_vm1, %v5781_v51 }
0x1437   : > { %v5805_v55 = vld [vmem:[#allocation2 + $0x3d] sm:$0xff] }
0x1438   : > { %v5806_v63 = vld [vmem:[#allocation2 + $0x3b] sm:$0xff]  ;;  %8144 = vmatmul.mubr.msk.f32.gmra.mxu1 %vm571_vm1, %v5805_v55  ;;  %v5807_v60 = vld [vmem:[#allocation2 + $0x43] sm:$0xff] }
0x1439   : > { %8174 = vmatprep.mubr.msk.f32.mxu1 %vm571_vm1, %v5806_v63  ;;  %v5810_v62 = vld [vmem:[#allocation2 + $0x5b] sm:$0xff] }
0x143b   : > { %v5808_v4 = vld [vmem:[#allocation2 + $0x4b] sm:$0xff]  ;;  %v5809_v2 = vld [vmem:[#allocation2 + $0x53] sm:$0xff] }
0x143c   : > { %8175 = vmatmul.mubr.msk.f32.vlgmr.msra.gmra.mxu1 %vm571_vm1, %v5807_v60 }
0x143d   : > { %8177 = vmatprep.mubr.msk.f32.mxu1 %vm571_vm1, %v5808_v4 }
0x1440   : > { %8178 = vmatmul.mubr.msk.f32.gmra.mxu1 %vm571_vm1, %v5809_v2 }
0x1441   : > { %8180 = vmatprep.mubr.msk.f32.mxu1 %vm571_vm1, %v5810_v62 }
0x1444   : > { %8181 = vmatmul.mubr.msk.f32.gmra.mxu1 %vm571_vm1, %v5811_v24 }
0x1445   : > { %8183 = vmatprep.mubr.msk.f32.mxu1 %vm571_vm1, %v5812_v6 }
0x1448   : > { %8184 = vmatmul.mubr.msk.f32.gmra.mxu1 %vm571_vm1, %v5813_v61 }
0x14e9   : > { %v8156_v23 = vpop.f32.mrf.mxu0 }
0x14ea   : > { %v6091_v59 = vadd.f32 %v8156_v23, %v5957_v38 }
0x14eb   : > { %v6051_v5 = vpop.f32.mrf.mxu0 }
0x14ec   : > { %v6090_v10 = vadd.f32 %v6051_v5, %v5956_v56 }
0x14ed   : > { %v8159_v43 = vpop.f32.mrf.mxu0 }
0x14ef   : > { %v6061_v53 = vpop.f32.mrf.mxu0 }
0x14f0   : > { %v8139_v20 = vpop.f32.mrf.mxu1 }
0x14f1   : > { %v5959_v22 = vadd.f32 %v8139_v20, %v7095_v28  ;;  %v8162_v47 = vpop.f32.mrf.mxu0 }
0x14f2   : > { %v5921_v46 = vpop.f32.mrf.mxu1 }
0x14f3   : > { %v5958_v13 = vadd.f32 %v7095_v28, %v5921_v46  ;;  %v6093_v45 = vadd.f32 %v8159_v43, %v5959_v22  ;;  %v6071_v25 = vpop.f32.mrf.mxu0 }
0x14f4   : > { %v8142_v49 = vpop.f32.mrf.mxu1 }
0x14f5   : > { %v5961_v34 = vadd.f32 %v8142_v49, %v7095_v28  ;;  %v6092_v12 = vadd.f32 %v6061_v53, %v5958_v13  ;;  %v8165_v21 = vpop.f32.mrf.mxu0 }
0x14f6   : > { %v5931_v39 = vpop.f32.mrf.mxu1 }
0x14f7   : > { %v5960_v15 = vadd.f32 %v7095_v28, %v5931_v39  ;;  %v6095_v42 = vadd.f32 %v8162_v47, %v5961_v34  ;;  %v6081_v2 = vpop.f32.mrf.mxu0 }
0x14f8   : > { %v8145_v32 = vpop.f32.mrf.mxu1 }
0x14f9   : > { %v5963_v26 = vadd.f32 %v8145_v32, %v7095_v28  ;;  %v6094_v51 = vadd.f32 %v6071_v25, %v5960_v15 }
0x14fa   : > { %v5941_v8 = vpop.f32.mrf.mxu1 }
0x14fb   : > { %v5962_v52 = vadd.f32 %v7095_v28, %v5941_v8  ;;  %v6097_v4 = vadd.f32 %v8165_v21, %v5963_v26  ;;  %v7120_v28 = vld [vmem:[%s10028_s7 + $0x20] sm:$0xff] }
0x14fc   : > { %v8176_v29 = vpop.f32.mrf.mxu1  ;;  %8192 = vmatprep.subr.mxu0 %v7120_v28 }
0x14fd   : > { %v9916_v9 = vadd.f32 %v8176_v29, %v6091_v59  ;;  %v6096_v61 = vadd.f32 %v6081_v2, %v5962_v52  ;;  %8193 = vmatpush3.msra.mxu0 %v7120_v28  ;;  %v6519_v28 = vld [vmem:[%s10030_s9 + $0x8] sm:$0xff] }
0x14fe   : > { %v6193_v41 = vpop.f32.mrf.mxu1 }
0x14ff   : > { %v7113_v58 = vmul.f32 -1.442695, %v9916_v9  ;;  %v9919_v0 = vadd.f32 %v6193_v41, %v6090_v10 }
0x1500   : > { %v8179_v17 = vpop.f32.mrf.mxu1 }
0x1501   : > { %8596 = vpow2.f32 %v7113_v58  ;;  %v7112_v40 = vmul.f32 -1.442695, %v9919_v0  ;;  %v9922_v35 = vadd.f32 %v8179_v17, %v6093_v45 }
0x1502   : > { %v6203_v36 = vpop.f32.mrf.mxu1 }
0x1503   : > { %8598 = vpow2.f32 %v7112_v40  ;;  %v7115_v31 = vmul.f32 -1.442695, %v9922_v35  ;;  %v9925_v11 = vadd.f32 %v6203_v36, %v6092_v12 }
0x1504   : > { %v8182_v50 = vpop.f32.mrf.mxu1 }
0x1505   : > { %8600 = vpow2.f32 %v7115_v31  ;;  %v7114_v57 = vmul.f32 -1.442695, %v9925_v11  ;;  %v9928_v19 = vadd.f32 %v8182_v50, %v6095_v42 }
0x1506   : > { %v6213_v55 = vpop.f32.mrf.mxu1 }
0x1507   : > { %8602 = vpow2.f32 %v7114_v57  ;;  %v7117_v63 = vmul.f32 -1.442695, %v9928_v19  ;;  %v6236_v60 = vadd.f32 %v6213_v55, %v6094_v51 }
0x1508   : > { %v8185_v62 = vpop.f32.mrf.mxu1 }
0x1509   : > { %8604 = vpow2.f32 %v7117_v63  ;;  %v7116_v24 = vmul.f32 -1.442695, %v6236_v60  ;;  %v6239_v6 = vadd.f32 %v8185_v62, %v6097_v4 }
0x150a   : > { %v6223_v3 = vpop.f32.mrf.mxu1 }
0x150b   : > { %8606 = vpow2.f32 %v7116_v24  ;;  %v7119_v37 = vmul.f32 -1.442695, %v6239_v6  ;;  %v6238_v1 = vadd.f32 %v6223_v3, %v6096_v61  ;;  %v7125_v24 = vld [vmem:[%s10029_s8 + $0x1] ss:$0 sm:$0xff] }
0x150d   : > { %8608 = vpow2.f32 %v7119_v37  ;;  %v7118_v14 = vmul.f32 -1.442695, %v6238_v1 }
0x150e   : > { %v8597_v23 = vpop.eup %8596 }
0x150f   : > { %v6273_v33 = vadd.f32 1.0, %v8597_v23  ;;  %8610 = vpow2.f32 %v7118_v14 }
0x1510   : > { %v8599_v5 = vpop.eup %8598 }
0x1511   : > { %8612 = vrcp.f32 %v6273_v33  ;;  %v6272_v20 = vadd.f32 1.0, %v8599_v5  ;;  %v6521_v33 = vld [vmem:[%s10030_s9 + $0x18] sm:$0xff]  ;;  %v6520_v5 = vld [vmem:[%s10030_s9 + $0x10] sm:$0xff] }
0x1512   : > { %v8601_v46 = vpop.eup %8600  ;;  %8206 = vmatprep.subr.mxu1 %v6521_v33 }
0x1513   : > { %8614 = vrcp.f32 %v6272_v20  ;;  %v6275_v43 = vadd.f32 1.0, %v8601_v46  ;;  %8207 = vmatpush3.msra.mxu1 %v6521_v33 }
0x1514   : > { %v8603_v49 = vpop.eup %8602  ;;  %8208 = vmatprep.subr.mxu1 %v6520_v5 }
0x1515   : > { %8616 = vrcp.f32 %v6275_v43  ;;  %v6274_v39 = vadd.f32 1.0, %v8603_v49  ;;  %8209 = vmatpush3.msra.mxu1 %v6520_v5 }
0x1516   : > { %v8605_v38 = vpop.eup %8604  ;;  %8210 = vmatprep.subr.mxu1 %v6519_v28 }
0x1517   : > { %8618 = vrcp.f32 %v6274_v39  ;;  %v6277_v53 = vadd.f32 1.0, %v8605_v38  ;;  %v6518_v39 = vld [vmem:[%s10030_s9] sm:$0xff]  ;;  %8211 = vmatpush3.msra.mxu1 %v6519_v28 }
0x1518   : > { %v8607_v32 = vpop.eup %8606  ;;  %8212 = vmatprep.subr.mxu1 %v6518_v39 }
0x1519   : > { %8620 = vrcp.f32 %v6277_v53  ;;  %v6276_v56 = vadd.f32 1.0, %v8607_v32  ;;  %8213 = vmatpush3.msra.mxu1 %v6518_v39 }
0x151a   : > { %v8609_v8 = vpop.eup %8608 }
0x151b   : > { %8622 = vrcp.f32 %v6276_v56  ;;  %v6279_v59 = vadd.f32 1.0, %v8609_v8 }
0x151c   : > { %v8611_v22 = vpop.eup %8610 }
0x151d   : > { %8624 = vrcp.f32 %v6279_v59  ;;  %v6278_v47 = vadd.f32 1.0, %v8611_v22 }
0x151e   : > { %v8613_v29 = vpop.eup %8612 }
0x151f   : > { %8626 = vrcp.f32 %v6278_v47  ;;  %6306 = vrot.lane.b32.xlu1 %v8613_v29, %s8717_s26 }
0x1520   : > { %v8615_v10 = vpop.eup %8614  ;;  %8628 = vtanh.f32 %v9919_v0 }
0x1521   : > { %6304 = vrot.lane.b32.xlu0 %v8615_v10, %s8717_s26  ;;  %8630 = vtanh.f32 %v9916_v9 }
0x1522   : > { %v8617_v13 = vpop.eup %8616  ;;  %8632 = vtanh.f32 %v9925_v11 }
0x1523   : > { %6310 = vrot.lane.b32.xlu1 %v8617_v13, %s8717_s26  ;;  %8634 = vtanh.f32 %v9922_v35 }
0x1524   : > { %v8619_v34 = vpop.eup %8618  ;;  %8636 = vtanh.f32 %v6236_v60 }
0x1525   : > { %6308 = vrot.lane.b32.xlu0 %v8619_v34, %s8717_s26  ;;  %8638 = vtanh.f32 %v9928_v19 }
0x1526   : > { %v8621_v41 = vpop.eup %8620  ;;  %8640 = vtanh.f32 %v6238_v1 }
0x1527   : > { %6314 = vrot.lane.b32.xlu1 %v8621_v41, %s8717_s26  ;;  %8642 = vtanh.f32 %v6239_v6 }
0x1528   : > { %v8623_v58 = vpop.eup %8622 }
0x1529   : > { %6312 = vrot.lane.b32.xlu0 %v8623_v58, %s8717_s26 }
0x152a   : > { %v8625_v45 = vpop.eup %8624 }
0x152b   : > { %6318 = vrot.lane.b32.xlu1 %v8625_v45, %s8717_s26 }
0x152c   : > { %v8627_v25 = vpop.eup %8626 }
0x152d   : > { %6316 = vrot.lane.b32.xlu0 %v8627_v25, %s8717_s26  ;;  %v8629_v17 = vpop.eup %8628 }
0x152e   : > { %v8631_v12 = vpop.eup %8630 }
0x152f   : > { %v8633_v0 = vpop.eup %8632 }
0x1530   : > { %v8635_v31 = vpop.eup %8634 }
0x1531   : > { %v8637_v50 = vpop.eup %8636 }
0x1532   : > { %v8639_v52 = vpop.eup %8638 }
0x1533   : > { %v8641_v63 = vpop.eup %8640 }
0x1534   : > { %v8643_v4 = vpop.eup %8642 }
0x1591   : > { %v6307_v15 = vpop.permute.xlu1 %6306 }
0x1592   : > { %v6329_v42 = vmul.f32 %v8631_v12, %v6307_v15 }
0x1593   : > { %v6305_v40 = vpop.permute.xlu0 %6304 }
0x1594   : > { %v6328_v36 = vmul.f32 %v8629_v17, %v6305_v40 }
0x1595   : > { %v6311_v26 = vpop.permute.xlu1 %6310 }
0x1596   : > { %8194 = vmatprep.mubr.msk.f32.mxu0 %vm571_vm1, %v6328_v36  ;;  %v6331_v11 = vmul.f32 %v8635_v31, %v6311_v26 }
0x1597   : > { %8195 = vmatmul.mubr.msk.f32.vlgmr.msra.gmra.mxu0 %vm571_vm1, %v6329_v42  ;;  %v6309_v9 = vpop.permute.xlu0 %6308  ;;  %v7134_v42 = vld [vmem:[%s10031_s10] ss:$0 sm:$0xff] }
0x1598   : > { %v6330_v35 = vmul.f32 %v8633_v0, %v6309_v9 }
0x1599   : > { %v6315_v21 = vpop.permute.xlu1 %6314 }
0x159a   : > { %8197 = vmatprep.mubr.msk.f32.mxu0 %vm571_vm1, %v6330_v35  ;;  %v6333_v19 = vmul.f32 %v8639_v52, %v6315_v21 }
0x159b   : > { %8198 = vmatmul.mubr.msk.f32.gmra.mxu0 %vm571_vm1, %v6331_v11  ;;  %v6313_v51 = vpop.permute.xlu0 %6312 }
0x159c   : > { %v6332_v57 = vmul.f32 %v8637_v50, %v6313_v51 }
0x159d   : > { %v6319_v55 = vpop.permute.xlu1 %6318 }
0x159e   : > { %8200 = vmatprep.mubr.msk.f32.mxu0 %vm571_vm1, %v6332_v57  ;;  %v6335_v62 = vmul.f32 %v8643_v4, %v6319_v55 }
0x159f   : > { %8201 = vmatmul.mubr.msk.f32.gmra.mxu0 %vm571_vm1, %v6333_v19  ;;  %v6317_v60 = vpop.permute.xlu0 %6316 }
0x15a0   : > { %v6334_v2 = vmul.f32 %v8641_v63, %v6317_v60 }
0x15a2   : > { %8203 = vmatprep.mubr.msk.f32.mxu0 %vm571_vm1, %v6334_v2 }
0x15a3   : > { %8204 = vmatmul.mubr.msk.f32.gmra.mxu0 %vm571_vm1, %v6335_v62 }
0x1657   : > { %v8196_v6 = vpop.f32.mrf.mxu0 }
0x1658   : > { %v6445_v61 = vadd.f32 %v8196_v6, %v7125_v24 }
0x1659   : > { %v6439_v3 = vpop.f32.mrf.mxu0 }
0x165a   : > { %v6440_v37 = vadd.f32 %v7125_v24, %v6439_v3  ;;  %6488 = vrot.lane.b32.xlu1 %v6445_v61, %s8718_s16 }
0x165b   : > { %v8199_v1 = vpop.f32.mrf.mxu0 }
0x165c   : > { %v6455_v14 = vadd.f32 %v8199_v1, %v7125_v24  ;;  %6486 = vrot.lane.b32.xlu0 %v6440_v37, %s8718_s16 }
0x165d   : > { %v6449_v23 = vpop.f32.mrf.mxu0 }
0x165e   : > { %v6450_v20 = vadd.f32 %v7125_v24, %v6449_v23  ;;  %6492 = vrot.lane.b32.xlu1 %v6455_v14, %s8718_s16 }
0x165f   : > { %v8202_v46 = vpop.f32.mrf.mxu0 }
0x1660   : > { %v6465_v43 = vadd.f32 %v8202_v46, %v7125_v24  ;;  %6490 = vrot.lane.b32.xlu0 %v6450_v20, %s8718_s16 }
0x1661   : > { %v6459_v49 = vpop.f32.mrf.mxu0 }
0x1662   : > { %v6460_v38 = vadd.f32 %v7125_v24, %v6459_v49  ;;  %6496 = vrot.lane.b32.xlu1 %v6465_v43, %s8718_s16 }
0x1663   : > { %v8205_v53 = vpop.f32.mrf.mxu0 }
0x1664   : > { %v6475_v32 = vadd.f32 %v8205_v53, %v7125_v24  ;;  %6494 = vrot.lane.b32.xlu0 %v6460_v38, %s8718_s16 }
0x1665   : > { %v6469_v56 = vpop.f32.mrf.mxu0 }
0x1666   : > { %v6470_v8 = vadd.f32 %v7125_v24, %v6469_v56  ;;  %6500 = vrot.lane.b32.xlu1 %v6475_v32, %s8718_s16 }
0x1668   : > { %6498 = vrot.lane.b32.xlu0 %v6470_v8, %s8718_s16 }
0x16cc   : > { %v6489_v59 = vpop.permute.xlu1 %6488 }
0x16cd   : > { %v6511_v22 = vadd.f32 %v6489_v59, %v9821_v44 }
0x16ce   : > { %v6487_v47 = vpop.permute.xlu0 %6486 }
0x16cf   : > { %v6510_v29 = vadd.f32 %v6487_v47, %v9826_v54  ;;  %6539 = vrot.lane.b32.xlu1 %v6511_v22, %s8717_s26 }
0x16d0   : > { %v6493_v10 = vpop.permute.xlu1 %6492 }
0x16d1   : > { %v6513_v13 = vadd.f32 %v6493_v10, %v9831_v27  ;;  %6537 = vrot.lane.b32.xlu0 %v6510_v29, %s8717_s26 }
0x16d2   : > { %v6491_v34 = vpop.permute.xlu0 %6490 }
0x16d3   : > { %v6512_v41 = vadd.f32 %v6491_v34, %v9836_v18  ;;  %6543 = vrot.lane.b32.xlu1 %v6513_v13, %s8717_s26 }
0x16d4   : > { %v6497_v58 = vpop.permute.xlu1 %6496 }
0x16d5   : > { %v6515_v45 = vadd.f32 %v6497_v58, %v9841_v16  ;;  %6541 = vrot.lane.b32.xlu0 %v6512_v41, %s8717_s26 }
0x16d6   : > { %v6495_v44 = vpop.permute.xlu0 %6494 }
0x16d7   : > { %v6514_v54 = vadd.f32 %v6495_v44, %v9846_v7  ;;  %6547 = vrot.lane.b32.xlu1 %v6515_v45, %s8717_s26 }
0x16d8   : > { %v6501_v25 = vpop.permute.xlu1 %6500 }
0x16d9   : > { %v6517_v27 = vadd.f32 %v6501_v25, %v9851_v48  ;;  %6545 = vrot.lane.b32.xlu0 %v6514_v54, %s8717_s26 }
0x16da   : > { %v6499_v15 = vpop.permute.xlu0 %6498 }
0x16db   : > { %v6516_v18 = vadd.f32 %v6499_v15, %v9854_v30  ;;  %6551 = vrot.lane.b32.xlu1 %v6517_v27, %s8717_s26 }
0x16dd   : > { %6549 = vrot.lane.b32.xlu0 %v6516_v18, %s8717_s26 }
0x1741   : > { %v6540_v16 = vpop.permute.xlu1 %6539 }
0x1743   : > { %v6538_v17 = vpop.permute.xlu0 %6537 }
0x1744   : > { %8214 = vmatprep.mubr.msk.f32.mxu1 %vm571_vm1, %v6538_v17 }
0x1745   : > { %v6544_v7 = vpop.permute.xlu1 %6543  ;;  %8215 = vmatmul.mubr.msk.f32.vlgmr.msra.gmra.mxu1 %vm571_vm1, %v6540_v16 }
0x1747   : > { %v6542_v40 = vpop.permute.xlu0 %6541 }
0x1748   : > { %8217 = vmatprep.mubr.msk.f32.mxu1 %vm571_vm1, %v6542_v40 }
0x1749   : > { %8218 = vmatmul.mubr.msk.f32.gmra.mxu1 %vm571_vm1, %v6544_v7  ;;  %v6548_v48 = vpop.permute.xlu1 %6547 }
0x174b   : > { %v6546_v12 = vpop.permute.xlu0 %6545 }
0x174c   : > { %8220 = vmatprep.mubr.msk.f32.mxu1 %vm571_vm1, %v6546_v12 }
0x174d   : > { %8221 = vmatmul.mubr.msk.f32.gmra.mxu1 %vm571_vm1, %v6548_v48  ;;  %v6552_v36 = vpop.permute.xlu1 %6551 }
0x174f   : > { %v6550_v30 = vpop.permute.xlu0 %6549 }
0x1750   : > { %8223 = vmatprep.mubr.msk.f32.mxu1 %vm571_vm1, %v6550_v30 }
0x1751   : > { %8224 = vmatmul.mubr.msk.f32.gmra.mxu1 %vm571_vm1, %v6552_v36 }
0x1805   : > { %v8216_v26 = vpop.f32.mrf.mxu1 }
0x1806   : > { %v6641_v0 = vadd.f32 %v8216_v26, %v7134_v42 }
0x1807   : > { %v6635_v9 = vpop.f32.mrf.mxu1 }
0x1808   : > { %6675 = vst.msk [vmem:[%s416_s25 + $0x8] sm:$0xff] %vm571_vm1, %v6641_v0  ;;  %v6636_v31 = vadd.f32 %v7134_v42, %v6635_v9 }
0x1809   : > { %v8219_v35 = vpop.f32.mrf.mxu1 }
0x180a   : > { %6674 = vst.msk [vmem:[%s416_s25] sm:$0xff] %vm571_vm1, %v6636_v31  ;;  %v6651_v11 = vadd.f32 %v8219_v35, %v7134_v42 }
0x180b   : > { %v6645_v21 = vpop.f32.mrf.mxu1 }
0x180c   : > { %6677 = vst.msk [vmem:[%s416_s25 + $0x18] sm:$0xff] %vm571_vm1, %v6651_v11  ;;  %v6646_v50 = vadd.f32 %v7134_v42, %v6645_v21 }
0x180d   : > { %v8222_v51 = vpop.f32.mrf.mxu1 }
0x180e   : > { %6676 = vst.msk [vmem:[%s416_s25 + $0x10] sm:$0xff] %vm571_vm1, %v6646_v50  ;;  %v6661_v52 = vadd.f32 %v8222_v51, %v7134_v42 }
0x180f   : > { %v6655_v57 = vpop.f32.mrf.mxu1 }
0x1810   : > { %6679 = vst.msk [vmem:[%s416_s25 + $0x28] sm:$0xff] %vm571_vm1, %v6661_v52  ;;  %v6656_v19 = vadd.f32 %v7134_v42, %v6655_v57 }
0x1811   : > { %v8225_v55 = vpop.f32.mrf.mxu1 }
0x1812   : > { %6678 = vst.msk [vmem:[%s416_s25 + $0x20] sm:$0xff] %vm571_vm1, %v6656_v19  ;;  %v6671_v63 = vadd.f32 %v8225_v55, %v7134_v42 }
0x1813   : > { %v6665_v60 = vpop.f32.mrf.mxu1 }
0x1814   : > { %6681 = vst.msk [vmem:[%s416_s25 + $0x38] sm:$0xff] %vm571_vm1, %v6671_v63  ;;  %v6666_v4 = vadd.f32 %v7134_v42, %v6665_v60 }
0x1816   : > { %6680 = vst.msk [vmem:[%s416_s25 + $0x30] sm:$0xff] %vm571_vm1, %v6666_v4 }
0x1817 PF: > { %s23_s17 = sadd.s32 1, %s8710_s17  }
0x1818   : > { %p20_p2 = scmp.ge.s32.totalorder %s23_s17, 4  }
0x181a   :  { %22 = sbr.rel (!%p20_p2) target bundleno = 2 (0x2), region = 145 }
0x181f   :  { %6703 = vsyncpa [#allocation4], 1 }
0x1820   :  { %6705 = vsyncpa [#allocation4 + $0x1], 1 }
0x1821   :  { %6706 = vsyncpa [#allocation6], 1 }

</bundles_post_ra>
